<compile_context>
chip_gen: v7x
topology: tpu7x:2x2x1
jax: 0.10.0
libtpu: 0.0.40
codegen_flags: <defaults>
</compile_context>

<pallas_src>
import jax
import jax.numpy as jnp
from jax import lax
from jax.experimental import pallas as pl
from jax.experimental.pallas import tpu as pltpu


def _round_up(n, m):
    return ((n + m - 1) // m) * m


def _st_projector_kernel(x_ref, adj_ref, wg_ref, bg_ref, w1b_ref, w1j_ref,
                         b1_ref, w2_ref, b2_ref, o_ref, hf_ref):
    """One grid step processes TB samples (sublane-dense batched tiles)."""
    TB, V, C = x_ref.shape
    conv = wg_ref.shape[1]

    wg = wg_ref[...]                                   # (C, conv)  VMEM-resident
    bg = bg_ref[...]                                   # (1, conv)

    # Per-joint slabs via strided ref loads; V is tiny and static.
    xs = [x_ref[:, v, :] for v in range(V)]            # each (TB, C)
    arow = [adj_ref[:, v, :] for v in range(V)]        # each (TB, V)

    # d_v = (deg_v + 1e-5)^-1/2  (EUP rsqrt).
    dis = [lax.rsqrt(jnp.sum(arow[v], axis=-1, keepdims=True) + 1e-5)
           for v in range(V)]                          # each (TB, 1)

    # support_w = x_w @ Wg  (M=TB MXU dots), pre-scaled by d_w.
    dS = [dis[w] * jnp.dot(xs[w], wg, preferred_element_type=jnp.float32)
          for w in range(V)]                           # each (TB, conv)

    # h_v = relu(d_v * sum_w A[:,v,w] * dS_w + bg)  -- VPU broadcast-FMA over
    # the 6-wide neighbor axis (keeps the MXU slot free).  Written into the
    # flattened-joint scratch so Flatten + Linear1(joint) is ONE K=V*conv dot.
    for v in range(V):
        acc = arow[v][:, 0:1] * dS[0]
        for w in range(1, V):
            acc = acc + arow[v][:, w:w + 1] * dS[w]
        hf_ref[:, v * conv:(v + 1) * conv] = jnp.maximum(dis[v] * acc + bg, 0.0)

    # Body branch: mean over the logical V joints (never a padded count).
    body = xs[0]
    for v in range(1, V):
        body = body + xs[v]
    body = body * (1.0 / float(V))                     # (TB, C)

    # Linear1 split by the cat structure -> no concat / flatten relayout.
    z1 = (jnp.dot(body, w1b_ref[...], preferred_element_type=jnp.float32)
          + jnp.dot(hf_ref[...], w1j_ref[...], preferred_element_type=jnp.float32)
          + b1_ref[...])                               # (TB, OUT)
    a1 = jnp.maximum(z1, 0.0)

    # Linear2 + L2 normalize (F.normalize, eps=1e-12).
    z2 = jnp.dot(a1, w2_ref[...], preferred_element_type=jnp.float32) + b2_ref[...]
    nrm = jnp.sqrt(jnp.sum(z2 * z2, axis=-1, keepdims=True))
    o_ref[...] = (z2 / jnp.maximum(nrm, 1e-12)).astype(o_ref.dtype)


def prepare_st_projector_params(wg, bg, w1, b1, w2, b2, num_clusters):
    """One-time parameter plumbing -- keep OUT of the per-call hot path.

    wg: (C, conv); bg: (conv,); w1: (OUT, C + V*conv); b1: (OUT,);
    w2: (OUT, OUT); b2: (OUT,)."""
    C, conv = wg.shape
    OUT = w1.shape[0]
    V = num_clusters
    w1t = jnp.transpose(w1).astype(jnp.float32)        # (C + V*conv, OUT)
    return dict(
        wg=wg.astype(jnp.float32),                     # (C, conv)
        bg=bg.reshape(1, conv).astype(jnp.float32),    # (1, conv)
        w1b=w1t[:C],                                   # (C, OUT)   body slab
        w1j=w1t[C:],                                   # (V*conv, OUT) joint slab (Flatten order v-major)
        b1=b1.reshape(1, OUT).astype(jnp.float32),
        w2=jnp.transpose(w2).astype(jnp.float32),      # (OUT, OUT)
        b2=b2.reshape(1, OUT).astype(jnp.float32),
        V=V, conv=conv, OUT=OUT,
    )


def st_projector(x, adj, params, *, tb=128):
    """x: (B, V, C); adj: (B, V, V); params from prepare_st_projector_params."""
    B, V, C = x.shape
    conv, OUT = params["conv"], params["OUT"]
    assert params["V"] == V and params["w1j"].shape == (V * conv, OUT)

    # TB samples per grid step (multiple of 8 -> dense (8,128) output stores);
    # pad B to a multiple of TB (zero-padded rows are harmless: deg=0 -> finite
    # rsqrt, h=0; they are sliced off below).
    tb = max(8, (tb // 8) * 8)
    TB = min(tb, _round_up(B, 8))
    Bp = _round_up(B, TB)
    if Bp != B:
        pad = Bp - B
        x = jnp.pad(x, ((0, pad), (0, 0), (0, 0)))
        adj = jnp.pad(adj, ((0, pad), (0, 0), (0, 0)))

    flops = Bp * (2 * V * C * conv + 2 * V * V * conv + 2 * C * OUT
                  + 2 * V * conv * OUT + 2 * OUT * OUT + 4 * OUT)
    bytes_accessed = 4 * (x.size + adj.size + Bp * OUT
                          + params["wg"].size + params["bg"].size
                          + params["w1b"].size + params["w1j"].size
                          + params["b1"].size + params["w2"].size
                          + params["b2"].size)
    transcendentals = Bp * (V + 2)

    out = pl.pallas_call(
        _st_projector_kernel,
        out_shape=jax.ShapeDtypeStruct((Bp, OUT), x.dtype),
        grid_spec=pltpu.PrefetchScalarGridSpec(
            num_scalar_prefetch=0,
            grid=(Bp // TB,),
            in_specs=[
                pl.BlockSpec((TB, V, C), lambda b: (b, 0, 0)),      # x tile
                pl.BlockSpec((TB, V, V), lambda b: (b, 0, 0)),      # adj tile
                pl.BlockSpec((C, conv), lambda b: (0, 0)),          # Wg (resident)
                pl.BlockSpec((1, conv), lambda b: (0, 0)),          # bg
                pl.BlockSpec((C, OUT), lambda b: (0, 0)),           # W1 body slab
                pl.BlockSpec((V * conv, OUT), lambda b: (0, 0)),    # W1 joint slab
                pl.BlockSpec((1, OUT), lambda b: (0, 0)),           # b1
                pl.BlockSpec((OUT, OUT), lambda b: (0, 0)),         # W2^T
                pl.BlockSpec((1, OUT), lambda b: (0, 0)),           # b2
            ],
            out_specs=pl.BlockSpec((TB, OUT), lambda b: (b, 0)),
            scratch_shapes=[pltpu.VMEM((TB, V * conv), jnp.float32)],
        ),
        compiler_params=pltpu.CompilerParams(
            dimension_semantics=("parallel",),
        ),
        cost_estimate=pl.CostEstimate(flops=int(flops),
                                      transcendentals=int(transcendentals),
                                      bytes_accessed=int(bytes_accessed)),
    )(x, adj, params["wg"], params["bg"], params["w1b"], params["w1j"],
      params["b1"], params["w2"], params["b2"])
    return out[:B]


def reference(x, adj, wg, bg, w1, b1, w2, b2):
    """Pure-JAX reference mirroring the PyTorch STProjector exactly."""
    deg_inv_sqrt = (jnp.sum(adj, axis=-1) + 1e-5) ** (-0.5)          # (B, V)
    D = jax.vmap(jnp.diag)(deg_inv_sqrt)                             # (B, V, V)
    adj_norm = jnp.matmul(jnp.matmul(D, adj), D)
    support = jnp.matmul(x, wg)                                      # (B, V, conv)
    h = jnp.maximum(jnp.matmul(adj_norm, support) + bg, 0.0)
    joint = h.reshape(x.shape[0], -1)                                # Flatten
    body = jnp.mean(x, axis=1)
    cat = jnp.concatenate([body, joint], axis=1)
    z1 = jnp.maximum(cat @ w1.T + b1, 0.0)
    z2 = z1 @ w2.T + b2
    n = jnp.sqrt(jnp.sum(z2 * z2, axis=-1, keepdims=True))
    return z2 / jnp.maximum(n, 1e-12)                                # F.normalize


if __name__ == "__main__":
    # Module defaults: in_channels=128, num_clusters(V)=6, conv_dim=32, out=128
    B, V = 2, 6
    C_IN, CONV, OUT = 128, 32, 128

    key = jax.random.PRNGKey(0)
    kx, ka, kwg, kw1, kb1, kw2, kb2 = jax.random.split(key, 7)

    x = jax.random.normal(kx, (B, V, C_IN), jnp.float32)
    adj = jax.random.uniform(ka, (B, V, V), jnp.float32)             # nonneg adjacency
    adj = 0.5 * (adj + jnp.transpose(adj, (0, 2, 1)))                # symmetric

    # GCN params: xavier_uniform weight, zero bias (reset_parameters)
    xav = jnp.sqrt(6.0 / (C_IN + CONV))
    wg = jax.random.uniform(kwg, (C_IN, CONV), jnp.float32, -xav, xav)
    bg = jnp.zeros((CONV,), jnp.float32)

    # Linear params: PyTorch default U(-1/sqrt(fan_in), 1/sqrt(fan_in))
    d_cat = C_IN + V * CONV
    bnd1 = 1.0 / jnp.sqrt(jnp.float32(d_cat))
    w1 = jax.random.uniform(kw1, (OUT, d_cat), jnp.float32, -bnd1, bnd1)
    b1 = jax.random.uniform(kb1, (OUT,), jnp.float32, -bnd1, bnd1)
    bnd2 = 1.0 / jnp.sqrt(jnp.float32(OUT))
    w2 = jax.random.uniform(kw2, (OUT, OUT), jnp.float32, -bnd2, bnd2)
    b2 = jax.random.uniform(kb2, (OUT,), jnp.float32, -bnd2, bnd2)

    # One-time parameter prep (hoisted out of the per-call path).
    params = prepare_st_projector_params(wg, bg, w1, b1, w2, b2, num_clusters=V)

    out = jax.block_until_ready(st_projector(x, adj, params))
    ref = reference(x, adj, wg, bg, w1, b1, w2, b2)
    assert out.shape == (B, OUT)
    assert jnp.allclose(out, ref, atol=1e-4, rtol=1e-4), "mismatch vs reference"

    # Exercise a multi-step grid + batch padding (B not a multiple of TB).
    B2 = 20
    kx2, ka2 = jax.random.split(jax.random.PRNGKey(1), 2)
    x2 = jax.random.normal(kx2, (B2, V, C_IN), jnp.float32)
    adj2 = jax.random.uniform(ka2, (B2, V, V), jnp.float32)
    adj2 = 0.5 * (adj2 + jnp.transpose(adj2, (0, 2, 1)))
    out2 = jax.block_until_ready(st_projector(x2, adj2, params, tb=8))
    ref2 = reference(x2, adj2, wg, bg, w1, b1, w2, b2)
    assert out2.shape == (B2, OUT)
    assert jnp.allclose(out2, ref2, atol=1e-4, rtol=1e-4), "mismatch vs reference (batched)"

    print("KERNEL_OK")
</pallas_src>

<mosaic_0001>
module attributes {stable_mosaic.version = 11 : i64} {
  func.func @_st_projector_kernel(%arg0: i32, %arg1: memref<8x6x128xf32, #tpu.memory_space<vmem>>, %arg2: memref<8x6x6xf32, #tpu.memory_space<vmem>>, %arg3: memref<128x32xf32, #tpu.memory_space<vmem>>, %arg4: memref<1x32xf32, #tpu.memory_space<vmem>>, %arg5: memref<128x128xf32, #tpu.memory_space<vmem>>, %arg6: memref<192x128xf32, #tpu.memory_space<vmem>>, %arg7: memref<1x128xf32, #tpu.memory_space<vmem>>, %arg8: memref<128x128xf32, #tpu.memory_space<vmem>>, %arg9: memref<1x128xf32, #tpu.memory_space<vmem>>, %arg10: memref<8x128xf32, #tpu.memory_space<vmem>>, %arg11: memref<8x192xf32, #tpu.memory_space<vmem>>) attributes {dimension_semantics = [#tpu.dimension_semantics<parallel>], iteration_bounds = array<i64: 1>, scalar_prefetch = 0 : i64, scratch_operands = 1 : i64, tpu.core_type = #tpu.core_type<tc>, window_params = [{transform_indices = @transform_0, window_bounds = array<i64: 8, 6, 128>}, {transform_indices = @transform_1, window_bounds = array<i64: 8, 6, 6>}, {pipeline_mode = #tpu.pipeline_mode<synchronous>, transform_indices = @transform_2, window_bounds = array<i64: 128, 32>}, {pipeline_mode = #tpu.pipeline_mode<synchronous>, transform_indices = @transform_3, window_bounds = array<i64: 1, 32>}, {pipeline_mode = #tpu.pipeline_mode<synchronous>, transform_indices = @transform_4, window_bounds = array<i64: 128, 128>}, {pipeline_mode = #tpu.pipeline_mode<synchronous>, transform_indices = @transform_5, window_bounds = array<i64: 192, 128>}, {pipeline_mode = #tpu.pipeline_mode<synchronous>, transform_indices = @transform_6, window_bounds = array<i64: 1, 128>}, {pipeline_mode = #tpu.pipeline_mode<synchronous>, transform_indices = @transform_7, window_bounds = array<i64: 128, 128>}, {pipeline_mode = #tpu.pipeline_mode<synchronous>, transform_indices = @transform_8, window_bounds = array<i64: 1, 128>}, {transform_indices = @transform_9, window_bounds = array<i64: 8, 128>}]} {
    %c0 = arith.constant 0 : index
    %c0_0 = arith.constant 0 : index
    %0 = vector.load %arg3[%c0, %c0_0] : memref<128x32xf32, #tpu.memory_space<vmem>>, vector<128x32xf32>
    %c0_1 = arith.constant 0 : index
    %c0_2 = arith.constant 0 : index
    %1 = vector.load %arg4[%c0_1, %c0_2] : memref<1x32xf32, #tpu.memory_space<vmem>>, vector<1x32xf32>
    %c0_3 = arith.constant 0 : index
    %c0_4 = arith.constant 0 : index
    %c0_5 = arith.constant 0 : index
    %2 = vector.load %arg1[%c0_3, %c0_4, %c0_5] : memref<8x6x128xf32, #tpu.memory_space<vmem>>, vector<8x1x128xf32>
    %3 = vector.shape_cast %2 : vector<8x1x128xf32> to vector<8x128xf32>
    %c0_6 = arith.constant 0 : index
    %c1 = arith.constant 1 : index
    %c0_7 = arith.constant 0 : index
    %4 = vector.load %arg1[%c0_6, %c1, %c0_7] : memref<8x6x128xf32, #tpu.memory_space<vmem>>, vector<8x1x128xf32>
    %5 = vector.shape_cast %4 : vector<8x1x128xf32> to vector<8x128xf32>
    %c0_8 = arith.constant 0 : index
    %c2 = arith.constant 2 : index
    %c0_9 = arith.constant 0 : index
    %6 = vector.load %arg1[%c0_8, %c2, %c0_9] : memref<8x6x128xf32, #tpu.memory_space<vmem>>, vector<8x1x128xf32>
    %7 = vector.shape_cast %6 : vector<8x1x128xf32> to vector<8x128xf32>
    %c0_10 = arith.constant 0 : index
    %c3 = arith.constant 3 : index
    %c0_11 = arith.constant 0 : index
    %8 = vector.load %arg1[%c0_10, %c3, %c0_11] : memref<8x6x128xf32, #tpu.memory_space<vmem>>, vector<8x1x128xf32>
    %9 = vector.shape_cast %8 : vector<8x1x128xf32> to vector<8x128xf32>
    %c0_12 = arith.constant 0 : index
    %c4 = arith.constant 4 : index
    %c0_13 = arith.constant 0 : index
    %10 = vector.load %arg1[%c0_12, %c4, %c0_13] : memref<8x6x128xf32, #tpu.memory_space<vmem>>, vector<8x1x128xf32>
    %11 = vector.shape_cast %10 : vector<8x1x128xf32> to vector<8x128xf32>
    %c0_14 = arith.constant 0 : index
    %c5 = arith.constant 5 : index
    %c0_15 = arith.constant 0 : index
    %12 = vector.load %arg1[%c0_14, %c5, %c0_15] : memref<8x6x128xf32, #tpu.memory_space<vmem>>, vector<8x1x128xf32>
    %13 = vector.shape_cast %12 : vector<8x1x128xf32> to vector<8x128xf32>
    %c0_16 = arith.constant 0 : index
    %c0_17 = arith.constant 0 : index
    %c0_18 = arith.constant 0 : index
    %14 = vector.load %arg2[%c0_16, %c0_17, %c0_18] : memref<8x6x6xf32, #tpu.memory_space<vmem>>, vector<8x1x6xf32>
    %15 = vector.shape_cast %14 : vector<8x1x6xf32> to vector<8x6xf32>
    %c0_19 = arith.constant 0 : index
    %c1_20 = arith.constant 1 : index
    %c0_21 = arith.constant 0 : index
    %16 = vector.load %arg2[%c0_19, %c1_20, %c0_21] : memref<8x6x6xf32, #tpu.memory_space<vmem>>, vector<8x1x6xf32>
    %17 = vector.shape_cast %16 : vector<8x1x6xf32> to vector<8x6xf32>
    %c0_22 = arith.constant 0 : index
    %c2_23 = arith.constant 2 : index
    %c0_24 = arith.constant 0 : index
    %18 = vector.load %arg2[%c0_22, %c2_23, %c0_24] : memref<8x6x6xf32, #tpu.memory_space<vmem>>, vector<8x1x6xf32>
    %19 = vector.shape_cast %18 : vector<8x1x6xf32> to vector<8x6xf32>
    %c0_25 = arith.constant 0 : index
    %c3_26 = arith.constant 3 : index
    %c0_27 = arith.constant 0 : index
    %20 = vector.load %arg2[%c0_25, %c3_26, %c0_27] : memref<8x6x6xf32, #tpu.memory_space<vmem>>, vector<8x1x6xf32>
    %21 = vector.shape_cast %20 : vector<8x1x6xf32> to vector<8x6xf32>
    %c0_28 = arith.constant 0 : index
    %c4_29 = arith.constant 4 : index
    %c0_30 = arith.constant 0 : index
    %22 = vector.load %arg2[%c0_28, %c4_29, %c0_30] : memref<8x6x6xf32, #tpu.memory_space<vmem>>, vector<8x1x6xf32>
    %23 = vector.shape_cast %22 : vector<8x1x6xf32> to vector<8x6xf32>
    %c0_31 = arith.constant 0 : index
    %c5_32 = arith.constant 5 : index
    %c0_33 = arith.constant 0 : index
    %24 = vector.load %arg2[%c0_31, %c5_32, %c0_33] : memref<8x6x6xf32, #tpu.memory_space<vmem>>, vector<8x1x6xf32>
    %25 = vector.shape_cast %24 : vector<8x1x6xf32> to vector<8x6xf32>
    %cst = arith.constant dense<0.000000e+00> : vector<8xf32>
    %26 = vector.multi_reduction <add>, %15, %cst [1] : vector<8x6xf32> to vector<8xf32>
    %27 = vector.shape_cast %26 : vector<8xf32> to vector<8x1xf32>
    %cst_34 = arith.constant 9.99999974E-6 : f32
    %28 = vector.broadcast %cst_34 : f32 to vector<8x1xf32>
    %29 = arith.addf %27, %28 : vector<8x1xf32>
    %30 = math.rsqrt %29 : vector<8x1xf32>
    %cst_35 = arith.constant dense<0.000000e+00> : vector<8xf32>
    %31 = vector.multi_reduction <add>, %17, %cst_35 [1] : vector<8x6xf32> to vector<8xf32>
    %32 = vector.shape_cast %31 : vector<8xf32> to vector<8x1xf32>
    %cst_36 = arith.constant 9.99999974E-6 : f32
    %33 = vector.broadcast %cst_36 : f32 to vector<8x1xf32>
    %34 = arith.addf %32, %33 : vector<8x1xf32>
    %35 = math.rsqrt %34 : vector<8x1xf32>
    %cst_37 = arith.constant dense<0.000000e+00> : vector<8xf32>
    %36 = vector.multi_reduction <add>, %19, %cst_37 [1] : vector<8x6xf32> to vector<8xf32>
    %37 = vector.shape_cast %36 : vector<8xf32> to vector<8x1xf32>
    %cst_38 = arith.constant 9.99999974E-6 : f32
    %38 = vector.broadcast %cst_38 : f32 to vector<8x1xf32>
    %39 = arith.addf %37, %38 : vector<8x1xf32>
    %40 = math.rsqrt %39 : vector<8x1xf32>
    %cst_39 = arith.constant dense<0.000000e+00> : vector<8xf32>
    %41 = vector.multi_reduction <add>, %21, %cst_39 [1] : vector<8x6xf32> to vector<8xf32>
    %42 = vector.shape_cast %41 : vector<8xf32> to vector<8x1xf32>
    %cst_40 = arith.constant 9.99999974E-6 : f32
    %43 = vector.broadcast %cst_40 : f32 to vector<8x1xf32>
    %44 = arith.addf %42, %43 : vector<8x1xf32>
    %45 = math.rsqrt %44 : vector<8x1xf32>
    %cst_41 = arith.constant dense<0.000000e+00> : vector<8xf32>
    %46 = vector.multi_reduction <add>, %23, %cst_41 [1] : vector<8x6xf32> to vector<8xf32>
    %47 = vector.shape_cast %46 : vector<8xf32> to vector<8x1xf32>
    %cst_42 = arith.constant 9.99999974E-6 : f32
    %48 = vector.broadcast %cst_42 : f32 to vector<8x1xf32>
    %49 = arith.addf %47, %48 : vector<8x1xf32>
    %50 = math.rsqrt %49 : vector<8x1xf32>
    %cst_43 = arith.constant dense<0.000000e+00> : vector<8xf32>
    %51 = vector.multi_reduction <add>, %25, %cst_43 [1] : vector<8x6xf32> to vector<8xf32>
    %52 = vector.shape_cast %51 : vector<8xf32> to vector<8x1xf32>
    %cst_44 = arith.constant 9.99999974E-6 : f32
    %53 = vector.broadcast %cst_44 : f32 to vector<8x1xf32>
    %54 = arith.addf %52, %53 : vector<8x1xf32>
    %55 = math.rsqrt %54 : vector<8x1xf32>
    %cst_45 = arith.constant dense<0.000000e+00> : vector<8x32xf32>
    %56 = tpu.matmul %3, %0, %cst_45 {dimension_numbers = #tpu.dot_dimension_numbers<[1], [0], [0], [1], [0, 0, 1, 1], [], []>} : vector<8x128xf32>, vector<128x32xf32>, vector<8x32xf32> -> vector<8x32xf32>
    %57 = vector.broadcast %30 : vector<8x1xf32> to vector<8x32xf32>
    %58 = arith.mulf %57, %56 : vector<8x32xf32>
    %cst_46 = arith.constant dense<0.000000e+00> : vector<8x32xf32>
    %59 = tpu.matmul %5, %0, %cst_46 {dimension_numbers = #tpu.dot_dimension_numbers<[1], [0], [0], [1], [0, 0, 1, 1], [], []>} : vector<8x128xf32>, vector<128x32xf32>, vector<8x32xf32> -> vector<8x32xf32>
    %60 = vector.broadcast %35 : vector<8x1xf32> to vector<8x32xf32>
    %61 = arith.mulf %60, %59 : vector<8x32xf32>
    %cst_47 = arith.constant dense<0.000000e+00> : vector<8x32xf32>
    %62 = tpu.matmul %7, %0, %cst_47 {dimension_numbers = #tpu.dot_dimension_numbers<[1], [0], [0], [1], [0, 0, 1, 1], [], []>} : vector<8x128xf32>, vector<128x32xf32>, vector<8x32xf32> -> vector<8x32xf32>
    %63 = vector.broadcast %40 : vector<8x1xf32> to vector<8x32xf32>
    %64 = arith.mulf %63, %62 : vector<8x32xf32>
    %cst_48 = arith.constant dense<0.000000e+00> : vector<8x32xf32>
    %65 = tpu.matmul %9, %0, %cst_48 {dimension_numbers = #tpu.dot_dimension_numbers<[1], [0], [0], [1], [0, 0, 1, 1], [], []>} : vector<8x128xf32>, vector<128x32xf32>, vector<8x32xf32> -> vector<8x32xf32>
    %66 = vector.broadcast %45 : vector<8x1xf32> to vector<8x32xf32>
    %67 = arith.mulf %66, %65 : vector<8x32xf32>
    %cst_49 = arith.constant dense<0.000000e+00> : vector<8x32xf32>
    %68 = tpu.matmul %11, %0, %cst_49 {dimension_numbers = #tpu.dot_dimension_numbers<[1], [0], [0], [1], [0, 0, 1, 1], [], []>} : vector<8x128xf32>, vector<128x32xf32>, vector<8x32xf32> -> vector<8x32xf32>
    %69 = vector.broadcast %50 : vector<8x1xf32> to vector<8x32xf32>
    %70 = arith.mulf %69, %68 : vector<8x32xf32>
    %cst_50 = arith.constant dense<0.000000e+00> : vector<8x32xf32>
    %71 = tpu.matmul %13, %0, %cst_50 {dimension_numbers = #tpu.dot_dimension_numbers<[1], [0], [0], [1], [0, 0, 1, 1], [], []>} : vector<8x128xf32>, vector<128x32xf32>, vector<8x32xf32> -> vector<8x32xf32>
    %72 = vector.broadcast %55 : vector<8x1xf32> to vector<8x32xf32>
    %73 = arith.mulf %72, %71 : vector<8x32xf32>
    %74 = vector.extract_strided_slice %15 {offsets = [0, 0], sizes = [8, 1], strides = [1, 1]} : vector<8x6xf32> to vector<8x1xf32>
    %75 = vector.broadcast %74 : vector<8x1xf32> to vector<8x32xf32>
    %76 = arith.mulf %75, %58 : vector<8x32xf32>
    %77 = vector.extract_strided_slice %15 {offsets = [0, 1], sizes = [8, 1], strides = [1, 1]} : vector<8x6xf32> to vector<8x1xf32>
    %78 = vector.broadcast %77 : vector<8x1xf32> to vector<8x32xf32>
    %79 = arith.mulf %78, %61 : vector<8x32xf32>
    %80 = arith.addf %76, %79 : vector<8x32xf32>
    %81 = vector.extract_strided_slice %15 {offsets = [0, 2], sizes = [8, 1], strides = [1, 1]} : vector<8x6xf32> to vector<8x1xf32>
    %82 = vector.broadcast %81 : vector<8x1xf32> to vector<8x32xf32>
    %83 = arith.mulf %82, %64 : vector<8x32xf32>
    %84 = arith.addf %80, %83 : vector<8x32xf32>
    %85 = vector.extract_strided_slice %15 {offsets = [0, 3], sizes = [8, 1], strides = [1, 1]} : vector<8x6xf32> to vector<8x1xf32>
    %86 = vector.broadcast %85 : vector<8x1xf32> to vector<8x32xf32>
    %87 = arith.mulf %86, %67 : vector<8x32xf32>
    %88 = arith.addf %84, %87 : vector<8x32xf32>
    %89 = vector.extract_strided_slice %15 {offsets = [0, 4], sizes = [8, 1], strides = [1, 1]} : vector<8x6xf32> to vector<8x1xf32>
    %90 = vector.broadcast %89 : vector<8x1xf32> to vector<8x32xf32>
    %91 = arith.mulf %90, %70 : vector<8x32xf32>
    %92 = arith.addf %88, %91 : vector<8x32xf32>
    %93 = vector.extract_strided_slice %15 {offsets = [0, 5], sizes = [8, 1], strides = [1, 1]} : vector<8x6xf32> to vector<8x1xf32>
    %94 = vector.broadcast %93 : vector<8x1xf32> to vector<8x32xf32>
    %95 = arith.mulf %94, %73 : vector<8x32xf32>
    %96 = arith.addf %92, %95 : vector<8x32xf32>
    %97 = vector.broadcast %30 : vector<8x1xf32> to vector<8x32xf32>
    %98 = arith.mulf %97, %96 : vector<8x32xf32>
    %99 = vector.broadcast %1 : vector<1x32xf32> to vector<8x32xf32>
    %100 = arith.addf %98, %99 : vector<8x32xf32>
    %cst_51 = arith.constant 0.000000e+00 : f32
    %101 = vector.broadcast %cst_51 : f32 to vector<8x32xf32>
    %102 = arith.maximumf %100, %101 : vector<8x32xf32>
    %c0_52 = arith.constant 0 : index
    %c0_53 = arith.constant 0 : index
    %103 = vector.load %arg11[%c0_52, %c0_53] : memref<8x192xf32, #tpu.memory_space<vmem>>, vector<8x32xf32>
    tpu.vector_store %arg11[%c0_52, %c0_53], %102 {strides = array<i32>} : memref<8x192xf32, #tpu.memory_space<vmem>>, vector<8x32xf32>,
    %104 = vector.extract_strided_slice %17 {offsets = [0, 0], sizes = [8, 1], strides = [1, 1]} : vector<8x6xf32> to vector<8x1xf32>
    %105 = vector.broadcast %104 : vector<8x1xf32> to vector<8x32xf32>
    %106 = arith.mulf %105, %58 : vector<8x32xf32>
    %107 = vector.extract_strided_slice %17 {offsets = [0, 1], sizes = [8, 1], strides = [1, 1]} : vector<8x6xf32> to vector<8x1xf32>
    %108 = vector.broadcast %107 : vector<8x1xf32> to vector<8x32xf32>
    %109 = arith.mulf %108, %61 : vector<8x32xf32>
    %110 = arith.addf %106, %109 : vector<8x32xf32>
    %111 = vector.extract_strided_slice %17 {offsets = [0, 2], sizes = [8, 1], strides = [1, 1]} : vector<8x6xf32> to vector<8x1xf32>
    %112 = vector.broadcast %111 : vector<8x1xf32> to vector<8x32xf32>
    %113 = arith.mulf %112, %64 : vector<8x32xf32>
    %114 = arith.addf %110, %113 : vector<8x32xf32>
    %115 = vector.extract_strided_slice %17 {offsets = [0, 3], sizes = [8, 1], strides = [1, 1]} : vector<8x6xf32> to vector<8x1xf32>
    %116 = vector.broadcast %115 : vector<8x1xf32> to vector<8x32xf32>
    %117 = arith.mulf %116, %67 : vector<8x32xf32>
    %118 = arith.addf %114, %117 : vector<8x32xf32>
    %119 = vector.extract_strided_slice %17 {offsets = [0, 4], sizes = [8, 1], strides = [1, 1]} : vector<8x6xf32> to vector<8x1xf32>
    %120 = vector.broadcast %119 : vector<8x1xf32> to vector<8x32xf32>
    %121 = arith.mulf %120, %70 : vector<8x32xf32>
    %122 = arith.addf %118, %121 : vector<8x32xf32>
    %123 = vector.extract_strided_slice %17 {offsets = [0, 5], sizes = [8, 1], strides = [1, 1]} : vector<8x6xf32> to vector<8x1xf32>
    %124 = vector.broadcast %123 : vector<8x1xf32> to vector<8x32xf32>
    %125 = arith.mulf %124, %73 : vector<8x32xf32>
    %126 = arith.addf %122, %125 : vector<8x32xf32>
    %127 = vector.broadcast %35 : vector<8x1xf32> to vector<8x32xf32>
    %128 = arith.mulf %127, %126 : vector<8x32xf32>
    %129 = vector.broadcast %1 : vector<1x32xf32> to vector<8x32xf32>
    %130 = arith.addf %128, %129 : vector<8x32xf32>
    %cst_54 = arith.constant 0.000000e+00 : f32
    %131 = vector.broadcast %cst_54 : f32 to vector<8x32xf32>
    %132 = arith.maximumf %130, %131 : vector<8x32xf32>
    %c0_55 = arith.constant 0 : index
    %c32 = arith.constant 32 : index
    %133 = vector.load %arg11[%c0_55, %c32] : memref<8x192xf32, #tpu.memory_space<vmem>>, vector<8x32xf32>
    tpu.vector_store %arg11[%c0_55, %c32], %132 {strides = array<i32>} : memref<8x192xf32, #tpu.memory_space<vmem>>, vector<8x32xf32>,
    %134 = vector.extract_strided_slice %19 {offsets = [0, 0], sizes = [8, 1], strides = [1, 1]} : vector<8x6xf32> to vector<8x1xf32>
    %135 = vector.broadcast %134 : vector<8x1xf32> to vector<8x32xf32>
    %136 = arith.mulf %135, %58 : vector<8x32xf32>
    %137 = vector.extract_strided_slice %19 {offsets = [0, 1], sizes = [8, 1], strides = [1, 1]} : vector<8x6xf32> to vector<8x1xf32>
    %138 = vector.broadcast %137 : vector<8x1xf32> to vector<8x32xf32>
    %139 = arith.mulf %138, %61 : vector<8x32xf32>
    %140 = arith.addf %136, %139 : vector<8x32xf32>
    %141 = vector.extract_strided_slice %19 {offsets = [0, 2], sizes = [8, 1], strides = [1, 1]} : vector<8x6xf32> to vector<8x1xf32>
    %142 = vector.broadcast %141 : vector<8x1xf32> to vector<8x32xf32>
    %143 = arith.mulf %142, %64 : vector<8x32xf32>
    %144 = arith.addf %140, %143 : vector<8x32xf32>
    %145 = vector.extract_strided_slice %19 {offsets = [0, 3], sizes = [8, 1], strides = [1, 1]} : vector<8x6xf32> to vector<8x1xf32>
    %146 = vector.broadcast %145 : vector<8x1xf32> to vector<8x32xf32>
    %147 = arith.mulf %146, %67 : vector<8x32xf32>
    %148 = arith.addf %144, %147 : vector<8x32xf32>
    %149 = vector.extract_strided_slice %19 {offsets = [0, 4], sizes = [8, 1], strides = [1, 1]} : vector<8x6xf32> to vector<8x1xf32>
    %150 = vector.broadcast %149 : vector<8x1xf32> to vector<8x32xf32>
    %151 = arith.mulf %150, %70 : vector<8x32xf32>
    %152 = arith.addf %148, %151 : vector<8x32xf32>
    %153 = vector.extract_strided_slice %19 {offsets = [0, 5], sizes = [8, 1], strides = [1, 1]} : vector<8x6xf32> to vector<8x1xf32>
    %154 = vector.broadcast %153 : vector<8x1xf32> to vector<8x32xf32>
    %155 = arith.mulf %154, %73 : vector<8x32xf32>
    %156 = arith.addf %152, %155 : vector<8x32xf32>
    %157 = vector.broadcast %40 : vector<8x1xf32> to vector<8x32xf32>
    %158 = arith.mulf %157, %156 : vector<8x32xf32>
    %159 = vector.broadcast %1 : vector<1x32xf32> to vector<8x32xf32>
    %160 = arith.addf %158, %159 : vector<8x32xf32>
    %cst_56 = arith.constant 0.000000e+00 : f32
    %161 = vector.broadcast %cst_56 : f32 to vector<8x32xf32>
    %162 = arith.maximumf %160, %161 : vector<8x32xf32>
    %c0_57 = arith.constant 0 : index
    %c64 = arith.constant 64 : index
    %163 = vector.load %arg11[%c0_57, %c64] : memref<8x192xf32, #tpu.memory_space<vmem>>, vector<8x32xf32>
    tpu.vector_store %arg11[%c0_57, %c64], %162 {strides = array<i32>} : memref<8x192xf32, #tpu.memory_space<vmem>>, vector<8x32xf32>,
    %164 = vector.extract_strided_slice %21 {offsets = [0, 0], sizes = [8, 1], strides = [1, 1]} : vector<8x6xf32> to vector<8x1xf32>
    %165 = vector.broadcast %164 : vector<8x1xf32> to vector<8x32xf32>
    %166 = arith.mulf %165, %58 : vector<8x32xf32>
    %167 = vector.extract_strided_slice %21 {offsets = [0, 1], sizes = [8, 1], strides = [1, 1]} : vector<8x6xf32> to vector<8x1xf32>
    %168 = vector.broadcast %167 : vector<8x1xf32> to vector<8x32xf32>
    %169 = arith.mulf %168, %61 : vector<8x32xf32>
    %170 = arith.addf %166, %169 : vector<8x32xf32>
    %171 = vector.extract_strided_slice %21 {offsets = [0, 2], sizes = [8, 1], strides = [1, 1]} : vector<8x6xf32> to vector<8x1xf32>
    %172 = vector.broadcast %171 : vector<8x1xf32> to vector<8x32xf32>
    %173 = arith.mulf %172, %64 : vector<8x32xf32>
    %174 = arith.addf %170, %173 : vector<8x32xf32>
    %175 = vector.extract_strided_slice %21 {offsets = [0, 3], sizes = [8, 1], strides = [1, 1]} : vector<8x6xf32> to vector<8x1xf32>
    %176 = vector.broadcast %175 : vector<8x1xf32> to vector<8x32xf32>
    %177 = arith.mulf %176, %67 : vector<8x32xf32>
    %178 = arith.addf %174, %177 : vector<8x32xf32>
    %179 = vector.extract_strided_slice %21 {offsets = [0, 4], sizes = [8, 1], strides = [1, 1]} : vector<8x6xf32> to vector<8x1xf32>
    %180 = vector.broadcast %179 : vector<8x1xf32> to vector<8x32xf32>
    %181 = arith.mulf %180, %70 : vector<8x32xf32>
    %182 = arith.addf %178, %181 : vector<8x32xf32>
    %183 = vector.extract_strided_slice %21 {offsets = [0, 5], sizes = [8, 1], strides = [1, 1]} : vector<8x6xf32> to vector<8x1xf32>
    %184 = vector.broadcast %183 : vector<8x1xf32> to vector<8x32xf32>
    %185 = arith.mulf %184, %73 : vector<8x32xf32>
    %186 = arith.addf %182, %185 : vector<8x32xf32>
    %187 = vector.broadcast %45 : vector<8x1xf32> to vector<8x32xf32>
    %188 = arith.mulf %187, %186 : vector<8x32xf32>
    %189 = vector.broadcast %1 : vector<1x32xf32> to vector<8x32xf32>
    %190 = arith.addf %188, %189 : vector<8x32xf32>
    %cst_58 = arith.constant 0.000000e+00 : f32
    %191 = vector.broadcast %cst_58 : f32 to vector<8x32xf32>
    %192 = arith.maximumf %190, %191 : vector<8x32xf32>
    %c0_59 = arith.constant 0 : index
    %c96 = arith.constant 96 : index
    %193 = vector.load %arg11[%c0_59, %c96] : memref<8x192xf32, #tpu.memory_space<vmem>>, vector<8x32xf32>
    tpu.vector_store %arg11[%c0_59, %c96], %192 {strides = array<i32>} : memref<8x192xf32, #tpu.memory_space<vmem>>, vector<8x32xf32>,
    %194 = vector.extract_strided_slice %23 {offsets = [0, 0], sizes = [8, 1], strides = [1, 1]} : vector<8x6xf32> to vector<8x1xf32>
    %195 = vector.broadcast %194 : vector<8x1xf32> to vector<8x32xf32>
    %196 = arith.mulf %195, %58 : vector<8x32xf32>
    %197 = vector.extract_strided_slice %23 {offsets = [0, 1], sizes = [8, 1], strides = [1, 1]} : vector<8x6xf32> to vector<8x1xf32>
    %198 = vector.broadcast %197 : vector<8x1xf32> to vector<8x32xf32>
    %199 = arith.mulf %198, %61 : vector<8x32xf32>
    %200 = arith.addf %196, %199 : vector<8x32xf32>
    %201 = vector.extract_strided_slice %23 {offsets = [0, 2], sizes = [8, 1], strides = [1, 1]} : vector<8x6xf32> to vector<8x1xf32>
    %202 = vector.broadcast %201 : vector<8x1xf32> to vector<8x32xf32>
    %203 = arith.mulf %202, %64 : vector<8x32xf32>
    %204 = arith.addf %200, %203 : vector<8x32xf32>
    %205 = vector.extract_strided_slice %23 {offsets = [0, 3], sizes = [8, 1], strides = [1, 1]} : vector<8x6xf32> to vector<8x1xf32>
    %206 = vector.broadcast %205 : vector<8x1xf32> to vector<8x32xf32>
    %207 = arith.mulf %206, %67 : vector<8x32xf32>
    %208 = arith.addf %204, %207 : vector<8x32xf32>
    %209 = vector.extract_strided_slice %23 {offsets = [0, 4], sizes = [8, 1], strides = [1, 1]} : vector<8x6xf32> to vector<8x1xf32>
    %210 = vector.broadcast %209 : vector<8x1xf32> to vector<8x32xf32>
    %211 = arith.mulf %210, %70 : vector<8x32xf32>
    %212 = arith.addf %208, %211 : vector<8x32xf32>
    %213 = vector.extract_strided_slice %23 {offsets = [0, 5], sizes = [8, 1], strides = [1, 1]} : vector<8x6xf32> to vector<8x1xf32>
    %214 = vector.broadcast %213 : vector<8x1xf32> to vector<8x32xf32>
    %215 = arith.mulf %214, %73 : vector<8x32xf32>
    %216 = arith.addf %212, %215 : vector<8x32xf32>
    %217 = vector.broadcast %50 : vector<8x1xf32> to vector<8x32xf32>
    %218 = arith.mulf %217, %216 : vector<8x32xf32>
    %219 = vector.broadcast %1 : vector<1x32xf32> to vector<8x32xf32>
    %220 = arith.addf %218, %219 : vector<8x32xf32>
    %cst_60 = arith.constant 0.000000e+00 : f32
    %221 = vector.broadcast %cst_60 : f32 to vector<8x32xf32>
    %222 = arith.maximumf %220, %221 : vector<8x32xf32>
    %c0_61 = arith.constant 0 : index
    %c128 = arith.constant 128 : index
    %223 = vector.load %arg11[%c0_61, %c128] : memref<8x192xf32, #tpu.memory_space<vmem>>, vector<8x32xf32>
    tpu.vector_store %arg11[%c0_61, %c128], %222 {strides = array<i32>} : memref<8x192xf32, #tpu.memory_space<vmem>>, vector<8x32xf32>,
    %224 = vector.extract_strided_slice %25 {offsets = [0, 0], sizes = [8, 1], strides = [1, 1]} : vector<8x6xf32> to vector<8x1xf32>
    %225 = vector.broadcast %224 : vector<8x1xf32> to vector<8x32xf32>
    %226 = arith.mulf %225, %58 : vector<8x32xf32>
    %227 = vector.extract_strided_slice %25 {offsets = [0, 1], sizes = [8, 1], strides = [1, 1]} : vector<8x6xf32> to vector<8x1xf32>
    %228 = vector.broadcast %227 : vector<8x1xf32> to vector<8x32xf32>
    %229 = arith.mulf %228, %61 : vector<8x32xf32>
    %230 = arith.addf %226, %229 : vector<8x32xf32>
    %231 = vector.extract_strided_slice %25 {offsets = [0, 2], sizes = [8, 1], strides = [1, 1]} : vector<8x6xf32> to vector<8x1xf32>
    %232 = vector.broadcast %231 : vector<8x1xf32> to vector<8x32xf32>
    %233 = arith.mulf %232, %64 : vector<8x32xf32>
    %234 = arith.addf %230, %233 : vector<8x32xf32>
    %235 = vector.extract_strided_slice %25 {offsets = [0, 3], sizes = [8, 1], strides = [1, 1]} : vector<8x6xf32> to vector<8x1xf32>
    %236 = vector.broadcast %235 : vector<8x1xf32> to vector<8x32xf32>
    %237 = arith.mulf %236, %67 : vector<8x32xf32>
    %238 = arith.addf %234, %237 : vector<8x32xf32>
    %239 = vector.extract_strided_slice %25 {offsets = [0, 4], sizes = [8, 1], strides = [1, 1]} : vector<8x6xf32> to vector<8x1xf32>
    %240 = vector.broadcast %239 : vector<8x1xf32> to vector<8x32xf32>
    %241 = arith.mulf %240, %70 : vector<8x32xf32>
    %242 = arith.addf %238, %241 : vector<8x32xf32>
    %243 = vector.extract_strided_slice %25 {offsets = [0, 5], sizes = [8, 1], strides = [1, 1]} : vector<8x6xf32> to vector<8x1xf32>
    %244 = vector.broadcast %243 : vector<8x1xf32> to vector<8x32xf32>
    %245 = arith.mulf %244, %73 : vector<8x32xf32>
    %246 = arith.addf %242, %245 : vector<8x32xf32>
    %247 = vector.broadcast %55 : vector<8x1xf32> to vector<8x32xf32>
    %248 = arith.mulf %247, %246 : vector<8x32xf32>
    %249 = vector.broadcast %1 : vector<1x32xf32> to vector<8x32xf32>
    %250 = arith.addf %248, %249 : vector<8x32xf32>
    %cst_62 = arith.constant 0.000000e+00 : f32
    %251 = vector.broadcast %cst_62 : f32 to vector<8x32xf32>
    %252 = arith.maximumf %250, %251 : vector<8x32xf32>
    %c0_63 = arith.constant 0 : index
    %c160 = arith.constant 160 : index
    %253 = vector.load %arg11[%c0_63, %c160] : memref<8x192xf32, #tpu.memory_space<vmem>>, vector<8x32xf32>
    tpu.vector_store %arg11[%c0_63, %c160], %252 {strides = array<i32>} : memref<8x192xf32, #tpu.memory_space<vmem>>, vector<8x32xf32>,
    %254 = arith.addf %3, %5 : vector<8x128xf32>
    %255 = arith.addf %254, %7 : vector<8x128xf32>
    %256 = arith.addf %255, %9 : vector<8x128xf32>
    %257 = arith.addf %256, %11 : vector<8x128xf32>
    %258 = arith.addf %257, %13 : vector<8x128xf32>
    %cst_64 = arith.constant 0.166666672 : f32
    %259 = vector.broadcast %cst_64 : f32 to vector<8x128xf32>
    %260 = arith.mulf %258, %259 : vector<8x128xf32>
    %c0_65 = arith.constant 0 : index
    %c0_66 = arith.constant 0 : index
    %261 = vector.load %arg5[%c0_65, %c0_66] : memref<128x128xf32, #tpu.memory_space<vmem>>, vector<128x128xf32>
    %cst_67 = arith.constant dense<0.000000e+00> : vector<8x128xf32>
    %262 = tpu.matmul %260, %261, %cst_67 {dimension_numbers = #tpu.dot_dimension_numbers<[1], [0], [0], [1], [0, 0, 1, 1], [], []>} : vector<8x128xf32>, vector<128x128xf32>, vector<8x128xf32> -> vector<8x128xf32>
    %c0_68 = arith.constant 0 : index
    %c0_69 = arith.constant 0 : index
    %263 = vector.load %arg11[%c0_68, %c0_69] : memref<8x192xf32, #tpu.memory_space<vmem>>, vector<8x192xf32>
    %c0_70 = arith.constant 0 : index
    %c0_71 = arith.constant 0 : index
    %264 = vector.load %arg6[%c0_70, %c0_71] : memref<192x128xf32, #tpu.memory_space<vmem>>, vector<192x128xf32>
    %cst_72 = arith.constant dense<0.000000e+00> : vector<8x128xf32>
    %265 = tpu.matmul %263, %264, %cst_72 {dimension_numbers = #tpu.dot_dimension_numbers<[1], [0], [0], [1], [0, 0, 1, 1], [], []>} : vector<8x192xf32>, vector<192x128xf32>, vector<8x128xf32> -> vector<8x128xf32>
    %266 = arith.addf %262, %265 : vector<8x128xf32>
    %c0_73 = arith.constant 0 : index
    %c0_74 = arith.constant 0 : index
    %267 = vector.load %arg7[%c0_73, %c0_74] : memref<1x128xf32, #tpu.memory_space<vmem>>, vector<1x128xf32>
    %268 = vector.broadcast %267 : vector<1x128xf32> to vector<8x128xf32>
    %269 = arith.addf %266, %268 : vector<8x128xf32>
    %cst_75 = arith.constant 0.000000e+00 : f32
    %270 = vector.broadcast %cst_75 : f32 to vector<8x128xf32>
    %271 = arith.maximumf %269, %270 : vector<8x128xf32>
    %c0_76 = arith.constant 0 : index
    %c0_77 = arith.constant 0 : index
    %272 = vector.load %arg8[%c0_76, %c0_77] : memref<128x128xf32, #tpu.memory_space<vmem>>, vector<128x128xf32>
    %cst_78 = arith.constant dense<0.000000e+00> : vector<8x128xf32>
    %273 = tpu.matmul %271, %272, %cst_78 {dimension_numbers = #tpu.dot_dimension_numbers<[1], [0], [0], [1], [0, 0, 1, 1], [], []>} : vector<8x128xf32>, vector<128x128xf32>, vector<8x128xf32> -> vector<8x128xf32>
    %c0_79 = arith.constant 0 : index
    %c0_80 = arith.constant 0 : index
    %274 = vector.load %arg9[%c0_79, %c0_80] : memref<1x128xf32, #tpu.memory_space<vmem>>, vector<1x128xf32>
    %275 = vector.broadcast %274 : vector<1x128xf32> to vector<8x128xf32>
    %276 = arith.addf %273, %275 : vector<8x128xf32>
    %277 = arith.mulf %276, %276 : vector<8x128xf32>
    %cst_81 = arith.constant dense<0.000000e+00> : vector<8xf32>
    %278 = vector.multi_reduction <add>, %277, %cst_81 [1] : vector<8x128xf32> to vector<8xf32>
    %279 = vector.shape_cast %278 : vector<8xf32> to vector<8x1xf32>
    %280 = math.sqrt %279 : vector<8x1xf32>
    %cst_82 = arith.constant 9.99999996E-13 : f32
    %281 = vector.broadcast %cst_82 : f32 to vector<8x1xf32>
    %282 = arith.maximumf %280, %281 : vector<8x1xf32>
    %283 = vector.broadcast %282 : vector<8x1xf32> to vector<8x128xf32>
    %284 = arith.divf %276, %283 : vector<8x128xf32>
    %c0_83 = arith.constant 0 : index
    %c0_84 = arith.constant 0 : index
    %285 = vector.load %arg10[%c0_83, %c0_84] : memref<8x128xf32, #tpu.memory_space<vmem>>, vector<8x128xf32>
    tpu.vector_store %arg10[%c0_83, %c0_84], %284 {strides = array<i32>} : memref<8x128xf32, #tpu.memory_space<vmem>>, vector<8x128xf32>,
    return
  }
  func.func @transform_0(%arg0: i32) -> (i32, i32, i32) {
    %c0_i32 = arith.constant 0 : i32
    %c0_i32_0 = arith.constant 0 : i32
    %c0_i32_1 = arith.constant 0 : i32
    return %arg0, %c0_i32, %c0_i32_0 : i32, i32, i32
  }
  func.func @transform_1(%arg0: i32) -> (i32, i32, i32) {
    %c0_i32 = arith.constant 0 : i32
    %c0_i32_0 = arith.constant 0 : i32
    %c0_i32_1 = arith.constant 0 : i32
    return %arg0, %c0_i32, %c0_i32_0 : i32, i32, i32
  }
  func.func @transform_2(%arg0: i32) -> (i32, i32) {
    %c0_i32 = arith.constant 0 : i32
    %c0_i32_0 = arith.constant 0 : i32
    %c0_i32_1 = arith.constant 0 : i32
    return %c0_i32, %c0_i32_0 : i32, i32
  }
  func.func @transform_3(%arg0: i32) -> (i32, i32) {
    %c0_i32 = arith.constant 0 : i32
    %c0_i32_0 = arith.constant 0 : i32
    %c0_i32_1 = arith.constant 0 : i32
    return %c0_i32, %c0_i32_0 : i32, i32
  }
  func.func @transform_4(%arg0: i32) -> (i32, i32) {
    %c0_i32 = arith.constant 0 : i32
    %c0_i32_0 = arith.constant 0 : i32
    %c0_i32_1 = arith.constant 0 : i32
    return %c0_i32, %c0_i32_0 : i32, i32
  }
  func.func @transform_5(%arg0: i32) -> (i32, i32) {
    %c0_i32 = arith.constant 0 : i32
    %c0_i32_0 = arith.constant 0 : i32
    %c0_i32_1 = arith.constant 0 : i32
    return %c0_i32, %c0_i32_0 : i32, i32
  }
  func.func @transform_6(%arg0: i32) -> (i32, i32) {
    %c0_i32 = arith.constant 0 : i32
    %c0_i32_0 = arith.constant 0 : i32
    %c0_i32_1 = arith.constant 0 : i32
    return %c0_i32, %c0_i32_0 : i32, i32
  }
  func.func @transform_7(%arg0: i32) -> (i32, i32) {
    %c0_i32 = arith.constant 0 : i32
    %c0_i32_0 = arith.constant 0 : i32
    %c0_i32_1 = arith.constant 0 : i32
    return %c0_i32, %c0_i32_0 : i32, i32
  }
  func.func @transform_8(%arg0: i32) -> (i32, i32) {
    %c0_i32 = arith.constant 0 : i32
    %c0_i32_0 = arith.constant 0 : i32
    %c0_i32_1 = arith.constant 0 : i32
    return %c0_i32, %c0_i32_0 : i32, i32
  }
  func.func @transform_9(%arg0: i32) -> (i32, i32) {
    %c0_i32 = arith.constant 0 : i32
    %c0_i32_0 = arith.constant 0 : i32
    return %arg0, %c0_i32 : i32, i32
  }
}

</mosaic_0001>

<bundles_post_ra>
// kernel: tpu_custom_call.1
= control target key start
LH: loop header
LB: loop body
LE: loop exit
PB: predicated region body
PF: predicated region fallthrough
CT: control target
= control target key end

     0   :  { %14 = vsyncpa [#allocation4], 0  ;;  %s7050_s0 = inlined_call_operand.vmem [shape: f32[8,6,128], index: 0, kind: input, shape index: {}]   ;;  %s7051_s1 = inlined_call_operand.vmem [shape: f32[8,6,6], index: 1, kind: input, shape index: {}]   ;;  %s7052_s2 = inlined_call_operand.vmem [shape: f32[128,32], index: 2, kind: input, shape index: {}]   ;;  %s7053_s3 = inlined_call_operand.vmem [shape: f32[1,32], index: 3, kind: input, shape index: {}]   ;;  %s7054_s4 = inlined_call_operand.vmem [shape: f32[128,128], index: 4, kind: input, shape index: {}]   ;;  %s7055_s5 = inlined_call_operand.vmem [shape: f32[192,128], index: 5, kind: input, shape index: {}]   ;;  %s7056_s6 = inlined_call_operand.vmem [shape: f32[1,128], index: 6, kind: input, shape index: {}]   ;;  %s7057_s7 = inlined_call_operand.hbm [shape: f32[128,128], index: 7, kind: input, shape index: {}]   ;;  %s7058_s8 = inlined_call_operand.vmem [shape: f32[1,128], index: 8, kind: input, shape index: {}]   ;;  %s7059_s9 = inlined_call_operand.hbm [shape: f32[8,128], index: 9, kind: output, shape index: {}]  }
   0x1   :  { %15 = vsyncpa [#allocation5], 0  ;;  %s4157_s30 = smov [#allocation3]   ;;  %s4109_s13 = scalar_lea.hbm %s7057_s7, 2048 }
   0x2   :  { %s35_s10 = sshll.u32 %s4157_s30, 4  ;;  %p4110_p0 = scmp.ne.s32.totalorder %s7057_s7, %s4109_s13  ;;  %s36_s10 = int_to_ptr.vmem [resolvable:$true] %s35_s10 }
   0x3   :  { %p4113_p1 = scmp.lt.u32.totalorder %s4109_s13, %s7057_s7 }
   0x5   :  { %p4115_p2 = pnand %p4113_p1, %p4110_p0 }
   0x7   :  { %4118 = shalt.err (!%p4115_p2)
}
   0x8   :  { %s4119_s18 = scalar_lea.vmem %s36_s10, 2048  ;;  %p4124_p4 = scmp.lt.s32.totalorder %s36_s10, %s36_s10 }
   0x9   :  { %p4120_p3 = scmp.ne.s32.totalorder %s36_s10, %s4119_s18  ;;  %p4125_p5 = scmp.lt.s32.totalorder %s4119_s18, %s4119_s18 }
   0xb   :  { %p4126_p6 = por %p4125_p5, %p4124_p4 }
   0xd   :  { %p4127_p7 = pnand %p4126_p6, %p4120_p3 }
   0xf   :  { %4130 = shalt.err (!%p4127_p7)
}
  0x10   :  { %s4158_s19 = smov 128   ;;  %s4159_s20 = smov 8  }
  0x11   :  { %41 = dma.hbm_to_vmem [thread:$0]  %s7057_s7, 2048, %s36_s10, [#allocation4], %s4158_s19, %s4158_s19, %s4159_s20  }
  0x12   :  { %4153 = dma.done.wait [#allocation4], 2048  }
  0x13   :  { %4154 = vsyncadd [#allocation4], 4294965248  ;;  %v7065_v0 = vmov 0.0|0.0   ;;  %vm4161_vm0 = vmmov 0   ;;  %v7062_v1 = vmov 0.0   ;;  %v7060_v2 = vmov 0  }
  0x14   :  { %3672 = vmatprep.subr.bf16.mxu0 %v7065_v0  ;;  %3696 = vmatprep.subr.bf16.mxu1 %v7065_v0  ;;  %vm169_vm1 = vcmask 1041409   ;;  %vm172_vm2 = vcmask 1042434   ;;  %vm175_vm3 = vcmask 1043459   ;;  %v47_v3 = vld [vmem:[%s7052_s2] sm:$0xff]  ;;  %v48_v4 = vld [vmem:[%s7052_s2 + $0x8] sm:$0xff]  ;;  %v49_v5 = vld [vmem:[%s7052_s2 + $0x10] sm:$0xff] }
  0x15   :  { %3424 = vmatprep.mubr.msk.f32.mxu0 %vm4161_vm0, %v7062_v1  ;;  %3459 = vmatprep.mubr.msk.f32.mxu1 %vm4161_vm0, %v7062_v1  ;;  %vm178_vm4 = vcmask 1044484   ;;  %vm181_vm5 = vcmask 1045509   ;;  %vm184_vm6 = vcmask 1046534   ;;  %v4252_v6 = vpack.c.bf16 %v48_v4, %v47_v3  ;;  %v50_v7 = vld [vmem:[%s7052_s2 + $0x18] sm:$0xff]  ;;  %v128_v8 = vld [vmem:[%s7051_s1 + $0x2] sm:$0x1] }
  0x16   :  { %3917 = vset.pattern.permute.xlu1 %v7060_v2  ;;  %3916 = vset.pattern.permute.xlu0 %v7060_v2  ;;  %v129_v9 = vld [vmem:[%s7051_s1 + $0xa] sm:$0x1]  ;;  %vm187_vm7 = vcmask 1047559   ;;  %v130_v10 = vld [vmem:[%s7051_s1 + $0x12] sm:$0x1]  ;;  %vm190_vm8 = vcmask 48128   ;;  %v4274_v13 = vpack.c.bf16 %v50_v7, %v49_v5 }
  0x17   :  { %v131_v11 = vld [vmem:[%s7051_s1 + $0x1a] sm:$0x1]  ;;  %v132_v12 = vld [vmem:[%s7051_s1 + $0x22] sm:$0x1]  ;;  %3674 = vmatpush3.bf16.msra.mxu0 %v4252_v6  ;;  %3698 = vmatpush3.bf16.msra.mxu1 %v4252_v6  ;;  %v133_v14 = vld [vmem:[%s7051_s1 + $0x2a] sm:$0x1] }
  0x18   :  { %v134_v15 = vld [vmem:[%s7051_s1 + $0x32] sm:$0x1]  ;;  %v135_v16 = vld [vmem:[%s7051_s1 + $0x3a] sm:$0x1]  ;;  %3675 = vmatprep.subr.bf16.mxu0 %v7065_v0  ;;  %3699 = vmatprep.subr.bf16.mxu1 %v7065_v0  ;;  %v232_v17 = vrot.slane %v129_v9, 7  ;;  %v234_v18 = vrot.slane %v130_v10, 6 }
  0x19   :  { %v236_v19 = vrot.slane %v131_v11, 5  ;;  %v238_v20 = vrot.slane %v132_v12, 4  ;;  %v240_v21 = vrot.slane %v133_v14, 3  ;;  %v242_v22 = vrot.slane %v134_v15, 2  ;;  %v4290_v24 = vld [vmem:[%s7051_s1] sm:$0x1] }
  0x1a   :  { %v244_v23 = vrot.slane %v135_v16, 1  ;;  %v4295_v25 = vld [vmem:[%s7051_s1 + $0x8] sm:$0x1]  ;;  %v51_v26 = vld [vmem:[%s7052_s2 + $0x20] sm:$0xff]  ;;  %v233_v27 = vsel %vm169_vm1, %v232_v17, %v128_v8  ;;  %v4304_v28 = vld [vmem:[%s7051_s1 + $0x10] sm:$0x1] }
  0x1b   :  { %v4309_v29 = vld [vmem:[%s7051_s1 + $0x18] sm:$0x1]  ;;  %v4314_v30 = vld [vmem:[%s7051_s1 + $0x20] sm:$0x1]  ;;  %3677 = vmatpush3.bf16.msra.mxu0 %v4274_v13  ;;  %3701 = vmatpush3.bf16.msra.mxu1 %v4274_v13  ;;  %v235_v31 = vsel %vm172_vm2, %v234_v18, %v233_v27  ;;  %v4322_v32 = vld [vmem:[%s7051_s1 + $0x28] sm:$0x1] }
  0x1c   :  { %v4327_v33 = vld [vmem:[%s7051_s1 + $0x30] sm:$0x1]  ;;  %v4332_v34 = vld [vmem:[%s7051_s1 + $0x38] sm:$0x1]  ;;  %3678 = vmatprep.subr.bf16.mxu0 %v7065_v0  ;;  %3702 = vmatprep.subr.bf16.mxu1 %v7065_v0  ;;  %v237_v35 = vsel %vm175_vm3, %v236_v19, %v235_v31  ;;  %v168_v36 = vrot.slane %v4295_v25, 7  ;;  %v171_v37 = vrot.slane %v4304_v28, 6 }
  0x1d   :  { %v174_v38 = vrot.slane %v4309_v29, 5  ;;  %v52_v39 = vld [vmem:[%s7052_s2 + $0x28] sm:$0xff]  ;;  %v239_v40 = vsel %vm178_vm4, %v238_v20, %v237_v35  ;;  %v177_v41 = vrot.slane %v4314_v30, 4  ;;  %v180_v42 = vrot.slane %v4322_v32, 3  ;;  %v136_v44 = vld [vmem:[%s7051_s1 + $0x3] sm:$0x1] }
  0x1e   :  { %v183_v43 = vrot.slane %v4327_v33, 2  ;;  %v4353_v45 = vld [vmem:[%s7051_s1 + $0xb] sm:$0x1]  ;;  %v53_v46 = vld [vmem:[%s7052_s2 + $0x30] sm:$0xff]  ;;  %v241_v47 = vsel %vm181_vm5, %v240_v21, %v239_v40  ;;  %v170_v48 = vsel %vm169_vm1, %v168_v36, %v4290_v24  ;;  %v186_v49 = vrot.slane %v4332_v34, 1  ;;  %v54_v53 = vld [vmem:[%s7052_s2 + $0x38] sm:$0xff] }
  0x1f   :  { %v4362_v50 = vpack.c.bf16 %v52_v39, %v51_v26  ;;  %v138_v51 = vld [vmem:[%s7051_s1 + $0x13] sm:$0x1]  ;;  %v139_v52 = vld [vmem:[%s7051_s1 + $0x1b] sm:$0x1]  ;;  %v243_v54 = vsel %vm184_vm6, %v242_v22, %v241_v47  ;;  %v173_v55 = vsel %vm172_vm2, %v171_v37, %v170_v48  ;;  %v4378_v56 = vld [vmem:[%s7051_s1 + $0x23] sm:$0x1]  ;;  %v4388_v59 = vpack.c.bf16 %v54_v53, %v53_v46 }
  0x20   :  { %v4383_v57 = vld [vmem:[%s7051_s1 + $0x2b] sm:$0x1]  ;;  %v142_v58 = vld [vmem:[%s7051_s1 + $0x33] sm:$0x1]  ;;  %v245_v60 = vsel %vm187_vm7, %v244_v23, %v243_v54  ;;  %v176_v61 = vsel %vm175_vm3, %v174_v38, %v173_v55  ;;  %v143_v62 = vld [vmem:[%s7051_s1 + $0x3b] sm:$0x1] }
  0x21   :  { %3680 = vmatpush3.bf16.msra.mxu0 %v4362_v50  ;;  %3704 = vmatpush3.bf16.msra.mxu1 %v4362_v50  ;;  %v260_v63 = vrot.slane %v4353_v45, 7  ;;  %v262_v3 = vrot.slane %v138_v51, 6  ;;  %v4401_v4 = vld [vmem:[%s7051_s1 + $0x1] sm:$0x1]  ;;  %v247_v5 = vsel %vm190_vm8, %v245_v60, 0.0  ;;  %v179_v7 = vsel %vm178_vm4, %v177_v41, %v176_v61  ;;  %s4170_s27 = smov 64  }
  0x22   :  { %3681 = vmatprep.subr.bf16.mxu0 %v7065_v0  ;;  %3705 = vmatprep.subr.bf16.mxu1 %v7065_v0  ;;  %v264_v8 = vrot.slane %v139_v52, 5  ;;  %v266_v9 = vrot.slane %v4378_v56, 4  ;;  %v4411_v10 = vld [vmem:[%s7051_s1 + $0x9] sm:$0x1]  ;;  %v182_v11 = vsel %vm181_vm5, %v180_v42, %v179_v7  ;;  %v268_v14 = vrot.slane %v4383_v57, 3  ;;  %s4171_s28 = smov 96  }
  0x23   :  { %248 = vadd.xlane.f32.xlu1 %v247_v5  ;;  %v261_v12 = vsel %vm169_vm1, %v260_v63, %v136_v44  ;;  %v270_v15 = vrot.slane %v142_v58, 2  ;;  %v4419_v16 = vld [vmem:[%s7051_s1 + $0x11] sm:$0x1]  ;;  %v4424_v17 = vld [vmem:[%s7051_s1 + $0x19] sm:$0x1]  ;;  %v185_v18 = vsel %vm184_vm6, %v183_v43, %v182_v11  ;;  %v272_v20 = vrot.slane %v143_v62, 1 }
  0x24   :  { %v263_v19 = vsel %vm172_vm2, %v262_v3, %v261_v12  ;;  %v4431_v21 = vld [vmem:[%s7051_s1 + $0x21] sm:$0x1]  ;;  %v4436_v22 = vld [vmem:[%s7051_s1 + $0x29] sm:$0x1]  ;;  %v204_v23 = vrot.slane %v4411_v10, 7  ;;  %v188_v26 = vsel %vm187_vm7, %v186_v49, %v185_v18  ;;  %v206_v36 = vrot.slane %v4419_v16, 6 }
  0x25   :  { %v265_v27 = vsel %vm175_vm3, %v264_v8, %v263_v19  ;;  %v4444_v31 = vld [vmem:[%s7051_s1 + $0x31] sm:$0x1]  ;;  %v4449_v35 = vld [vmem:[%s7051_s1 + $0x39] sm:$0x1]  ;;  %v208_v37 = vrot.slane %v4424_v17, 5  ;;  %3683 = vmatpush3.bf16.msra.mxu0 %v4388_v59  ;;  %3707 = vmatpush3.bf16.msra.mxu1 %v4388_v59  ;;  %v191_v38 = vsel %vm190_vm8, %v188_v26, 0.0 }
  0x26   :  { %v267_v39 = vsel %vm178_vm4, %v266_v9, %v265_v27  ;;  %v205_v40 = vsel %vm169_vm1, %v204_v23, %v4401_v4  ;;  %v210_v41 = vrot.slane %v4431_v21, 4  ;;  %3684 = vmatprep.subr.bf16.mxu0 %v7065_v0  ;;  %3708 = vmatprep.subr.bf16.mxu1 %v7065_v0  ;;  %v4465_v42 = vld [vmem:[%s7051_s1 + $0x5] sm:$0x1]  ;;  %v153_v43 = vld [vmem:[%s7051_s1 + $0xd] sm:$0x1]  ;;  %v212_v47 = vrot.slane %v4436_v22, 3 }
  0x27   :  { %192 = vadd.xlane.f32.xlu0 %v191_v38  ;;  %v269_v44 = vsel %vm181_vm5, %v268_v14, %v267_v39  ;;  %v207_v46 = vsel %vm172_vm2, %v206_v36, %v205_v40  ;;  %v214_v48 = vrot.slane %v4444_v31, 2  ;;  %v4477_v49 = vld [vmem:[%s7051_s1 + $0x15] sm:$0x1]  ;;  %v4482_v51 = vld [vmem:[%s7051_s1 + $0x1d] sm:$0x1]  ;;  %v216_v54 = vrot.slane %v4449_v35, 1 }
  0x28   :  { %7220 = vst [vmem:[#allocation9_spill] sm:$0xff] %v4482_v51  ;;  %v271_v52 = vsel %vm184_vm6, %v270_v15, %v269_v44  ;;  %v209_v53 = vsel %vm175_vm3, %v208_v37, %v207_v46  ;;  %v156_v55 = vld [vmem:[%s7051_s1 + $0x25] sm:$0x1]  ;;  %v157_v58 = vld [vmem:[%s7051_s1 + $0x2d] sm:$0x1]  ;;  %v316_v60 = vrot.slane %v153_v43, 7 }
  0x29   :  { %v273_v61 = vsel %vm187_vm7, %v272_v20, %v271_v52  ;;  %v211_v62 = vsel %vm178_vm4, %v210_v41, %v209_v53  ;;  %v158_v63 = vld [vmem:[%s7051_s1 + $0x35] sm:$0x1]  ;;  %v159_v3 = vld [vmem:[%s7051_s1 + $0x3d] sm:$0x1]  ;;  %v318_v5 = vrot.slane %v4477_v49, 6  ;;  %v320_v7 = vrot.slane %v4482_v51, 5 }
  0x2a   :  { %v275_v8 = vsel %vm190_vm8, %v273_v61, 0.0  ;;  %v213_v9 = vsel %vm181_vm5, %v212_v47, %v211_v62  ;;  %v317_v11 = vsel %vm169_vm1, %v316_v60, %v4465_v42  ;;  %v322_v12 = vrot.slane %v156_v55, 4  ;;  %v144_v14 = vld [vmem:[%s7051_s1 + $0x4] sm:$0x1]  ;;  %v145_v15 = vld [vmem:[%s7051_s1 + $0xc] sm:$0x1] }
  0x2b   :  { %276 = vadd.xlane.f32.xlu1 %v275_v8  ;;  %v215_v18 = vsel %vm184_vm6, %v214_v48, %v213_v9  ;;  %v319_v19 = vsel %vm172_vm2, %v318_v5, %v317_v11  ;;  %v324_v20 = vrot.slane %v157_v58, 3  ;;  %v326_v23 = vrot.slane %v158_v63, 2  ;;  %v146_v26 = vld [vmem:[%s7051_s1 + $0x14] sm:$0x1]  ;;  %v147_v27 = vld [vmem:[%s7051_s1 + $0x1c] sm:$0x1] }
  0x2c   :  { %v55_v36 = vld [vmem:[%s7052_s2 + $0x40] sm:$0xff]  ;;  %v217_v37 = vsel %vm187_vm7, %v216_v54, %v215_v18  ;;  %v321_v38 = vsel %vm175_vm3, %v320_v7, %v319_v19  ;;  %v328_v39 = vrot.slane %v159_v3, 1  ;;  %v149_v41 = vld [vmem:[%s7051_s1 + $0x2c] sm:$0x1]  ;;  %v288_v43 = vrot.slane %v145_v15, 7  ;;  %v57_v5 = vld [vmem:[%s7052_s2 + $0x50] sm:$0xff] }
  0x2d   :  { %v148_v40 = vld [vmem:[%s7051_s1 + $0x24] sm:$0x1]  ;;  %v219_v44 = vsel %vm190_vm8, %v217_v37, 0.0  ;;  %v323_v46 = vsel %vm178_vm4, %v322_v12, %v321_v38  ;;  %v150_v47 = vld [vmem:[%s7051_s1 + $0x34] sm:$0x1]  ;;  %v290_v52 = vrot.slane %v146_v26, 6 }
  0x2e   :  { %v151_v48 = vld [vmem:[%s7051_s1 + $0x3c] sm:$0x1]  ;;  %220 = vadd.xlane.f32.xlu0 %v219_v44  ;;  %v325_v53 = vsel %vm181_vm5, %v324_v20, %v323_v46  ;;  %v289_v54 = vsel %vm169_vm1, %v288_v43, %v144_v14  ;;  %v292_v55 = vrot.slane %v147_v27, 5  ;;  %v294_v58 = vrot.slane %v148_v40, 4  ;;  %v56_v60 = vld [vmem:[%s7052_s2 + $0x48] sm:$0xff]  ;;  %v59_v14 = vld [vmem:[%s7052_s2 + $0x60] sm:$0xff] }
  0x2f   :  { %v327_v61 = vsel %vm184_vm6, %v326_v23, %v325_v53  ;;  %v291_v62 = vsel %vm172_vm2, %v290_v52, %v289_v54  ;;  %v296_v63 = vrot.slane %v149_v41, 3  ;;  %v298_v3 = vrot.slane %v150_v47, 2  ;;  %v58_v7 = vld [vmem:[%s7052_s2 + $0x58] sm:$0xff]  ;;  %v64_v15 = vld [vmem:[%s7050_s0] sm:$0x1]  ;;  %v60_v23 = vld [vmem:[%s7052_s2 + $0x68] sm:$0xff] }
  0x30   :  { %v329_v8 = vsel %vm187_vm7, %v328_v39, %v327_v61  ;;  %v293_v9 = vsel %vm175_vm3, %v292_v55, %v291_v62  ;;  %v300_v11 = vrot.slane %v151_v48, 1  ;;  %v4555_v12 = vpack.c.bf16 %v56_v60, %v55_v36  ;;  %v65_v18 = vld [vmem:[%s7050_s0 + $0x8] sm:$0x1]  ;;  %v66_v26 = vld [vmem:[%s7050_s0 + $0x10] sm:$0x1]  ;;  %v62_v44 = vld [vmem:[%s7052_s2 + $0x78] sm:$0xff] }
  0x31   :  { %v331_v19 = vsel %vm190_vm8, %v329_v8, 0.0  ;;  %v295_v20 = vsel %vm178_vm4, %v294_v58, %v293_v9  ;;  %v67_v27 = vld [vmem:[%s7050_s0 + $0x18] sm:$0x1]  ;;  %v4579_v37 = vpack.c.bf16 %v58_v7, %v57_v5  ;;  %v68_v38 = vld [vmem:[%s7050_s0 + $0x20] sm:$0x1]  ;;  %v61_v43 = vld [vmem:[%s7052_s2 + $0x70] sm:$0xff]  ;;  %v4601_v53 = vpack.c.bf16 %v60_v23, %v59_v14 }
  0x32   :  { %332 = vadd.xlane.f32.xlu1 %v331_v19  ;;  %v297_v36 = vsel %vm181_vm5, %v296_v63, %v295_v20  ;;  %3686 = vmatpush3.bf16.msra.mxu0 %v4555_v12  ;;  %v69_v39 = vld [vmem:[%s7050_s0 + $0x28] sm:$0x1]  ;;  %v70_v40 = vld [vmem:[%s7050_s0 + $0x30] sm:$0x1]  ;;  %v344_v46 = vrot.slane %v65_v18, 7  ;;  %v346_v47 = vrot.slane %v66_v26, 6 }
  0x33   :  { %v299_v41 = vsel %vm184_vm6, %v298_v3, %v297_v36  ;;  %3710 = vmatpush3.bf16.msra.mxu1 %v4555_v12  ;;  %3687 = vmatprep.subr.bf16.mxu0 %v7065_v0  ;;  %v348_v48 = vrot.slane %v67_v27, 5  ;;  %v71_v54 = vld [vmem:[%s7050_s0 + $0x38] sm:$0x1]  ;;  %v350_v55 = vrot.slane %v68_v38, 4  ;;  %v352_v58 = vrot.slane %v69_v39, 3  ;;  %s4169_s2 = smov 32  }
  0x34   :  { %v301_v52 = vsel %vm187_vm7, %v300_v11, %v299_v41  ;;  %3711 = vmatprep.subr.bf16.mxu1 %v7065_v0  ;;  %v72_v60 = vld [vmem:[%s7050_s0 + $0x1] sm:$0x1]  ;;  %v345_v62 = vsel %vm169_vm1, %v344_v46, %v64_v15  ;;  %v354_v63 = vrot.slane %v70_v40, 2  ;;  %v73_v3 = vld [vmem:[%s7050_s0 + $0x9] sm:$0x1]  ;;  %vm1308_vm9 = vcmask 261120  }
  0x35   :  { %v303_v61 = vsel %vm190_vm8, %v301_v52, 0.0  ;;  %v74_v5 = vld [vmem:[%s7050_s0 + $0x11] sm:$0x1]  ;;  %v2864_v7 = vadd.f32 %v72_v60, %v64_v15  ;;  %v347_v8 = vsel %vm172_vm2, %v346_v47, %v345_v62  ;;  %v75_v9 = vld [vmem:[%s7050_s0 + $0x19] sm:$0x1]  ;;  %v2865_v19 = vadd.f32 %v73_v3, %v65_v18 }
  0x36   :  { %304 = vadd.xlane.f32.xlu0 %v303_v61  ;;  %3689 = vmatpush3.bf16.msra.mxu0 %v4579_v37  ;;  %v76_v11 = vld [vmem:[%s7050_s0 + $0x21] sm:$0x1]  ;;  %v77_v14 = vld [vmem:[%s7050_s0 + $0x29] sm:$0x1]  ;;  %v2866_v20 = vadd.f32 %v74_v5, %v66_v26  ;;  %v349_v15 = vsel %vm175_vm3, %v348_v48, %v347_v8  ;;  %v78_v23 = vld [vmem:[%s7050_s0 + $0x31] sm:$0x1]  ;;  %v2867_v46 = vadd.f32 %v75_v9, %v67_v27 }
  0x37   :  { %3713 = vmatpush3.bf16.msra.mxu1 %v4579_v37  ;;  %3690 = vmatprep.subr.bf16.mxu0 %v7065_v0  ;;  %v438_v36 = vrot.slane %v73_v3, 7  ;;  %v440_v41 = vrot.slane %v74_v5, 6  ;;  %v4635_v47 = vpack.c.bf16 %v62_v44, %v61_v43  ;;  %v351_v18 = vsel %vm178_vm4, %v350_v55, %v349_v15  ;;  %v79_v26 = vld [vmem:[%s7050_s0 + $0x39] sm:$0x1]  ;;  %v4792_v2 = vld [vmem:[%s7050_s0 + $0x24] sm:$0x1] }
  0x38   :  { %3714 = vmatprep.subr.bf16.mxu1 %v7065_v0  ;;  %v442_v52 = vrot.slane %v75_v9, 5  ;;  %v444_v61 = vrot.slane %v76_v11, 4  ;;  %v353_v48 = vsel %vm181_vm5, %v352_v58, %v351_v18  ;;  %v356_v62 = vrot.slane %v71_v54, 1  ;;  %v4683_v18 = vld [vmem:[%s7050_s0 + $0x22] sm:$0x1] }
  0x39   :  { %v439_v8 = vsel %vm169_vm1, %v438_v36, %v72_v60  ;;  %v446_v3 = vrot.slane %v77_v14, 3  ;;  %v448_v43 = vrot.slane %v78_v23, 2  ;;  %v2868_v44 = vadd.f32 %v76_v11, %v68_v38  ;;  %v4671_v11 = vld [vmem:[%s7050_s0 + $0x12] sm:$0x1]  ;;  %v4812_v51 = vld [vmem:[%s7050_s0 + $0x34] sm:$0x1] }
  0x3a   :  { %3692 = vmatpush3.bf16.msra.mxu0 %v4601_v53  ;;  %v441_v27 = vsel %vm172_vm2, %v440_v41, %v439_v8  ;;  %v2869_v5 = vadd.f32 %v77_v14, %v69_v39  ;;  %v355_v55 = vsel %vm184_vm6, %v354_v63, %v353_v48  ;;  %v450_v58 = vrot.slane %v79_v26, 1  ;;  %v4658_v63 = vld [vmem:[%s7050_s0 + $0x2] sm:$0x1]  ;;  %v4676_v14 = vld [vmem:[%s7050_s0 + $0x1a] sm:$0x1] }
  0x3b   :  { %3716 = vmatpush3.bf16.msra.mxu1 %v4601_v53  ;;  %3693 = vmatprep.subr.bf16.mxu0 %v7065_v0  ;;  %v443_v9 = vsel %vm175_vm3, %v442_v52, %v441_v27  ;;  %v2870_v15 = vadd.f32 %v78_v23, %v70_v40  ;;  %v2871_v36 = vadd.f32 %v79_v26, %v71_v54  ;;  %v4666_v54 = vld [vmem:[%s7050_s0 + $0xa] sm:$0x1]  ;;  %v4693_v52 = vld [vmem:[%s7050_s0 + $0x32] sm:$0x1]  ;;  %vm1620_vm10 = vcmask 523520  }
  0x3c   :  { %3717 = vmatprep.subr.bf16.mxu1 %v7065_v0  ;;  %v445_v60 = vsel %vm178_vm4, %v444_v61, %v443_v9  ;;  %v357_v38 = vsel %vm187_vm7, %v356_v62, %v355_v55  ;;  %v2872_v23 = vadd.f32 %v2864_v7, %v4658_v63  ;;  %v4688_v26 = vld [vmem:[%s7050_s0 + $0x2a] sm:$0x1]  ;;  %v2873_v61 = vadd.f32 %v2865_v19, %v4666_v54  ;;  %v4701_v62 = vld [vmem:[%s7050_s0 + $0x3a] sm:$0x1]  ;;  %v4733_v55 = vld [vmem:[%s7050_s0 + $0x23] sm:$0x1] }
  0x3d   :  { %v447_v41 = vsel %vm181_vm5, %v446_v3, %v445_v60  ;;  %v2874_v7 = vadd.f32 %v2866_v20, %v4671_v11  ;;  %v2875_v48 = vadd.f32 %v2867_v46, %v4676_v14  ;;  %v2876_v8 = vadd.f32 %v2868_v44, %v4683_v18  ;;  %v88_v20 = vld [vmem:[%s7050_s0 + $0x3] sm:$0x1]  ;;  %v89_v46 = vld [vmem:[%s7050_s0 + $0xb] sm:$0x1]  ;;  %v4744_v60 = vld [vmem:[%s7050_s0 + $0x33] sm:$0x1] }
  0x3e   :  { %3695 = vmatpush3.bf16.msra.mxu0 %v4635_v47  ;;  %v449_v39 = vsel %vm184_vm6, %v448_v43, %v447_v41  ;;  %v2877_v3 = vadd.f32 %v2869_v5, %v4688_v26  ;;  %v2878_v27 = vadd.f32 %v2870_v15, %v4693_v52  ;;  %v2879_v19 = vadd.f32 %v2871_v36, %v4701_v62  ;;  %v90_v43 = vld [vmem:[%s7050_s0 + $0x13] sm:$0x1]  ;;  %v4728_v5 = vld [vmem:[%s7050_s0 + $0x1b] sm:$0x1]  ;;  %v4738_v9 = vld [vmem:[%s7050_s0 + $0x2b] sm:$0x1] }
  0x3f   :  { %3719 = vmatpush3.bf16.msra.mxu1 %v4635_v47  ;;  %v451_v40 = vsel %vm187_vm7, %v450_v58, %v449_v39  ;;  %3720 = vmatprep.subr.bf16.mxu0 %v7065_v0  ;;  %v2880_v44 = vadd.f32 %v2872_v23, %v88_v20  ;;  %v2881_v58 = vadd.f32 %v2873_v61, %v89_v46  ;;  %v4749_v36 = vld [vmem:[%s7050_s0 + $0x3b] sm:$0x1]  ;;  %v532_v61 = vrot.slane %v4666_v54, 7  ;;  %v4780_v54 = vld [vmem:[%s7050_s0 + $0x1c] sm:$0x1] }
  0x40   :  { %3744 = vmatprep.subr.bf16.mxu1 %v7065_v0  ;;  %v2882_v15 = vadd.f32 %v2874_v7, %v90_v43  ;;  %v2883_v41 = vadd.f32 %v2875_v48, %v4728_v5  ;;  %v2885_v39 = vadd.f32 %v2877_v3, %v4738_v9  ;;  %v2887_v23 = vadd.f32 %v2879_v19, %v4749_v36  ;;  %v4764_v48 = vld [vmem:[%s7050_s0 + $0x4] sm:$0x1]  ;;  %v4775_v3 = vld [vmem:[%s7050_s0 + $0x14] sm:$0x1] }
  0x41   :  { %3425 = vmatmul.mubr.f32.vlgmr.msra.gmra.mrb[0].mxu0 %v357_v38  ;;  %v2884_v38 = vadd.f32 %v2876_v8, %v4733_v55  ;;  %v626_v7 = vrot.slane %v89_v46, 7  ;;  %v4769_v8 = vld [vmem:[%s7050_s0 + $0xc] sm:$0x1]  ;;  %v534_v46 = vrot.slane %v4671_v11, 6  ;;  %v533_v11 = vsel %vm169_vm1, %v532_v61, %v4658_v63 }
  0x42   :  { %3460 = vmatmul.mubr.f32.vlgmr.msra.gmra.mrb[0].mxu1 %v451_v40  ;;  %3722 = vmatpush3.bf16.msra.mxu0 %v4252_v6  ;;  %v2886_v40 = vadd.f32 %v2878_v27, %v4744_v60  ;;  %v2888_v27 = vadd.f32 %v2880_v44, %v4764_v48  ;;  %v4784_v19 = vadd.f32 %v2881_v58, %v4769_v8  ;;  %vm1932_vm11 = vcmask 785920  }
  0x43   :  { %3746 = vmatpush3.bf16.msra.mxu1 %v4252_v6  ;;  %905 = vperm.xlu1 %3917, %v4295_v25   ;;  %v4800_v44 = vadd.f32 %v2882_v15, %v4775_v3  ;;  %v4803_v58 = vadd.f32 %v2883_v41, %v4780_v54  ;;  %v4817_v15 = vld [vmem:[%s7050_s0 + $0x3c] sm:$0x1]  ;;  %v4820_v41 = vadd.f32 %v2884_v38, %v4792_v2  ;;  %v4838_v38 = vld [vmem:[%s7050_s0 + $0x5] sm:$0x1]  ;;  %vm2244_vm12 = vcmask 1048320  }
  0x44   :  { %3723 = vmatprep.subr.bf16.mxu0 %v7065_v0  ;;  %3747 = vmatprep.subr.bf16.mxu1 %v7065_v0  ;;  %7221 = vst [vmem:[#allocation10_spill] sm:$0xff] %v4784_v19  ;;  %v628_v19 = vrot.slane %v90_v43, 6  ;;  %v627_v63 = vsel %vm169_vm1, %v626_v7, %v88_v20  ;;  %v4828_v43 = vadd.f32 %v2886_v40, %v4812_v51  ;;  %vm2954_vm13 = vcmask 523264  }
  0x45   :  { %3494 = vmatprep.mubr.msk.f32.mxu0 %vm4161_vm0, %v7062_v1  ;;  %3529 = vmatprep.mubr.msk.f32.mxu1 %vm4161_vm0, %v7062_v1  ;;  %v4797_v1 = vld [vmem:[%s7050_s0 + $0x2c] sm:$0x1]  ;;  %7222 = vst [vmem:[#allocation11_spill] sm:$0xff] %v4800_v44  ;;  %7223 = vst [vmem:[#allocation12_spill] sm:$0xff] %v4803_v58  ;;  %v4831_v61 = vadd.f32 %v2887_v23, %v4817_v15  ;;  %v536_v44 = vrot.slane %v4676_v14, 5  ;;  %v535_v20 = vsel %vm172_vm2, %v534_v46, %v533_v11 }
  0x46   :  { %3725 = vmatpush3.bf16.msra.mxu0 %v4274_v13  ;;  %7224 = vst [vmem:[#allocation13_spill] sm:$0xff] %v4820_v41  ;;  %v4823_v58 = vadd.f32 %v2885_v39, %v4797_v1  ;;  %7226 = vst [vmem:[#allocation15_spill] sm:$0xff] %v4828_v43  ;;  %v630_v39 = vrot.slane %v4728_v5, 5  ;;  %v4845_v40 = vadd.f32 %v2888_v27, %v4838_v38  ;;  %v538_v23 = vrot.slane %v4683_v18, 4  ;;  %v4059_v43 = vld [vmem:[%s7051_s1 + $0x31] sm:$0x1] }
  0x47   :  { %3749 = vmatpush3.bf16.msra.mxu1 %v4274_v13  ;;  %909 = vperm.xlu1 %3917, %v4304_v28   ;;  %7227 = vst [vmem:[#allocation16_spill] sm:$0xff] %v4831_v61  ;;  %v629_v14 = vsel %vm172_vm2, %v628_v19, %v627_v63  ;;  %v537_v7 = vsel %vm175_vm3, %v536_v44, %v535_v20  ;;  %v632_v46 = vrot.slane %v4733_v55, 4  ;;  %v540_v27 = vrot.slane %v4688_v26, 3  ;;  %v7246_v61 = vld [vmem:[#allocation9_spill] sm:$0xff] }
  0x48   :  { %3726 = vmatprep.subr.bf16.mxu0 %v7065_v0  ;;  %3750 = vmatprep.subr.bf16.mxu1 %v7065_v0  ;;  %7225 = vst [vmem:[#allocation14_spill] sm:$0xff] %v4823_v58  ;;  %7228 = vst [vmem:[#allocation17_spill] sm:$0xff] %v4845_v40  ;;  %v631_v5 = vsel %vm175_vm3, %v630_v39, %v629_v14  ;;  %v539_v18 = vsel %vm178_vm4, %v538_v23, %v537_v7  ;;  %v634_v19 = vrot.slane %v4738_v9, 3  ;;  %v7073_v39 = vmov 1   ;;  %v106_v7 = vld [vmem:[%s7050_s0 + $0x15] sm:$0x1] }
  0x49   :  { %v633_v55 = vsel %vm178_vm4, %v632_v46, %v631_v5  ;;  %v542_v44 = vrot.slane %v4693_v52, 2  ;;  %v541_v26 = vsel %vm181_vm5, %v540_v27, %v539_v18  ;;  %v636_v11 = vrot.slane %v4744_v60, 2  ;;  %v107_v5 = vld [vmem:[%s7050_s0 + $0x1d] sm:$0x1]  ;;  %v108_v18 = vld [vmem:[%s7050_s0 + $0x25] sm:$0x1] }
  0x4a   :  { %3728 = vmatpush3.bf16.msra.mxu0 %v4362_v50  ;;  %v635_v9 = vsel %vm181_vm5, %v634_v19, %v633_v55  ;;  %v544_v63 = vrot.slane %v4701_v62, 1  ;;  %v638_v20 = vrot.slane %v4749_v36, 1  ;;  %v7229_v36 = vmov 0.0   ;;  %v109_v55 = vld [vmem:[%s7050_s0 + $0x2d] sm:$0x1] }
  0x4b   :  { %3752 = vmatpush3.bf16.msra.mxu1 %v4362_v50  ;;  %913 = vperm.xlu1 %3917, %v4309_v29   ;;  %v543_v52 = vsel %vm184_vm6, %v542_v44, %v541_v26  ;;  %v637_v60 = vsel %vm184_vm6, %v636_v11, %v635_v9  ;;  %v720_v23 = vrot.slane %v4769_v8, 7  ;;  %v816_v27 = vrot.slane %v106_v7, 6 }
  0x4c   :  { %901 = vperm.xlu0 %3916, %v4290_v24   ;;  %3729 = vmatprep.subr.bf16.mxu0 %v7065_v0  ;;  %v545_v62 = vsel %vm187_vm7, %v544_v63, %v543_v52  ;;  %v639_v14 = vsel %vm187_vm7, %v638_v20, %v637_v60  ;;  %v818_v19 = vrot.slane %v107_v5, 5  ;;  %v820_v44 = vrot.slane %v108_v18, 4  ;;  %v5071_v18 = vld [vmem:[%s7051_s1 + $0xa] sm:$0x1] }
  0x4d   :  { %3753 = vmatprep.subr.bf16.mxu1 %v7065_v0  ;;  %v721_v8 = vsel %vm169_vm1, %v720_v23, %v4764_v48  ;;  %v7071_v26 = vmov 2   ;;  %v822_v63 = vrot.slane %v109_v55, 3  ;;  %v7067_v20 = vmov 4   ;;  %7233 = vst [vmem:[#allocation20_spill] sm:$0xff] %v5071_v18 }
  0x4e   :  { %3731 = vmatpush3.bf16.msra.mxu0 %v4388_v59  ;;  %v7247_v40 = vmov 5  }
  0x4f   :  { %3755 = vmatpush3.bf16.msra.mxu1 %v4388_v59  ;;  %917 = vperm.xlu1 %3917, %v4314_v30  }
  0x50   :  { %1311 = vperm.xlu0 %3916, %v4401_v4   ;;  %3732 = vmatprep.subr.bf16.mxu0 %v7065_v0 }
  0x51   :  { %3756 = vmatprep.subr.bf16.mxu1 %v7065_v0 }
  0x52   :  { %3734 = vmatpush3.bf16.msra.mxu0 %v4555_v12 }
  0x53   :  { %3758 = vmatpush3.bf16.msra.mxu1 %v4555_v12  ;;  %921 = vperm.xlu1 %3917, %v4322_v32  }
  0x54   :  { %1323 = vperm.xlu0 %3916, %v4424_v17   ;;  %3735 = vmatprep.subr.bf16.mxu0 %v7065_v0 }
  0x55   :  { %3759 = vmatprep.subr.bf16.mxu1 %v7065_v0 }
  0x56   :  { %3737 = vmatpush3.bf16.msra.mxu0 %v4579_v37 }
  0x57   :  { %3761 = vmatpush3.bf16.msra.mxu1 %v4579_v37  ;;  %925 = vperm.xlu1 %3917, %v4327_v33  }
  0x58   :  { %1331 = vperm.xlu0 %3916, %v4436_v22   ;;  %3738 = vmatprep.subr.bf16.mxu0 %v7065_v0 }
  0x59   :  { %3762 = vmatprep.subr.bf16.mxu1 %v7065_v0 }
  0x5a   :  { %3740 = vmatpush3.bf16.msra.mxu0 %v4601_v53 }
  0x5b   :  { %3764 = vmatpush3.bf16.msra.mxu1 %v4601_v53  ;;  %929 = vperm.xlu1 %3917, %v4332_v34  }
  0x5c   :  { %1339 = vperm.xlu0 %3916, %v4449_v35   ;;  %3741 = vmatprep.subr.bf16.mxu0 %v7065_v0 }
  0x5d   :  { %3765 = vmatprep.subr.bf16.mxu1 %v7065_v0 }
  0x5e   :  { %3743 = vmatpush3.bf16.msra.mxu0 %v4635_v47 }
  0x5f   :  { %3767 = vmatpush3.bf16.msra.mxu1 %v4635_v47  ;;  %3918 = vset.pattern.permute.xlu1 %v7073_v39 }
  0x60   :  { %3924 = vset.pattern.permute.xlu0 %v7073_v39  ;;  %957 = vperm.xlu1 %3918, %v4290_v24  }
  0x61   :  { %961 = vperm.xlu0 %3924, %v4295_v25   ;;  %3495 = vmatmul.mubr.f32.vlgmr.msra.gmra.mrb[2].mxu0 %v545_v62  ;;  %v111_v62 = vld [vmem:[%s7050_s0 + $0x3d] sm:$0x1] }
  0x62   :  { %3530 = vmatmul.mubr.f32.vlgmr.msra.gmra.mrb[2].mxu1 %v639_v14  ;;  %3768 = vmatprep.subr.bf16.mxu0 %v7065_v0  ;;  %v826_v23 = vrot.slane %v111_v62, 1 }
  0x63   :  { %3792 = vmatprep.subr.bf16.mxu1 %v7065_v0  ;;  %3770 = vmatpush3.bf16.msra.mxu0 %v4252_v6 }
  0x64   :  { %3794 = vmatpush3.bf16.msra.mxu1 %v4252_v6  ;;  %965 = vperm.xlu1 %3918, %v4304_v28   ;;  %v105_v6 = vld [vmem:[%s7050_s0 + $0xd] sm:$0x1] }
  0x65   :  { %973 = vperm.xlu0 %3924, %v4314_v30   ;;  %3771 = vmatprep.subr.bf16.mxu0 %v7065_v0  ;;  %v814_v46 = vrot.slane %v105_v6, 7 }
  0x66   :  { %3795 = vmatprep.subr.bf16.mxu1 %v7065_v0  ;;  %3564 = vmatprep.mubr.msk.f32.mxu0 %vm4161_vm0, %v7229_v36 }
  0x67   :  { %3773 = vmatpush3.bf16.msra.mxu0 %v4274_v13  ;;  %3599 = vmatprep.mubr.msk.f32.mxu1 %vm4161_vm0, %v7229_v36 }
  0x68   :  { %3797 = vmatpush3.bf16.msra.mxu1 %v4274_v13  ;;  %969 = vperm.xlu1 %3918, %v4309_v29   ;;  %v722_v13 = vrot.slane %v4775_v3, 6  ;;  %v724_v3 = vrot.slane %v4780_v54, 5  ;;  %v726_v54 = vrot.slane %v4792_v2, 4  ;;  %v728_v2 = vrot.slane %v4797_v1, 3 }
  0x69   :  { %981 = vperm.xlu0 %3924, %v4327_v33   ;;  %3774 = vmatprep.subr.bf16.mxu0 %v7065_v0  ;;  %v730_v1 = vrot.slane %v4812_v51, 2  ;;  %v732_v51 = vrot.slane %v4817_v15, 1  ;;  %v7069_v15 = vmov 3  }
  0x6a   :  { %3798 = vmatprep.subr.bf16.mxu1 %v7065_v0  ;;  %v723_v48 = vsel %vm172_vm2, %v722_v13, %v721_v8 }
  0x6b   :  { %3776 = vmatpush3.bf16.msra.mxu0 %v4362_v50 }
  0x6c   :  { %3800 = vmatpush3.bf16.msra.mxu1 %v4362_v50  ;;  %977 = vperm.xlu1 %3918, %v4322_v32   ;;  %v815_v50 = vsel %vm169_vm1, %v814_v46, %v4838_v38 }
  0x6d   :  { %1355 = vperm.xlu0 %3924, %v4411_v10   ;;  %3777 = vmatprep.subr.bf16.mxu0 %v7065_v0  ;;  %v817_v38 = vsel %vm172_vm2, %v816_v27, %v815_v50 }
  0x6e   :  { %3801 = vmatprep.subr.bf16.mxu1 %v7065_v0  ;;  %v819_v11 = vsel %vm175_vm3, %v818_v19, %v817_v38 }
  0x6f   :  { %3779 = vmatpush3.bf16.msra.mxu0 %v4388_v59  ;;  %v821_v52 = vsel %vm178_vm4, %v820_v44, %v819_v11  ;;  %v5093_v44 = vld [vmem:[%s7051_s1 + $0x32] sm:$0x1] }
  0x70   :  { %3803 = vmatpush3.bf16.msra.mxu1 %v4388_v59  ;;  %985 = vperm.xlu1 %3918, %v4332_v34   ;;  %v725_v59 = vsel %vm175_vm3, %v724_v3, %v723_v48 }
  0x71   :  { %1367 = vperm.xlu0 %3924, %v4431_v21   ;;  %3780 = vmatprep.subr.bf16.mxu0 %v7065_v0  ;;  %v727_v9 = vsel %vm178_vm4, %v726_v54, %v725_v59  ;;  %v5082_v54 = vld [vmem:[%s7051_s1 + $0x22] sm:$0x1] }
  0x72   :  { %3804 = vmatprep.subr.bf16.mxu1 %v7065_v0  ;;  %v729_v60 = vsel %vm181_vm5, %v728_v2, %v727_v9 }
  0x73   :  { %3782 = vmatpush3.bf16.msra.mxu0 %v4555_v12  ;;  %v731_v6 = vsel %vm184_vm6, %v730_v1, %v729_v60  ;;  %v5121_v1 = vld [vmem:[%s7051_s1 + $0x3] sm:$0x1] }
  0x74   :  { %3806 = vmatpush3.bf16.msra.mxu1 %v4555_v12  ;;  %3919 = vset.pattern.permute.xlu1 %v7071_v26  ;;  %v110_v12 = vld [vmem:[%s7050_s0 + $0x35] sm:$0x1]  ;;  %v733_v46 = vsel %vm187_vm7, %v732_v51, %v731_v6  ;;  %7236 = vst [vmem:[#allocation23_spill] sm:$0xff] %v5121_v1 }
  0x75   :  { %1375 = vperm.xlu0 %3924, %v4444_v31   ;;  %1025 = vperm.xlu1 %3919, %v4295_v25   ;;  %v824_v14 = vrot.slane %v110_v12, 2 }
  0x76   :  { %3783 = vmatprep.subr.bf16.mxu0 %v7065_v0  ;;  %3807 = vmatprep.subr.bf16.mxu1 %v7065_v0 }
  0x77   :  { %3785 = vmatpush3.bf16.msra.mxu0 %v4579_v37 }
  0x78   :  { %3809 = vmatpush3.bf16.msra.mxu1 %v4579_v37  ;;  %3786 = vmatprep.subr.bf16.mxu0 %v7065_v0  ;;  %v823_v37 = vsel %vm181_vm5, %v822_v63, %v821_v52 }
  0x79   :  { %3926 = vset.pattern.permute.xlu0 %v7067_v20  ;;  %1029 = vperm.xlu1 %3919, %v4304_v28   ;;  %v825_v7 = vsel %vm184_vm6, %v824_v14, %v823_v37 }
  0x7a   :  { %1149 = vperm.xlu0 %3926, %v4290_v24   ;;  %3810 = vmatprep.subr.bf16.mxu1 %v7065_v0 }
  0x7b   :  { %3788 = vmatpush3.bf16.msra.mxu0 %v4601_v53 }
  0x7c   :  { %3812 = vmatpush3.bf16.msra.mxu1 %v4601_v53  ;;  %3789 = vmatprep.subr.bf16.mxu0 %v7065_v0  ;;  %v827_v53 = vsel %vm187_vm7, %v826_v23, %v825_v7  ;;  %v4053_v23 = vld [vmem:[%s7051_s1 + $0x20] sm:$0x1] }
  0x7d   :  { %1037 = vperm.xlu1 %3919, %v4314_v30   ;;  %3813 = vmatprep.subr.bf16.mxu1 %v7065_v0 }
  0x7e   :  { %1161 = vperm.xlu0 %3926, %v4309_v29  }
  0x7f   :  { %3791 = vmatpush3.bf16.msra.mxu0 %v4635_v47 }
  0x80   :  { %3815 = vmatpush3.bf16.msra.mxu1 %v4635_v47  ;;  %3816 = vmatprep.subr.bf16.mxu0 %v7065_v0  ;;  %v7075_v47 = vmov 5  }
  0x81   :  { %1045 = vperm.xlu1 %3919, %v4327_v33   ;;  %3852 = vmatprep.subr.bf16.mxu1 %v7065_v0 }
  0x82   :  { %1169 = vperm.xlu0 %3926, %v4322_v32   ;;  %3565 = vmatmul.mubr.f32.vlgmr.msra.gmra.mrb[4].mxu0 %v733_v46  ;;  %v4054_v46 = vld [vmem:[%s7051_s1 + $0x30] sm:$0x1] }
  0x83   :  { %3600 = vmatmul.mubr.f32.vlgmr.msra.gmra.mrb[4].mxu1 %v827_v53 }
  0x84   :  { %3634 = vmatprep.mubr.msk.f32.mxu1 %vm4161_vm0, %v7229_v36 }
  0x85   :  { %3920 = vset.pattern.permute.xlu1 %v7069_v15 }
  0x86   :  { %1177 = vperm.xlu0 %3926, %v4332_v34   ;;  %1085 = vperm.xlu1 %3920, %v4290_v24  }
  0x8a   :  { %1495 = vperm.xlu0 %3926, %v4401_v4   ;;  %1093 = vperm.xlu1 %3920, %v4304_v28  }
  0x8e   :  { %1507 = vperm.xlu0 %3926, %v4424_v17   ;;  %1097 = vperm.xlu1 %3920, %v4309_v29  }
  0x92   :  { %1515 = vperm.xlu0 %3926, %v4436_v22   ;;  %1105 = vperm.xlu1 %3920, %v4322_v32  }
  0x96   :  { %1523 = vperm.xlu0 %3926, %v4449_v35   ;;  %1113 = vperm.xlu1 %3920, %v4332_v34  }
  0x9a   :  { %3930 = vset.pattern.permute.xlu0 %v7075_v47  ;;  %3921 = vset.pattern.permute.xlu1 %v7067_v20 }
  0x9b   :  { %1217 = vperm.xlu0 %3930, %v4295_v25   ;;  %1153 = vperm.xlu1 %3921, %v4295_v25  }
  0x9f   :  { %1229 = vperm.xlu0 %3930, %v4314_v30   ;;  %1157 = vperm.xlu1 %3921, %v4304_v28  }
  0xa3   :  { %1237 = vperm.xlu0 %3930, %v4327_v33   ;;  %1165 = vperm.xlu1 %3921, %v4314_v30  }
  0xa7   :  { %1547 = vperm.xlu0 %3930, %v4411_v10   ;;  %1173 = vperm.xlu1 %3921, %v4327_v33  }
  0xab   :  { %1559 = vperm.xlu0 %3930, %v4431_v21   ;;  %3922 = vset.pattern.permute.xlu1 %v7075_v47 }
  0xac   :  { %1213 = vperm.xlu1 %3922, %v4290_v24  }
  0xaf   :  { %1567 = vperm.xlu0 %3930, %v4444_v31  }
  0xb0   :  { %1221 = vperm.xlu1 %3922, %v4304_v28   ;;  %v5022_v25 = vpop.xlane.xlu1 %248 }
  0xb3   :  { %3932 = vset.pattern.permute.xlu0 %v7071_v26 }
  0xb4   :  { %1021 = vperm.xlu0 %3932, %v4290_v24   ;;  %1225 = vperm.xlu1 %3922, %v4309_v29   ;;  %v5030_v33 = vpop.xlane.xlu0 %192  ;;  %v7230_v24 = vmov 0  }
  0xb8   :  { %1033 = vperm.xlu0 %3932, %v4309_v29   ;;  %1233 = vperm.xlu1 %3922, %v4322_v32   ;;  %v5028_v30 = vpop.xlane.xlu1 %276 }
  0xbb   :  { %v5036_v13 = vpop.xlane.xlu0 %220 }
  0xbc   :  { %1041 = vperm.xlu0 %3932, %v4322_v32   ;;  %1241 = vperm.xlu1 %3922, %v4332_v34  }
  0xbf   :  { %v5034_v28 = vpop.xlane.xlu1 %332 }
  0xc0   :  { %1049 = vperm.xlu0 %3932, %v4332_v34   ;;  %3923 = vset.pattern.permute.xlu1 %v7230_v24 }
  0xc1   :  { %1315 = vperm.xlu1 %3923, %v4411_v10  }
  0xc3   :  { %v5041_v29 = vpop.permute.xlu1 %905  ;;  %v5045_v8 = vpop.xlane.xlu0 %304 }
  0xc4   :  { %1399 = vperm.xlu0 %3932, %v4401_v4  }
  0xc5   :  { %1319 = vperm.xlu1 %3923, %v4419_v16  }
  0xc7   :  { %v5047_v32 = vpop.permute.xlu1 %909 }
  0xc8   :  { %1411 = vperm.xlu0 %3932, %v4424_v17  }
  0xc9   :  { %1327 = vperm.xlu1 %3923, %v4431_v21  }
  0xcb   :  { %v5051_v5 = vpop.permute.xlu1 %913  ;;  %v5053_v34 = vpop.permute.xlu0 %901 }
  0xcc   :  { %1419 = vperm.xlu0 %3932, %v4436_v22  }
  0xcd   :  { %1335 = vperm.xlu1 %3923, %v4444_v31  }
  0xcf   :  { %v5057_v27 = vpop.permute.xlu1 %917  ;;  %v5059_v50 = vpop.permute.xlu0 %1311 }
  0xd0   :  { %7231 = vst [vmem:[#allocation18_spill] sm:$0xff] %v5059_v50  ;;  %1427 = vperm.xlu0 %3932, %v4449_v35  }
  0xd1   :  { %3925 = vset.pattern.permute.xlu1 %v7073_v39 }
  0xd2   :  { %1351 = vperm.xlu1 %3925, %v4401_v4  }
  0xd3   :  { %v5064_v3 = vpop.permute.xlu1 %921  ;;  %v5066_v48 = vpop.permute.xlu0 %1323 }
  0xd4   :  { %7232 = vst [vmem:[#allocation19_spill] sm:$0xff] %v5066_v48  ;;  %1715 = vperm.xlu0 %3932, %v5071_v18  }
  0xd6   :  { %1359 = vperm.xlu1 %3925, %v4419_v16  }
  0xd7   :  { %v5075_v19 = vpop.permute.xlu1 %925  ;;  %v5077_v38 = vpop.permute.xlu0 %1331 }
  0xd8   :  { %7234 = vst [vmem:[#allocation21_spill] sm:$0xff] %v5077_v38  ;;  %1727 = vperm.xlu0 %3932, %v5082_v54  }
  0xda   :  { %1363 = vperm.xlu1 %3925, %v4424_v17  }
  0xdb   :  { %v5086_v59 = vpop.permute.xlu1 %929  ;;  %v5088_v55 = vpop.permute.xlu0 %1339 }
  0xdc   :  { %7235 = vst [vmem:[#allocation22_spill] sm:$0xff] %v5088_v55  ;;  %1735 = vperm.xlu0 %3932, %v5093_v44  }
  0xde   :  { %1371 = vperm.xlu1 %3925, %v4436_v22  }
  0xdf   :  { %v5097_v11 = vpop.permute.xlu1 %957 }
  0xe0   :  { %2027 = vperm.xlu0 %3932, %v4353_v45   ;;  %v5100_v2 = vpop.permute.xlu0 %961 }
  0xe2   :  { %1379 = vperm.xlu1 %3925, %v4449_v35  }
  0xe3   :  { %v5103_v9 = vpop.permute.xlu1 %965 }
  0xe4   :  { %2650 = vperm.xlu0 %3932, %v4477_v49   ;;  %v5106_v12 = vpop.permute.xlu0 %973 }
  0xe6   :  { %3927 = vset.pattern.permute.xlu1 %v7071_v26  ;;  %v4058_v26 = vld [vmem:[%s7051_s1 + $0x21] sm:$0x1] }
  0xe7   :  { %1403 = vperm.xlu1 %3927, %v4411_v10   ;;  %v5110_v63 = vpop.permute.xlu1 %969 }
  0xe8   :  { %2642 = vperm.xlu0 %3932, %v4465_v42   ;;  %v5113_v52 = vpop.permute.xlu0 %981 }
  0xeb   :  { %1407 = vperm.xlu1 %3927, %v4419_v16   ;;  %v5116_v45 = vpop.permute.xlu1 %977 }
  0xec   :  { %2023 = vperm.xlu0 %3932, %v5121_v1   ;;  %v5124_v60 = vpop.permute.xlu0 %1355 }
  0xed   :  { %7237 = vst [vmem:[#allocation24_spill] sm:$0xff] %v5124_v60 }
  0xef   :  { %1415 = vperm.xlu1 %3927, %v4431_v21   ;;  %v5127_v62 = vpop.permute.xlu1 %985 }
  0xf0   :  { %2039 = vperm.xlu0 %3932, %v4378_v56   ;;  %v5130_v42 = vpop.permute.xlu0 %1367  ;;  %v4052_v56 = vld [vmem:[%s7051_s1 + $0x8] sm:$0x1] }
  0xf1   :  { %7238 = vst [vmem:[#allocation25_spill] sm:$0xff] %v5130_v42  ;;  %v5276_v42 = vld [vmem:[%s7051_s1 + $0x1a] sm:$0x1] }
  0xf2   :  { %7258 = vst [vmem:[#allocation42_spill] sm:$0xff] %v5276_v42 }
  0xf3   :  { %1423 = vperm.xlu1 %3927, %v4444_v31  }
  0xf4   :  { %2043 = vperm.xlu0 %3932, %v4383_v57   ;;  %v5134_v14 = vpop.permute.xlu0 %1375  ;;  %v5136_v37 = vpop.permute.xlu1 %1025 }
  0xf5   :  { %7239 = vst [vmem:[#allocation26_spill] sm:$0xff] %v5134_v14 }
  0xf7   :  { %3928 = vset.pattern.permute.xlu1 %v7069_v15 }
  0xf8   :  { %3969 = vset.pattern.permute.xlu0 %v7069_v15  ;;  %1447 = vperm.xlu1 %3928, %v4401_v4   ;;  %v5141_v51 = vpop.permute.xlu1 %1029 }
  0xf9   :  { %1089 = vperm.xlu0 %3969, %v4052_v56   ;;  %v5146_v6 = vpop.permute.xlu0 %1149 }
  0xfc   :  { %1455 = vperm.xlu1 %3928, %v4419_v16   ;;  %v5149_v57 = vpop.permute.xlu1 %1037 }
  0xfd   :  { %1101 = vperm.xlu0 %3969, %v4053_v23   ;;  %v5154_v7 = vpop.permute.xlu0 %1161 }
 0x100   :  { %1459 = vperm.xlu1 %3928, %v4424_v17   ;;  %v5157_v4 = vpop.permute.xlu1 %1045 }
 0x101   :  { %1109 = vperm.xlu0 %3969, %v4054_v46   ;;  %v5162_v53 = vpop.permute.xlu0 %1169 }
 0x104   :  { %1467 = vperm.xlu1 %3928, %v4436_v22  }
 0x105   :  { %1451 = vperm.xlu0 %3969, %v4411_v10   ;;  %v5166_v16 = vpop.permute.xlu0 %1177  ;;  %v5168_v56 = vpop.permute.xlu1 %1085  ;;  %v4055_v10 = vld [vmem:[%s7051_s1 + $0x9] sm:$0x1] }
 0x106   :  { %7240 = vst [vmem:[#allocation27_spill] sm:$0xff] %v5166_v16 }
 0x108   :  { %1475 = vperm.xlu1 %3928, %v4449_v35  }
 0x109   :  { %1463 = vperm.xlu0 %3969, %v4431_v21   ;;  %v5172_v17 = vpop.permute.xlu0 %1495  ;;  %v5174_v23 = vpop.permute.xlu1 %1093  ;;  %v5188_v21 = vld [vmem:[%s7051_s1 + $0x12] sm:$0x1] }
 0x10a   :  { %7241 = vst [vmem:[#allocation28_spill] sm:$0xff] %v5172_v17  ;;  %7243 = vst [vmem:[#allocation30_spill] sm:$0xff] %v5188_v21  ;;  %v4063_v17 = vld [vmem:[%s7051_s1 + $0x39] sm:$0x1] }
 0x10c   :  { %3929 = vset.pattern.permute.xlu1 %v7067_v20 }
 0x10d   :  { %1471 = vperm.xlu0 %3969, %v4444_v31   ;;  %v5178_v46 = vpop.permute.xlu0 %1507  ;;  %1499 = vperm.xlu1 %3929, %v4055_v10   ;;  %v5183_v22 = vpop.permute.xlu1 %1097  ;;  %v4057_v31 = vld [vmem:[%s7051_s1 + $0x11] sm:$0x1] }
 0x10e   :  { %7242 = vst [vmem:[#allocation29_spill] sm:$0xff] %v5178_v46 }
 0x111   :  { %1767 = vperm.xlu0 %3969, %v5188_v21   ;;  %v5191_v35 = vpop.permute.xlu0 %1515  ;;  %1503 = vperm.xlu1 %3929, %v4057_v31   ;;  %v5196_v0 = vpop.permute.xlu1 %1105 }
 0x112   :  { %7244 = vst [vmem:[#allocation31_spill] sm:$0xff] %v5191_v35 }
 0x114   :  { %v5198_v20 = vpop.f32.mrb[0].mxu0 }
 0x115   :  { %2698 = vperm.xlu0 %3969, %v4477_v49   ;;  %v5201_v10 = vpop.permute.xlu0 %1523  ;;  %v5203_v15 = vpop.f32.mrb[0].mxu1  ;;  %1511 = vperm.xlu1 %3929, %v4058_v26   ;;  %v4060_v26 = vld [vmem:[%s7051_s1 + $0x1] sm:$0x1] }
 0x116   :  { %7245 = vst [vmem:[#allocation32_spill] sm:$0xff] %v5201_v10  ;;  %v5208_v39 = vpop.permute.xlu1 %1113  ;;  %v3426_v47 = vpop.f32.mrb[1].mxu0 }
 0x117   :  { %v3461_v36 = vpop.f32.mrb[1].mxu1 }
 0x119   :  { %2702 = vperm.xlu0 %3969, %v7246_v61   ;;  %1519 = vperm.xlu1 %3929, %v4059_v43  }
 0x11a   :  { %v5214_v49 = vpop.permute.xlu0 %1217  ;;  %v5216_v58 = vpop.permute.xlu1 %1153 }
 0x11d   :  { %3931 = vset.pattern.permute.xlu1 %v7247_v40  ;;  %v4061_v40 = vld [vmem:[%s7051_s1 + $0x19] sm:$0x1] }
 0x11e   :  { %v5219_v41 = vpop.permute.xlu0 %1229  ;;  %1543 = vperm.xlu1 %3931, %v4060_v26   ;;  %v5224_v36 = vpop.permute.xlu1 %1157  ;;  %v4062_v26 = vld [vmem:[%s7051_s1 + $0x29] sm:$0x1] }
 0x11f   :  { %7248 = vst [vmem:[#allocation9_spill] sm:$0xff] %v5219_v41  ;;  %v7266_v41 = vmov 1  }
 0x122   :  { %v5226_v61 = vpop.permute.xlu0 %1237  ;;  %1551 = vperm.xlu1 %3931, %v4057_v31   ;;  %v5228_v47 = vpop.permute.xlu1 %1165 }
 0x123   :  { %7249 = vst [vmem:[#allocation33_spill] sm:$0xff] %v5226_v61  ;;  %7250 = vst [vmem:[#allocation34_spill] sm:$0xff] %v5228_v47 }
 0x126   :  { %v5230_v43 = vpop.permute.xlu0 %1547  ;;  %1555 = vperm.xlu1 %3931, %v4061_v40   ;;  %v5235_v10 = vpop.permute.xlu1 %1173 }
 0x127   :  { %7251 = vst [vmem:[#allocation35_spill] sm:$0xff] %v5230_v43  ;;  %7252 = vst [vmem:[#allocation36_spill] sm:$0xff] %v5235_v10 }
 0x12a   :  { %v5237_v35 = vpop.permute.xlu0 %1559  ;;  %1563 = vperm.xlu1 %3931, %v4062_v26  }
 0x12b   :  { %7253 = vst [vmem:[#allocation37_spill] sm:$0xff] %v5237_v35  ;;  %v5242_v46 = vpop.permute.xlu1 %1213  ;;  %v5257_v35 = vld [vmem:[%s7051_s1 + $0x2] sm:$0x1] }
 0x12c   :  { %7255 = vst [vmem:[#allocation39_spill] sm:$0xff] %v5257_v35 }
 0x12e   :  { %v5244_v31 = vpop.permute.xlu0 %1567  ;;  %1571 = vperm.xlu1 %3931, %v4063_v17  }
 0x12f   :  { %7254 = vst [vmem:[#allocation38_spill] sm:$0xff] %v5244_v31  ;;  %v5249_v43 = vpop.permute.xlu1 %1221 }
 0x132   :  { %3933 = vset.pattern.permute.xlu1 %v7230_v24 }
 0x133   :  { %v5252_v40 = vpop.permute.xlu0 %1021  ;;  %1623 = vperm.xlu1 %3933, %v5257_v35   ;;  %v5260_v26 = vpop.permute.xlu1 %1225 }
 0x134   :  { %7256 = vst [vmem:[#allocation40_spill] sm:$0xff] %v5260_v26  ;;  %v5262_v31 = vpop.f32.mrb[2].mxu0 }
 0x135   :  { %v5264_v55 = vpop.f32.mrb[2].mxu1  ;;  %v3496_v17 = vpop.f32.mrb[3].mxu0 }
 0x136   :  { %v3531_v38 = vpop.f32.mrb[3].mxu1 }
 0x137   :  { %v5266_v48 = vpop.permute.xlu0 %1033  ;;  %1631 = vperm.xlu1 %3933, %v5188_v21   ;;  %v5269_v50 = vpop.permute.xlu1 %1233  ;;  %v5286_v38 = vld [vmem:[%s7051_s1 + $0x2a] sm:$0x1] }
 0x138   :  { %7257 = vst [vmem:[#allocation41_spill] sm:$0xff] %v5269_v50  ;;  %7260 = vst [vmem:[#allocation44_spill] sm:$0xff] %v5286_v38  ;;  %v5296_v50 = vld [vmem:[%s7051_s1 + $0x3a] sm:$0x1] }
 0x139   :  { %7263 = vst [vmem:[#allocation47_spill] sm:$0xff] %v5296_v50 }
 0x13b   :  { %v5271_v14 = vpop.permute.xlu0 %1041  ;;  %1635 = vperm.xlu1 %3933, %v5276_v42   ;;  %v5279_v1 = vpop.permute.xlu1 %1241 }
 0x13c   :  { %7259 = vst [vmem:[#allocation43_spill] sm:$0xff] %v5279_v1 }
 0x13f   :  { %v5281_v60 = vpop.permute.xlu0 %1049  ;;  %1643 = vperm.xlu1 %3933, %v5286_v38  }
 0x140   :  { %v5289_v17 = vpop.permute.xlu1 %1315 }
 0x141   :  { %7261 = vst [vmem:[#allocation45_spill] sm:$0xff] %v5289_v17  ;;  %v194_v17 = vadd.f32 1e-05, %v5030_v33 }
 0x143   :  { %v5291_v61 = vpop.permute.xlu0 %1399  ;;  %1651 = vperm.xlu1 %3933, %v5296_v50   ;;  %4032 = vrsqrt.f32 %v194_v17 }
 0x144   :  { %7262 = vst [vmem:[#allocation46_spill] sm:$0xff] %v5291_v61  ;;  %v5299_v1 = vpop.permute.xlu1 %1319  ;;  %v222_v61 = vadd.f32 1e-05, %v5036_v13 }
 0x145   :  { %7264 = vst [vmem:[#allocation48_spill] sm:$0xff] %v5299_v1 }
 0x146   :  { %4034 = vrsqrt.f32 %v222_v61  ;;  %v250_v61 = vadd.f32 1e-05, %v5022_v25 }
 0x147   :  { %v5301_v10 = vpop.permute.xlu0 %1411  ;;  %3934 = vset.pattern.permute.xlu1 %v7266_v41 }
 0x148   :  { %7265 = vst [vmem:[#allocation49_spill] sm:$0xff] %v5301_v10  ;;  %1667 = vperm.xlu1 %3934, %v5071_v18   ;;  %v5305_v47 = vpop.permute.xlu1 %1327  ;;  %4036 = vrsqrt.f32 %v250_v61 }
 0x149   :  { %7267 = vst [vmem:[#allocation50_spill] sm:$0xff] %v5305_v47 }
 0x14b   :  { %v5309_v16 = vpop.permute.xlu0 %1419 }
 0x14c   :  { %7268 = vst [vmem:[#allocation51_spill] sm:$0xff] %v5309_v16  ;;  %1671 = vperm.xlu1 %3934, %v5188_v21   ;;  %v5312_v26 = vpop.permute.xlu1 %1335 }
 0x14d   :  { %7269 = vst [vmem:[#allocation52_spill] sm:$0xff] %v5312_v26  ;;  %v5328_v26 = vpop.eup %4032 }
 0x14f   :  { %v5314_v1 = vpop.permute.xlu0 %1427 }
 0x150   :  { %7270 = vst [vmem:[#allocation53_spill] sm:$0xff] %v5314_v1  ;;  %1679 = vperm.xlu1 %3934, %v5082_v54   ;;  %v5333_v1 = vpop.eup %4034 }
 0x151   :  { %v5317_v10 = vpop.permute.xlu1 %1351  ;;  %7275 = vst [vmem:[#allocation58_spill] sm:$0xff] %v5333_v1  ;;  %v5346_v25 = vmul.f32 %v5333_v1, %v5203_v15  ;;  %v334_v15 = vadd.f32 1e-05, %v5034_v28 }
 0x152   :  { %7271 = vst [vmem:[#allocation54_spill] sm:$0xff] %v5317_v10  ;;  %v7276_v10 = vmov 2  }
 0x153   :  { %v5319_v18 = vpop.permute.xlu0 %1715  ;;  %7279 = vst [vmem:[#allocation61_spill] sm:$0xff] %v5346_v25  ;;  %v5358_v61 = vrot.slane %v5346_v25, 5  ;;  %v5374_v1 = vrot.slane %v5346_v25, 7 }
 0x154   :  { %7272 = vst [vmem:[#allocation55_spill] sm:$0xff] %v5319_v18  ;;  %1687 = vperm.xlu1 %3934, %v5093_v44   ;;  %v278_v18 = vadd.f32 1e-05, %v5028_v30 }
 0x155   :  { %v5322_v33 = vpop.f32.mrb[4].mxu0  ;;  %v5324_v13 = vpop.permute.xlu1 %1359  ;;  %7283 = vst [vmem:[#allocation65_spill] sm:$0xff] %v5358_v61  ;;  %7287 = vst [vmem:[#allocation69_spill] sm:$0xff] %v5374_v1 }
 0x156   :  { %7273 = vst [vmem:[#allocation56_spill] sm:$0xff] %v5324_v13  ;;  %v5326_v16 = vpop.f32.mrb[4].mxu1  ;;  %v3566_v47 = vpop.f32.mrb[5].mxu0  ;;  %4038 = vrsqrt.f32 %v278_v18 }
 0x157   :  { %v5331_v17 = vpop.permute.xlu0 %1727  ;;  %v3601_v54 = vpop.f32.mrb[5].mxu1  ;;  %v5342_v47 = vmul.f32 %v5328_v26, %v5198_v20 }
 0x158   :  { %7274 = vst [vmem:[#allocation57_spill] sm:$0xff] %v5331_v17  ;;  %3935 = vset.pattern.permute.xlu1 %v7276_v10  ;;  %v306_v17 = vadd.f32 1e-05, %v5045_v8  ;;  %v1011_v10 = vmul.f32 %v5374_v1, %v5127_v62 }
 0x159   :  { %1711 = vperm.xlu1 %3935, %v5257_v35   ;;  %v5337_v44 = vpop.permute.xlu1 %1363  ;;  %7278 = vst [vmem:[#allocation60_spill] sm:$0xff] %v5342_v47  ;;  %v5355_v30 = vrot.slane %v5342_v47, 5  ;;  %v5367_v8 = vrot.slane %v5342_v47, 7  ;;  %v5379_v28 = vrot.slane %v5342_v47, 1 }
 0x15a   :  { %7277 = vst [vmem:[#allocation59_spill] sm:$0xff] %v5337_v44  ;;  %4040 = vrsqrt.f32 %v306_v17  ;;  %v5382_v17 = vrot.slane %v5346_v25, 1 }
 0x15b   :  { %v5348_v54 = vpop.permute.xlu0 %1735  ;;  %7282 = vst [vmem:[#allocation64_spill] sm:$0xff] %v5355_v30  ;;  %7286 = vst [vmem:[#allocation68_spill] sm:$0xff] %v5367_v8  ;;  %v953_v18 = vmul.f32 %v5355_v30, %v5064_v3  ;;  %4042 = vrsqrt.f32 %v334_v15  ;;  %v5390_v3 = vrot.slane %v5342_v47, 4  ;;  %v5409_v30 = vrot.slane %v5346_v25, 3 }
 0x15c   :  { %7280 = vst [vmem:[#allocation62_spill] sm:$0xff] %v5348_v54  ;;  %7289 = vst [vmem:[#allocation71_spill] sm:$0xff] %v5379_v28  ;;  %v1005_v62 = vmul.f32 %v5382_v17, %v5100_v2 }
 0x15d   :  { %1719 = vperm.xlu1 %3935, %v5188_v21   ;;  %v5352_v35 = vpop.permute.xlu1 %1371  ;;  %v1009_v21 = vmul.f32 %v5358_v61, %v5116_v45  ;;  %7290 = vst [vmem:[#allocation72_spill] sm:$0xff] %v5382_v17  ;;  %7293 = vst [vmem:[#allocation75_spill] sm:$0xff] %v5390_v3  ;;  %v5393_v45 = vrot.slane %v5346_v25, 2  ;;  %v5406_v61 = vrot.slane %v5346_v25, 4  ;;  %v1007_v2 = vmul.f32 %v5409_v30, %v5110_v63 }
 0x15e   :  { %7281 = vst [vmem:[#allocation63_spill] sm:$0xff] %v5352_v35  ;;  %v955_v35 = vmul.f32 %v5367_v8, %v5086_v59  ;;  %7298 = vst [vmem:[#allocation80_spill] sm:$0xff] %v5409_v30  ;;  %v948_v8 = vmul.f32 %v5053_v34, %v5342_v47 }
 0x15f   :  { %v5360_v20 = vpop.permute.xlu0 %2027  ;;  %7294 = vst [vmem:[#allocation76_spill] sm:$0xff] %v5393_v45  ;;  %7297 = vst [vmem:[#allocation79_spill] sm:$0xff] %v5406_v61  ;;  %v1017_v13 = vadd.f32 %v1009_v21, %v953_v18  ;;  %v1004_v21 = vmul.f32 %v5097_v11, %v5346_v25  ;;  %v1006_v34 = vmul.f32 %v5393_v45, %v5103_v9 }
 0x160   :  { %7284 = vst [vmem:[#allocation66_spill] sm:$0xff] %v5360_v20 }
 0x161   :  { %1723 = vperm.xlu1 %3935, %v5276_v42   ;;  %v5364_v54 = vpop.permute.xlu1 %1379  ;;  %v5384_v42 = vpop.eup %4036 }
 0x162   :  { %7285 = vst [vmem:[#allocation67_spill] sm:$0xff] %v5364_v54  ;;  %7291 = vst [vmem:[#allocation73_spill] sm:$0xff] %v5384_v42  ;;  %v5387_v54 = vrot.slane %v5342_v47, 2  ;;  %v5401_v15 = vmul.f32 %v5384_v42, %v5262_v31  ;;  %v5419_v31 = vrot.slane %v5346_v25, 6  ;;  %v5423_v59 = vpop.eup %4038 }
 0x163   :  { %v5376_v20 = vpop.permute.xlu0 %2650  ;;  %7303 = vst [vmem:[#allocation85_spill] sm:$0xff] %v5423_v59  ;;  %v5435_v18 = vmul.f32 %v5423_v59, %v5264_v55  ;;  %v952_v55 = vmul.f32 %v5390_v3, %v5057_v27 }
 0x164   :  { %7288 = vst [vmem:[#allocation70_spill] sm:$0xff] %v5376_v20  ;;  %7292 = vst [vmem:[#allocation74_spill] sm:$0xff] %v5387_v54  ;;  %v5396_v20 = vrot.slane %v5342_v47, 3  ;;  %v5445_v11 = vrot.slane %v5401_v15, 2  ;;  %v5455_v59 = vpop.eup %4040  ;;  %v5458_v9 = vrot.slane %v5401_v15, 5  ;;  %v1010_v27 = vmul.f32 %v5419_v31, %v5113_v52 }
 0x165   :  { %1731 = vperm.xlu1 %3935, %v5286_v38   ;;  %7296 = vst [vmem:[#allocation78_spill] sm:$0xff] %v5401_v15  ;;  %v5416_v38 = vrot.slane %v5342_v47, 6  ;;  %7301 = vst [vmem:[#allocation83_spill] sm:$0xff] %v5419_v31  ;;  %v5470_v63 = vrot.slane %v5401_v15, 1  ;;  %v1068_v52 = vmul.f32 %v5252_v40, %v5401_v15 }
 0x166   :  { %7295 = vst [vmem:[#allocation77_spill] sm:$0xff] %v5396_v20  ;;  %v5411_v44 = vpop.permute.xlu1 %1403  ;;  %7304 = vst [vmem:[#allocation86_spill] sm:$0xff] %v5435_v18 }
 0x167   :  { %7299 = vst [vmem:[#allocation81_spill] sm:$0xff] %v5411_v44  ;;  %7300 = vst [vmem:[#allocation82_spill] sm:$0xff] %v5416_v38  ;;  %v5421_v42 = vpop.permute.xlu0 %2642  ;;  %v949_v44 = vmul.f32 %v5379_v28, %v5041_v29  ;;  %v951_v29 = vmul.f32 %v5396_v20, %v5051_v5  ;;  %v1019_v5 = vadd.f32 %v1011_v10, %v955_v35  ;;  %v5473_v20 = vrot.slane %v5435_v18, 5  ;;  %v5481_v10 = vpop.eup %4042 }
 0x168   :  { %7302 = vst [vmem:[#allocation84_spill] sm:$0xff] %v5421_v42  ;;  %v950_v42 = vmul.f32 %v5387_v54, %v5047_v32  ;;  %7305 = vst [vmem:[#allocation87_spill] sm:$0xff] %v5445_v11  ;;  %v1008_v32 = vmul.f32 %v5406_v61, %v5106_v12  ;;  %v5467_v54 = vrot.slane %v5401_v15, 3  ;;  %v1012_v12 = vadd.f32 %v1004_v21, %v948_v8 }
 0x169   :  { %1739 = vperm.xlu1 %3935, %v5296_v50   ;;  %7307 = vst [vmem:[#allocation89_spill] sm:$0xff] %v5455_v59  ;;  %7308 = vst [vmem:[#allocation90_spill] sm:$0xff] %v5458_v9  ;;  %v1013_v30 = vadd.f32 %v1005_v62, %v949_v44  ;;  %v5476_v35 = vrot.slane %v5401_v15, 4  ;;  %v5490_v44 = vld [vmem:[%s7051_s1 + $0xd] sm:$0x1]  ;;  %v1015_v21 = vadd.f32 %v1007_v2, %v951_v29  ;;  %v5513_v29 = vrot.slane %v5435_v18, 2 }
 0x16a   :  { %v5447_v1 = vpop.permute.xlu1 %1407  ;;  %7310 = vst [vmem:[#allocation92_spill] sm:$0xff] %v5467_v54  ;;  %7311 = vst [vmem:[#allocation93_spill] sm:$0xff] %v5470_v63  ;;  %v1016_v40 = vadd.f32 %v1008_v32, %v952_v55  ;;  %v1073_v62 = vmul.f32 %v5458_v9, %v5271_v14  ;;  %v1071_v14 = vmul.f32 %v5467_v54, %v5266_v48  ;;  %v5520_v32 = vrot.slane %v5435_v18, 1 }
 0x16b   :  { %7306 = vst [vmem:[#allocation88_spill] sm:$0xff] %v5447_v1  ;;  %v5460_v50 = vpop.permute.xlu0 %2023  ;;  %v954_v1 = vmul.f32 %v5416_v38, %v5075_v19  ;;  %7312 = vst [vmem:[#allocation94_spill] sm:$0xff] %v5473_v20  ;;  %v1014_v19 = vadd.f32 %v1006_v34, %v950_v42  ;;  %v1070_v42 = vmul.f32 %v5445_v11, %v5141_v51  ;;  %v5503_v34 = vrot.slane %v5435_v18, 7 }
 0x16c   :  { %7309 = vst [vmem:[#allocation91_spill] sm:$0xff] %v5460_v50  ;;  %7313 = vst [vmem:[#allocation95_spill] sm:$0xff] %v5476_v35  ;;  %v5485_v50 = vmul.f32 %v5455_v59, %v5322_v33  ;;  %v5500_v33 = vrot.slane %v5401_v15, 7  ;;  %v5508_v38 = vrot.slane %v5401_v15, 6  ;;  %v1069_v51 = vmul.f32 %v5470_v63, %v5136_v37 }
 0x16d   :  { %3936 = vset.pattern.permute.xlu1 %v7266_v41  ;;  %7314 = vst [vmem:[#allocation96_spill] sm:$0xff] %v5481_v10  ;;  %7316 = vst [vmem:[#allocation98_spill] sm:$0xff] %v5490_v44  ;;  %v1018_v45 = vadd.f32 %v1010_v27, %v954_v1  ;;  %v1137_v55 = vmul.f32 %v5473_v20, %v5196_v0  ;;  %v1076_v2 = vadd.f32 %v1068_v52, %v1012_v12 }
 0x16e   :  { %7315 = vst [vmem:[#allocation97_spill] sm:$0xff] %v5485_v50  ;;  %2598 = vperm.xlu1 %3936, %v5490_v44   ;;  %v5493_v8 = vpop.permute.xlu1 %1415  ;;  %7318 = vst [vmem:[#allocation100_spill] sm:$0xff] %v5500_v33  ;;  %v1072_v1 = vmul.f32 %v5476_v35, %v5149_v57  ;;  %v1075_v27 = vmul.f32 %v5500_v33, %v5281_v60  ;;  %v5530_v48 = vrot.slane %v5485_v50, 2  ;;  %v5533_v0 = vrot.slane %v5435_v18, 3  ;;  %v5542_v60 = vld [vmem:[%s7051_s1 + $0xb] sm:$0x1] }
 0x16f   :  { %7317 = vst [vmem:[#allocation99_spill] sm:$0xff] %v5493_v8  ;;  %7319 = vst [vmem:[#allocation101_spill] sm:$0xff] %v5503_v34  ;;  %v5505_v59 = vpop.permute.xlu0 %2039  ;;  %v1081_v12 = vadd.f32 %v1073_v62, %v1017_v13  ;;  %v1139_v52 = vmul.f32 %v5503_v34, %v5208_v39  ;;  %v1132_v57 = vmul.f32 %v5168_v56, %v5435_v18 }
 0x170   :  { %7320 = vst [vmem:[#allocation102_spill] sm:$0xff] %v5505_v59  ;;  %7321 = vst [vmem:[#allocation103_spill] sm:$0xff] %v5508_v38  ;;  %v1078_v59 = vadd.f32 %v1070_v42, %v1014_v19  ;;  %v5548_v19 = vrot.slane %v5485_v50, 3  ;;  %v5552_v13 = vmul.f32 %v5481_v10, %v5326_v16  ;;  %v1077_v39 = vadd.f32 %v1069_v51, %v1013_v30 }
 0x171   :  { %7322 = vst [vmem:[#allocation104_spill] sm:$0xff] %v5513_v29  ;;  %7323 = vst [vmem:[#allocation105_spill] sm:$0xff] %v5520_v32  ;;  %v1134_v42 = vmul.f32 %v5513_v29, %v5174_v23  ;;  %v1079_v62 = vadd.f32 %v1071_v14, %v1015_v21  ;;  %v1080_v34 = vadd.f32 %v1072_v1, %v1016_v40  ;;  %v5566_v23 = vrot.slane %v5485_v50, 1  ;;  %v5571_v21 = vld [vmem:[%s7051_s1 + $0x15] sm:$0x1] }
 0x172   :  { %3937 = vset.pattern.permute.xlu1 %v7230_v24  ;;  %v5527_v37 = vpop.permute.xlu1 %1423  ;;  %7325 = vst [vmem:[#allocation107_spill] sm:$0xff] %v5530_v48  ;;  %7326 = vst [vmem:[#allocation108_spill] sm:$0xff] %v5533_v0  ;;  %v1074_v56 = vmul.f32 %v5508_v38, %v5157_v4  ;;  %v1198_v35 = vmul.f32 %v5530_v48, %v5224_v36  ;;  %v1135_v16 = vmul.f32 %v5533_v0, %v5183_v22 }
 0x173   :  { %7324 = vst [vmem:[#allocation106_spill] sm:$0xff] %v5527_v37  ;;  %v5537_v20 = vpop.permute.xlu0 %2043  ;;  %7328 = vst [vmem:[#allocation110_spill] sm:$0xff] %v5542_v60  ;;  %1939 = vperm.xlu1 %3937, %v5542_v60   ;;  %v5557_v37 = vrot.slane %v5435_v18, 4  ;;  %v1083_v60 = vadd.f32 %v1075_v27, %v1019_v5  ;;  %v1142_v8 = vadd.f32 %v1134_v42, %v1078_v59  ;;  %v5579_v36 = vrot.slane %v5435_v18, 6 }
 0x174   :  { %7327 = vst [vmem:[#allocation109_spill] sm:$0xff] %v5537_v20  ;;  %7329 = vst [vmem:[#allocation111_spill] sm:$0xff] %v5548_v19  ;;  %v1140_v20 = vadd.f32 %v1132_v57, %v1076_v2  ;;  %v1145_v30 = vadd.f32 %v1137_v55, %v1081_v12  ;;  %v1199_v59 = vmul.f32 %v5548_v19, %v5154_v7  ;;  %v5584_v40 = vrot.slane %v5552_v13, 2 }
 0x175   :  { %7330 = vst [vmem:[#allocation112_spill] sm:$0xff] %v5557_v37  ;;  %7331 = vst [vmem:[#allocation113_spill] sm:$0xff] %v5566_v23  ;;  %v1196_v5 = vmul.f32 %v5146_v6, %v5485_v50  ;;  %v1143_v51 = vadd.f32 %v1135_v16, %v1079_v62  ;;  %v5587_v14 = vrot.slane %v5485_v50, 5  ;;  %v5591_v2 = vrot.slane %v5552_v13, 1 }
 0x176   :  { %7332 = vst [vmem:[#allocation114_spill] sm:$0xff] %v5571_v21  ;;  %7333 = vst [vmem:[#allocation115_spill] sm:$0xff] %v5579_v36  ;;  %v5594_v7 = vrot.slane %v5552_v13, 3  ;;  %v1082_v1 = vadd.f32 %v1074_v56, %v1018_v45  ;;  %v1147_v27 = vadd.f32 %v1139_v52, %v1083_v60  ;;  %v1206_v12 = vadd.f32 %v1198_v35, %v1142_v8  ;;  %v7341_v56 = vld [vmem:[#allocation40_spill] sm:$0xff] }
 0x177   :  { %2562 = vperm.xlu1 %3937, %v5571_v21   ;;  %v5574_v4 = vpop.permute.xlu1 %1447  ;;  %7334 = vst [vmem:[#allocation116_spill] sm:$0xff] %v5584_v40  ;;  %7335 = vst [vmem:[#allocation117_spill] sm:$0xff] %v5587_v14  ;;  %v1260_v6 = vmul.f32 %v5242_v46, %v5552_v13  ;;  %v5599_v57 = vrot.slane %v5485_v50, 7  ;;  %v1197_v62 = vmul.f32 %v5566_v23, %v5216_v58  ;;  %v5604_v16 = vrot.slane %v5485_v50, 4 }
 0x178   :  { %v1090_v22 = vpop.permute.xlu0 %1089  ;;  %7336 = vst [vmem:[#allocation118_spill] sm:$0xff] %v5591_v2  ;;  %7337 = vst [vmem:[#allocation119_spill] sm:$0xff] %v5594_v7  ;;  %v1204_v45 = vadd.f32 %v1196_v5, %v1140_v20  ;;  %v1262_v35 = vmul.f32 %v5584_v40, %v5249_v43  ;;  %v5612_v8 = vrot.slane %v5552_v13, 4  ;;  %v1201_v58 = vmul.f32 %v5587_v14, %v5162_v53  ;;  %v7343_v5 = vld [vmem:[#allocation27_spill] sm:$0xff] }
 0x179   :  { %v1133_v55 = vmul.f32 %v5520_v32, %v1090_v22  ;;  %7338 = vst [vmem:[#allocation120_spill] sm:$0xff] %v5599_v57  ;;  %7339 = vst [vmem:[#allocation121_spill] sm:$0xff] %v5604_v16  ;;  %v1207_v22 = vadd.f32 %v1199_v59, %v1143_v51  ;;  %v1261_v60 = vmul.f32 %v5591_v2, %v5214_v49  ;;  %v5623_v43 = vrot.slane %v5485_v50, 6 }
 0x17a   :  { %7340 = vst [vmem:[#allocation122_spill] sm:$0xff] %v5612_v8  ;;  %v1263_v20 = vmul.f32 %v5594_v7, %v7341_v56  ;;  %v1270_v59 = vadd.f32 %v1262_v35, %v1206_v12  ;;  %v1203_v51 = vmul.f32 %v5599_v57, %v7343_v5  ;;  %v1268_v14 = vadd.f32 %v1260_v6, %v1204_v45  ;;  %v7346_v56 = vld [vmem:[#allocation9_spill] sm:$0xff] }
 0x17b   :  { %v1141_v42 = vadd.f32 %v1133_v55, %v1077_v39  ;;  %3938 = vset.pattern.permute.xlu1 %v7266_v41  ;;  %v5607_v10 = vpop.permute.xlu1 %1455  ;;  %7342 = vst [vmem:[#allocation40_spill] sm:$0xff] %v5623_v43  ;;  %v5628_v55 = vrot.slane %v5552_v13, 5  ;;  %v1264_v12 = vmul.f32 %v5612_v8, %v7346_v56  ;;  %v1209_v7 = vadd.f32 %v1201_v58, %v1145_v30 }
 0x17c   :  { %v1102_v46 = vpop.permute.xlu0 %1101  ;;  %2602 = vperm.xlu1 %3938, %v5571_v21   ;;  %v1271_v21 = vadd.f32 %v1263_v20, %v1207_v22  ;;  %v5637_v19 = vrot.slane %v5552_v13, 7  ;;  %v5647_v6 = vrot.slane %v5552_v13, 6  ;;  %v1286_v45 = vrot.slane %v1270_v59, 6  ;;  %v7351_v20 = vld [vmem:[#allocation41_spill] sm:$0xff] }
 0x17d   :  { %v1205_v52 = vadd.f32 %v1197_v62, %v1141_v42  ;;  %v1136_v39 = vmul.f32 %v5557_v37, %v1102_v46  ;;  %7344 = vst [vmem:[#allocation27_spill] sm:$0xff] %v5628_v55  ;;  %v7345_v62 = vld [vmem:[#allocation34_spill] sm:$0xff]  ;;  %v1211_v58 = vadd.f32 %v1203_v51, %v1147_v27  ;;  %v1265_v5 = vmul.f32 %v5628_v55, %v7351_v20  ;;  %v7353_v20 = vld [vmem:[#allocation33_spill] sm:$0xff] }
 0x17e   :  { %v1200_v49 = vmul.f32 %v5604_v16, %v7345_v62  ;;  %7347 = vst [vmem:[#allocation34_spill] sm:$0xff] %v5637_v19  ;;  %7349 = vst [vmem:[#allocation123_spill] sm:$0xff] %v5647_v6  ;;  %v1288_v57 = vrot.slane %v1271_v21, 5  ;;  %v5666_v21 = vld [vmem:[%s7051_s1 + $0x5] sm:$0x1] }
 0x17f   :  { %v1269_v53 = vadd.f32 %v1261_v60, %v1205_v52  ;;  %v1144_v42 = vadd.f32 %v1136_v39, %v1080_v34  ;;  %v5632_v46 = vpop.permute.xlu1 %1459  ;;  %v5642_v52 = vld [vmem:[%s7051_s1 + $0x13] sm:$0x1]  ;;  %v1273_v59 = vadd.f32 %v1265_v5, %v1209_v7 }
 0x180   :  { %v1110_v35 = vpop.permute.xlu0 %1109  ;;  %7348 = vst [vmem:[#allocation9_spill] sm:$0xff] %v5642_v52  ;;  %1983 = vperm.xlu1 %3938, %v5642_v52   ;;  %v7350_v39 = vld [vmem:[#allocation36_spill] sm:$0xff] }
 0x181   :  { %v1284_v34 = vrot.slane %v1269_v53, 7  ;;  %v1208_v22 = vadd.f32 %v1200_v49, %v1144_v42  ;;  %v1138_v60 = vmul.f32 %v5579_v36, %v1110_v35  ;;  %v1202_v30 = vmul.f32 %v5623_v43, %v7350_v39  ;;  %v7352_v49 = vld [vmem:[#allocation43_spill] sm:$0xff]  ;;  %7354 = vst [vmem:[#allocation36_spill] sm:$0xff] %v5666_v21 }
 0x182   :  { %v1267_v35 = vmul.f32 %v5637_v19, %v7352_v49 }
 0x183   :  { %v1285_v62 = vsel %vm169_vm1, %v1284_v34, %v1268_v14  ;;  %v1272_v56 = vadd.f32 %v1264_v12, %v1208_v22  ;;  %v1146_v52 = vadd.f32 %v1138_v60, %v1082_v1  ;;  %v5654_v53 = vpop.permute.xlu1 %1467  ;;  %v1266_v14 = vmul.f32 %v5647_v6, %v7353_v20  ;;  %v7359_v20 = vld [vmem:[#allocation23_spill] sm:$0xff] }
 0x184   :  { %v1287_v42 = vsel %vm172_vm2, %v1286_v45, %v1285_v62  ;;  %3939 = vset.pattern.permute.xlu1 %v7230_v24  ;;  %v1275_v1 = vadd.f32 %v1267_v35, %v1211_v58  ;;  %v1292_v22 = vrot.slane %v1273_v59, 3  ;;  %v5680_v58 = vld [vmem:[%s7053_s3] ss:$0 sm:$0xff]  ;;  %v7357_v59 = vld [vmem:[#allocation45_spill] sm:$0xff] }
 0x185   :  { %v1289_v27 = vsel %vm175_vm3, %v1288_v57, %v1287_v42  ;;  %v1290_v51 = vrot.slane %v1272_v56, 4  ;;  %v1210_v39 = vadd.f32 %v1202_v30, %v1146_v52  ;;  %2554 = vperm.xlu1 %3939, %v5666_v21   ;;  %7355 = vst [vmem:[#allocation41_spill] sm:$0xff] %v5680_v58  ;;  %v7356_v56 = vmov 2  }
 0x186   :  { %v1296_v60 = vrot.slane %v1275_v1, 1  ;;  %v7360_v1 = vld [vmem:[#allocation54_spill] sm:$0xff] }
 0x187   :  { %v1291_v12 = vsel %vm178_vm4, %v1290_v51, %v1289_v27  ;;  %v1274_v7 = vadd.f32 %v1266_v14, %v1210_v39  ;;  %v5670_v34 = vpop.permute.xlu1 %1475  ;;  %v1343_v27 = vmul.f32 %v7357_v59, %v5379_v28  ;;  %v7358_v51 = vld [vmem:[#allocation24_spill] sm:$0xff] }
 0x188   :  { %v1293_v52 = vsel %vm181_vm5, %v1292_v22, %v1291_v12  ;;  %v1383_v39 = vmul.f32 %v7358_v51, %v5382_v17  ;;  %v1382_v12 = vmul.f32 %v7360_v1, %v5346_v25  ;;  %v7367_v51 = vld [vmem:[#allocation76_spill] sm:$0xff]  ;;  %v7370_v1 = vld [vmem:[#allocation19_spill] sm:$0xff] }
 0x189   :  { %v1294_v57 = vrot.slane %v1274_v7, 2  ;;  %3940 = vset.pattern.permute.xlu1 %v7266_v41  ;;  %v7361_v7 = vld [vmem:[#allocation50_spill] sm:$0xff]  ;;  %v7368_v17 = vld [vmem:[#allocation56_spill] sm:$0xff] }
 0x18a   :  { %2594 = vperm.xlu1 %3940, %v5666_v21   ;;  %v1346_v22 = vmul.f32 %v7361_v7, %v5390_v3  ;;  %v1384_v28 = vmul.f32 %v7368_v17, %v7367_v51  ;;  %v7369_v21 = vld [vmem:[#allocation77_spill] sm:$0xff]  ;;  %v7372_v7 = vld [vmem:[#allocation59_spill] sm:$0xff]  ;;  %v7378_v17 = vld [vmem:[#allocation46_spill] sm:$0xff] }
 0x18b   :  { %v1295_v45 = vsel %vm184_vm6, %v1294_v57, %v1293_v52  ;;  %v7362_v57 = vld [vmem:[#allocation25_spill] sm:$0xff]  ;;  %v1345_v25 = vmul.f32 %v7370_v1, %v7369_v21  ;;  %v7379_v1 = vld [vmem:[#allocation74_spill] sm:$0xff]  ;;  %v7380_v21 = vld [vmem:[#allocation48_spill] sm:$0xff] }
 0x18c   :  { %v1297_v30 = vsel %vm187_vm7, %v1296_v60, %v1295_v45  ;;  %v1500_v5 = vpop.permute.xlu1 %1499  ;;  %v1386_v52 = vmul.f32 %v7362_v57, %v5406_v61  ;;  %v7363_v60 = vld [vmem:[#allocation26_spill] sm:$0xff]  ;;  %v7373_v57 = vld [vmem:[#allocation64_spill] sm:$0xff]  ;;  %v7374_v61 = vld [vmem:[#allocation21_spill] sm:$0xff]  ;;  %v1344_v51 = vmul.f32 %v7380_v21, %v7379_v1 }
 0x18d   :  { %v1299_v62 = vmul.f32 %v5328_v26, %v1297_v30  ;;  %v1452_v26 = vpop.permute.xlu0 %1451  ;;  %v1388_v45 = vmul.f32 %v7363_v60, %v5419_v31  ;;  %v7364_v30 = vld [vmem:[#allocation18_spill] sm:$0xff]  ;;  %v7375_v60 = vld [vmem:[#allocation68_spill] sm:$0xff] }
 0x18e   :  { %3941 = vset.pattern.permute.xlu1 %v7356_v56  ;;  %v1347_v56 = vmul.f32 %v7374_v61, %v7373_v57  ;;  %v7376_v31 = vld [vmem:[#allocation22_spill] sm:$0xff]  ;;  %v7383_v61 = vld [vmem:[#allocation49_spill] sm:$0xff] }
 0x18f   :  { %2646 = vperm.xlu1 %3941, %v5490_v44   ;;  %v1306_v42 = vadd.f32 %v5680_v58, %v1299_v62  ;;  %v1342_v62 = vmul.f32 %v7364_v30, %v5342_v47  ;;  %v7371_v44 = vld [vmem:[#allocation80_spill] sm:$0xff]  ;;  %v1391_v58 = vadd.f32 %v1383_v39, %v1343_v27  ;;  %v1349_v19 = vmul.f32 %v7376_v31, %v7375_v60  ;;  %v7377_v30 = vld [vmem:[#allocation81_spill] sm:$0xff]  ;;  %v7382_v39 = vld [vmem:[#allocation63_spill] sm:$0xff] }
 0x190   :  { %v1504_v49 = vpop.permute.xlu1 %1503  ;;  %v1385_v3 = vmul.f32 %v7372_v7, %v7371_v44  ;;  %v1431_v47 = vmul.f32 %v7377_v30, %v5470_v63  ;;  %v7381_v27 = vld [vmem:[#allocation65_spill] sm:$0xff]  ;;  %v1433_v31 = vmul.f32 %v7383_v61, %v5467_v54  ;;  %v1394_v60 = vadd.f32 %v1386_v52, %v1346_v22  ;;  %v7384_v30 = vld [vmem:[#allocation88_spill] sm:$0xff] }
 0x191   :  { %v1307_v35 = vmax.f32 %v1306_v42, 0.0  ;;  %v7365_v42 = vld [vmem:[#allocation82_spill] sm:$0xff]  ;;  %v1390_v7 = vadd.f32 %v1382_v12, %v1342_v62  ;;  %v1387_v44 = vmul.f32 %v7382_v39, %v7381_v27  ;;  %v1432_v57 = vmul.f32 %v7384_v30, %v5445_v11  ;;  %v1464_v6 = vpop.permute.xlu0 %1463  ;;  %v7386_v52 = vld [vmem:[#allocation53_spill] sm:$0xff]  ;;  %v7387_v30 = vld [vmem:[#allocation95_spill] sm:$0xff] }
 0x192   :  { %v1479_v63 = vmul.f32 %v1452_v26, %v5520_v32  ;;  %v1392_v12 = vadd.f32 %v1384_v28, %v1344_v51  ;;  %v1393_v62 = vadd.f32 %v1385_v3, %v1345_v25  ;;  %v1439_v1 = vadd.f32 %v1431_v47, %v1391_v58  ;;  %v7388_v27 = vld [vmem:[#allocation99_spill] sm:$0xff]  ;;  %v5744_v47 = vld [vmem:[%s7051_s1 + $0x1b] sm:$0x1] }
 0x193   :  { %3942 = vset.pattern.permute.xlu1 %v7230_v24  ;;  %1309 = vst.msk [vmem:[#allocation2] sm:$0xff] %vm1308_vm9, %v1307_v35  ;;  %v7366_v35 = vld [vmem:[#allocation52_spill] sm:$0xff]  ;;  %v1480_v39 = vmul.f32 %v5607_v10, %v5513_v29  ;;  %v1527_v22 = vmul.f32 %v1500_v5, %v5566_v23  ;;  %v1437_v61 = vmul.f32 %v7386_v52, %v5500_v33  ;;  %v7390_v5 = vld [vmem:[#allocation67_spill] sm:$0xff] }
 0x194   :  { %1935 = vperm.xlu1 %3942, %v7359_v20   ;;  %v1512_v14 = vpop.permute.xlu1 %1511  ;;  %v1348_v59 = vmul.f32 %v7366_v35, %v7365_v42  ;;  %v1430_v42 = vmul.f32 %v7378_v17, %v5401_v15  ;;  %v7385_v17 = vld [vmem:[#allocation51_spill] sm:$0xff]  ;;  %v1395_v26 = vadd.f32 %v1387_v44, %v1347_v56  ;;  %v1434_v54 = vmul.f32 %v7388_v27, %v7387_v30  ;;  %v7389_v44 = vld [vmem:[#allocation69_spill] sm:$0xff] }
 0x195   :  { %v1435_v15 = vmul.f32 %v7385_v17, %v5458_v9  ;;  %v1440_v28 = vadd.f32 %v1432_v57, %v1392_v12  ;;  %v1481_v3 = vmul.f32 %v5632_v46, %v5533_v0  ;;  %v1487_v10 = vadd.f32 %v1479_v63, %v1439_v1  ;;  %v1472_v27 = vpop.permute.xlu0 %1471  ;;  %v7392_v57 = vld [vmem:[#allocation28_spill] sm:$0xff]  ;;  %v7393_v63 = vld [vmem:[#allocation106_spill] sm:$0xff] }
 0x196   :  { %v1396_v21 = vadd.f32 %v1388_v45, %v1348_v59  ;;  %v1438_v17 = vadd.f32 %v1430_v42, %v1390_v7  ;;  %v1389_v58 = vmul.f32 %v7390_v5, %v7389_v44  ;;  %v1441_v56 = vadd.f32 %v1433_v31, %v1393_v62  ;;  %v7391_v42 = vld [vmem:[#allocation35_spill] sm:$0xff]  ;;  %v7394_v1 = vld [vmem:[#allocation94_spill] sm:$0xff]  ;;  %v7397_v44 = vld [vmem:[#allocation101_spill] sm:$0xff] }
 0x197   :  { %v1482_v45 = vmul.f32 %v1464_v6, %v5557_v37  ;;  %v1575_v59 = vmul.f32 %v7391_v42, %v5591_v2  ;;  %v1488_v7 = vadd.f32 %v1480_v39, %v1440_v28  ;;  %v1535_v52 = vadd.f32 %v1527_v22, %v1487_v10 }
 0x198   :  { %3943 = vset.pattern.permute.xlu1 %v7266_v41  ;;  %v1520_v35 = vpop.permute.xlu1 %1519  ;;  %v1526_v12 = vmul.f32 %v7392_v57, %v5485_v50  ;;  %v1442_v46 = vadd.f32 %v1434_v54, %v1394_v60  ;;  %v1483_v5 = vmul.f32 %v5654_v53, %v7394_v1  ;;  %v1530_v31 = vmul.f32 %v1512_v14, %v5604_v16  ;;  %v5768_v54 = vld [vmem:[%s7051_s1 + $0x25] sm:$0x1] }
 0x199   :  { %1975 = vperm.xlu1 %3943, %v7359_v20   ;;  %v1478_v20 = vmul.f32 %v5574_v4, %v5435_v18  ;;  %v1528_v4 = vmul.f32 %v1504_v49, %v5530_v48  ;;  %v1436_v49 = vmul.f32 %v7393_v63, %v5508_v38  ;;  %v1489_v62 = vadd.f32 %v1481_v3, %v1441_v56  ;;  %v7396_v56 = vld [vmem:[#allocation29_spill] sm:$0xff]  ;;  %v5970_v38 = vpop.permute.xlu0 %1767 }
 0x19a   :  { %v1397_v60 = vadd.f32 %v1389_v58, %v1349_v19  ;;  %v1443_v53 = vadd.f32 %v1435_v15, %v1395_v26  ;;  %v1484_v14 = vmul.f32 %v1472_v27, %v5579_v36  ;;  %v1583_v28 = vadd.f32 %v1575_v59, %v1535_v52  ;;  %v7398_v26 = vld [vmem:[#allocation119_spill] sm:$0xff]  ;;  %v7399_v59 = vld [vmem:[#allocation37_spill] sm:$0xff]  ;;  %7436 = vst [vmem:[#allocation19_spill] sm:$0xff] %v5970_v38 }
 0x19b   :  { %v1486_v51 = vadd.f32 %v1478_v20, %v1438_v17  ;;  %v1536_v20 = vadd.f32 %v1528_v4, %v1488_v7  ;;  %v1490_v17 = vadd.f32 %v1482_v45, %v1442_v46  ;;  %v7395_v4 = vld [vmem:[#allocation111_spill] sm:$0xff]  ;;  %v1444_v42 = vadd.f32 %v1436_v49, %v1396_v21  ;;  %v7400_v21 = vld [vmem:[#allocation117_spill] sm:$0xff] }
 0x19c   :  { %v1491_v7 = vadd.f32 %v1483_v5, %v1443_v53  ;;  %v1532_v63 = vmul.f32 %v1520_v35, %v5623_v43  ;;  %v1485_v1 = vmul.f32 %v5670_v34, %v7397_v44  ;;  %v7401_v52 = vld [vmem:[#allocation31_spill] sm:$0xff]  ;;  %v1598_v46 = vrot.slane %v1583_v28, 7  ;;  %v7405_v28 = vld [vmem:[#allocation20_spill] sm:$0xff] }
 0x19d   :  { %1987 = vperm.xlu1 %3943, %v5744_v47   ;;  %v1544_v25 = vpop.permute.xlu1 %1543  ;;  %v1534_v10 = vadd.f32 %v1526_v12, %v1486_v51  ;;  %v1538_v57 = vadd.f32 %v1530_v31, %v1490_v17  ;;  %v1492_v45 = vadd.f32 %v1484_v14, %v1444_v42  ;;  %v1578_v51 = vmul.f32 %v7399_v59, %v5612_v8  ;;  %v7402_v17 = vld [vmem:[#allocation123_spill] sm:$0xff]  ;;  %v7403_v14 = vld [vmem:[#allocation38_spill] sm:$0xff]  ;;  %v7407_v42 = vld [vmem:[#allocation32_spill] sm:$0xff] }
 0x19e   :  { %v1574_v39 = vmul.f32 %v1544_v25, %v5552_v13  ;;  %v1529_v25 = vmul.f32 %v7396_v56, %v7395_v4  ;;  %v1531_v35 = vmul.f32 %v7401_v52, %v7400_v21  ;;  %v1445_v12 = vadd.f32 %v1437_v61, %v1397_v60  ;;  %v5801_v52 = vld [vmem:[%s7051_s1 + $0x23] sm:$0x1] }
 0x19f   :  { %v1586_v34 = vadd.f32 %v1578_v51, %v1538_v57  ;;  %v1540_v5 = vadd.f32 %v1532_v63, %v1492_v45  ;;  %v7404_v56 = vmov 3   ;;  %v7432_v36 = vmov 5  }
 0x1a0   :  { %v1582_v19 = vadd.f32 %v1574_v39, %v1534_v10  ;;  %v1537_v15 = vadd.f32 %v1529_v25, %v1489_v62  ;;  %v1539_v62 = vadd.f32 %v1531_v35, %v1491_v7  ;;  %v1580_v10 = vmul.f32 %v7403_v14, %v7402_v17  ;;  %v7406_v25 = vld [vmem:[#allocation120_spill] sm:$0xff] }
 0x1a1   :  { %3944 = vset.pattern.permute.xlu1 %v7230_v24  ;;  %v1552_v6 = vpop.permute.xlu1 %1551  ;;  %v1604_v7 = vrot.slane %v1586_v34, 4  ;;  %v7409_v34 = vld [vmem:[#allocation58_spill] sm:$0xff] }
 0x1a2   :  { %v1576_v22 = vmul.f32 %v1552_v6, %v5584_v40  ;;  %2570 = vperm.xlu1 %3944, %v5768_v54   ;;  %v1599_v39 = vsel %vm169_vm1, %v1598_v46, %v1582_v19  ;;  %v1588_v57 = vadd.f32 %v1580_v10, %v1540_v5  ;;  %v5820_v10 = vld [vmem:[%s7051_s1 + $0x2d] sm:$0x1] }
 0x1a4   :  { %v1584_v3 = vadd.f32 %v1576_v22, %v1536_v20  ;;  %v1493_v20 = vadd.f32 %v1485_v1, %v1445_v12  ;;  %v1533_v1 = vmul.f32 %v7407_v42, %v7406_v25 }
 0x1a5   :  { %v1556_v6 = vpop.permute.xlu1 %1555 }
 0x1a6   :  { %v1577_v58 = vmul.f32 %v1556_v6, %v7398_v26  ;;  %3945 = vset.pattern.permute.xlu1 %v7266_v41  ;;  %v1600_v27 = vrot.slane %v1584_v3, 6  ;;  %v1541_v19 = vadd.f32 %v1533_v1, %v1493_v20  ;;  %v5844_v1 = vld [vmem:[%s7051_s1 + $0x33] sm:$0x1] }
 0x1a7   :  { %2610 = vperm.xlu1 %3945, %v5768_v54  }
 0x1a8   :  { %v1585_v49 = vadd.f32 %v1577_v58, %v1537_v15  ;;  %v1601_v3 = vsel %vm172_vm2, %v1600_v27, %v1599_v39  ;;  %v7408_v15 = vld [vmem:[#allocation34_spill] sm:$0xff]  ;;  %v1608_v27 = vrot.slane %v1588_v57, 2  ;;  %v7412_v39 = vld [vmem:[#allocation41_spill] sm:$0xff] }
 0x1a9   :  { %v1564_v31 = vpop.permute.xlu1 %1563 }
 0x1aa   :  { %v1602_v22 = vrot.slane %v1585_v49, 5  ;;  %v1579_v53 = vmul.f32 %v1564_v31, %v5628_v55  ;;  %v7410_v31 = vmov 2   ;;  %v7430_v55 = vld [vmem:[#allocation47_spill] sm:$0xff] }
 0x1ab   :  { %3946 = vset.pattern.permute.xlu1 %v7404_v56 }
 0x1ac   :  { %v1603_v61 = vsel %vm175_vm3, %v1602_v22, %v1601_v3  ;;  %v1587_v60 = vadd.f32 %v1579_v53, %v1539_v62  ;;  %1763 = vperm.xlu1 %3946, %v7405_v28   ;;  %v7411_v62 = vld [vmem:[#allocation9_spill] sm:$0xff] }
 0x1ad   :  { %v1572_v63 = vpop.permute.xlu1 %1571  ;;  %v1605_v45 = vsel %vm178_vm4, %v1604_v7, %v1603_v61  ;;  %v5830_v61 = vld [vmem:[%s7051_s1 + $0x2b] sm:$0x1]  ;;  %v7416_v7 = vld [vmem:[#allocation98_spill] sm:$0xff] }
 0x1ae   :  { %v1606_v6 = vrot.slane %v1587_v60, 3  ;;  %v1581_v58 = vmul.f32 %v1572_v63, %v7408_v15  ;;  %v5836_v60 = vld [vmem:[%s7051_s1 + $0x1d] sm:$0x1]  ;;  %v7429_v15 = vld [vmem:[#allocation42_spill] sm:$0xff] }
 0x1af   :  { %v5854_v63 = vld [vmem:[%s7051_s1 + $0x3d] sm:$0x1] }
 0x1b0   :  { %v1607_v59 = vsel %vm181_vm5, %v1606_v6, %v1605_v45  ;;  %v1589_v51 = vadd.f32 %v1581_v58, %v1541_v19  ;;  %3947 = vset.pattern.permute.xlu1 %v7266_v41  ;;  %v7417_v19 = vmov 4   ;;  %v7418_v45 = vld [vmem:[#allocation30_spill] sm:$0xff] }
 0x1b1   :  { %1991 = vperm.xlu1 %3947, %v5801_v52   ;;  %v1609_v46 = vsel %vm184_vm6, %v1608_v27, %v1607_v59 }
 0x1b2   :  { %v1610_v35 = vrot.slane %v1589_v51, 1  ;;  %v5804_v12 = vpop.permute.xlu1 %1623  ;;  %v7420_v51 = vld [vmem:[#allocation110_spill] sm:$0xff] }
 0x1b4   :  { %v1611_v49 = vsel %vm187_vm7, %v1610_v35, %v1609_v46  ;;  %v7423_v46 = vld [vmem:[#allocation39_spill] sm:$0xff] }
 0x1b5   :  { %v1613_v5 = vmul.f32 %v7409_v34, %v1611_v49  ;;  %3948 = vset.pattern.permute.xlu1 %v7410_v31  ;;  %v5885_v49 = vld [vmem:[%s7051_s1 + $0x35] sm:$0x1] }
 0x1b6   :  { %2031 = vperm.xlu1 %3948, %v7411_v62   ;;  %v5811_v20 = vpop.permute.xlu1 %1631 }
 0x1b7   :  { %v1614_v22 = vadd.f32 %v7412_v39, %v1613_v5  ;;  %v7426_v39 = vld [vmem:[#allocation36_spill] sm:$0xff] }
 0x1b9   :  { %v1615_v53 = vmax.f32 %v1614_v22, 0.0 }
 0x1ba   :  { %3949 = vset.pattern.permute.xlu1 %v7266_v41  ;;  %v5815_v14 = vpop.permute.xlu1 %1635 }
 0x1bb   :  { %7413 = vst [vmem:[#allocation43_spill] sm:$0xff] %v5815_v14  ;;  %2614 = vperm.xlu1 %3949, %v5820_v10   ;;  %1617 = vrot.lane.b32.xlu0 %v1615_v53, %s4169_s2  ;;  %v7428_v53 = vld [vmem:[#allocation44_spill] sm:$0xff] }
 0x1be   :  { %v5824_v3 = vpop.permute.xlu1 %1643 }
 0x1bf   :  { %7414 = vst [vmem:[#allocation33_spill] sm:$0xff] %v5824_v3  ;;  %3950 = vset.pattern.permute.xlu1 %v7410_v31  ;;  %2091 = vperm.xlu0 %3969, %v5830_v61  }
 0x1c0   :  { %2654 = vperm.xlu1 %3950, %v5836_v60  }
 0x1c2   :  { %v5839_v42 = vpop.permute.xlu1 %1651 }
 0x1c3   :  { %7415 = vst [vmem:[#allocation45_spill] sm:$0xff] %v5839_v42  ;;  %2095 = vperm.xlu0 %3969, %v5844_v1  }
 0x1c4   :  { %3951 = vset.pattern.permute.xlu1 %v7404_v56 }
 0x1c5   :  { %2694 = vperm.xlu1 %3951, %v7416_v7  }
 0x1c7   :  { %v5849_v57 = vpop.permute.xlu1 %1667  ;;  %2718 = vperm.xlu0 %3969, %v5854_v63  }
 0x1c9   :  { %3952 = vset.pattern.permute.xlu1 %v7230_v24 }
 0x1ca   :  { %1955 = vperm.xlu1 %3952, %v5830_v61  }
 0x1cb   :  { %v5859_v6 = vpop.permute.xlu1 %1671  ;;  %3989 = vset.pattern.permute.xlu0 %v7417_v19 }
 0x1cc   :  { %1811 = vperm.xlu0 %3989, %v7405_v28   ;;  %v7422_v28 = vld [vmem:[#allocation114_spill] sm:$0xff] }
 0x1ce   :  { %3953 = vset.pattern.permute.xlu1 %v7266_v41 }
 0x1cf   :  { %1995 = vperm.xlu1 %3953, %v5830_v61   ;;  %v5865_v58 = vpop.permute.xlu1 %1679 }
 0x1d0   :  { %1815 = vperm.xlu0 %3989, %v7418_v45  }
 0x1d3   :  { %3954 = vset.pattern.permute.xlu1 %v7410_v31  ;;  %v5869_v59 = vpop.permute.xlu1 %1687 }
 0x1d4   :  { %7419 = vst [vmem:[#allocation24_spill] sm:$0xff] %v5869_v59  ;;  %2035 = vperm.xlu1 %3954, %v5744_v47   ;;  %2123 = vperm.xlu0 %3989, %v7420_v51  }
 0x1d8   :  { %3955 = vset.pattern.permute.xlu1 %v7404_v56  ;;  %v5874_v27 = vpop.permute.xlu1 %1711  ;;  %2746 = vperm.xlu0 %3989, %v7422_v28  }
 0x1d9   :  { %7421 = vst [vmem:[#allocation23_spill] sm:$0xff] %v5874_v27  ;;  %2075 = vperm.xlu1 %3955, %v7420_v51  }
 0x1dc   :  { %v5878_v35 = vpop.permute.xlu1 %1719  ;;  %1807 = vperm.xlu0 %3989, %v7423_v46  }
 0x1dd   :  { %3956 = vset.pattern.permute.xlu1 %v7266_v41 }
 0x1de   :  { %2618 = vperm.xlu1 %3956, %v5885_v49  }
 0x1e0   :  { %v5888_v34 = vpop.permute.xlu1 %1723  ;;  %2127 = vperm.xlu0 %3989, %v7411_v62  }
 0x1e1   :  { %7424 = vst [vmem:[#allocation54_spill] sm:$0xff] %v5888_v34 }
 0x1e2   :  { %3957 = vset.pattern.permute.xlu1 %v7410_v31 }
 0x1e3   :  { %2658 = vperm.xlu1 %3957, %v5768_v54  }
 0x1e4   :  { %v5893_v5 = vpop.permute.xlu1 %1731  ;;  %2738 = vperm.xlu0 %3989, %v7426_v39  }
 0x1e5   :  { %7425 = vst [vmem:[#allocation50_spill] sm:$0xff] %v5893_v5 }
 0x1e7   :  { %3958 = vset.pattern.permute.xlu1 %v7404_v56 }
 0x1e8   :  { %1759 = vperm.xlu1 %3958, %v7423_v46   ;;  %v5898_v22 = vpop.permute.xlu1 %1739  ;;  %1827 = vperm.xlu0 %3989, %v7428_v53  }
 0x1e9   :  { %7427 = vst [vmem:[#allocation25_spill] sm:$0xff] %v5898_v22  ;;  %v5929_v22 = vld [vmem:[%s7051_s1 + $0xa] sm:$0x1] }
 0x1ec   :  { %1771 = vperm.xlu1 %3958, %v7429_v15   ;;  %2139 = vperm.xlu0 %3989, %v5830_v61  }
 0x1ed   :  { %v5903_v25 = vpop.permute.xlu1 %2598 }
 0x1f0   :  { %3959 = vset.pattern.permute.xlu1 %v7230_v24  ;;  %2762 = vperm.xlu0 %3989, %v5885_v49  }
 0x1f1   :  { %1959 = vperm.xlu1 %3959, %v5844_v1  }
 0x1f2   :  { %v5908_v44 = vpop.permute.xlu1 %1939 }
 0x1f4   :  { %1835 = vperm.xlu0 %3989, %v7430_v55  }
 0x1f5   :  { %3960 = vset.pattern.permute.xlu1 %v7266_v41 }
 0x1f6   :  { %1999 = vperm.xlu1 %3960, %v5844_v1   ;;  %v5913_v17 = vpop.permute.xlu1 %2562 }
 0x1f8   :  { %2143 = vperm.xlu0 %3989, %v5844_v1  }
 0x1fa   :  { %3961 = vset.pattern.permute.xlu1 %v7404_v56 }
 0x1fb   :  { %2079 = vperm.xlu1 %3961, %v7411_v62   ;;  %v5918_v43 = vpop.permute.xlu1 %2602 }
 0x1fc   :  { %2766 = vperm.xlu0 %3989, %v5854_v63  }
 0x1ff   :  { %3962 = vset.pattern.permute.xlu1 %v7230_v24  ;;  %v5922_v21 = vpop.permute.xlu1 %1983 }
 0x200   :  { %7431 = vst [vmem:[#allocation26_spill] sm:$0xff] %v5922_v21  ;;  %2582 = vperm.xlu1 %3962, %v5854_v63   ;;  %3995 = vset.pattern.permute.xlu0 %v7432_v36 }
 0x201   :  { %1859 = vperm.xlu0 %3995, %v5929_v22  }
 0x204   :  { %3963 = vset.pattern.permute.xlu1 %v7410_v31  ;;  %v5933_v33 = vpop.permute.xlu1 %2554 }
 0x205   :  { %2662 = vperm.xlu1 %3963, %v5820_v10   ;;  %2790 = vperm.xlu0 %3995, %v7416_v7  }
 0x209   :  { %3964 = vset.pattern.permute.xlu1 %v7404_v56  ;;  %v5938_v5 = vpop.permute.xlu1 %2594  ;;  %1863 = vperm.xlu0 %3995, %v7418_v45   ;;  %v5954_v45 = vld [vmem:[%s7051_s1 + $0x22] sm:$0x1] }
 0x20a   :  { %2690 = vperm.xlu1 %3964, %v7426_v39  }
 0x20d   :  { %2171 = vperm.xlu0 %3995, %v7420_v51  }
 0x20e   :  { %3965 = vset.pattern.permute.xlu1 %v7417_v19  ;;  %v5944_v59 = vpop.permute.xlu1 %2646 }
 0x20f   :  { %2742 = vperm.xlu1 %3965, %v7416_v7  }
 0x211   :  { %2794 = vperm.xlu0 %3995, %v7422_v28   ;;  %v5964_v28 = vld [vmem:[%s7051_s1 + $0x3b] sm:$0x1] }
 0x213   :  { %3966 = vset.pattern.permute.xlu1 %v7404_v56  ;;  %v5949_v42 = vpop.permute.xlu1 %1935 }
 0x214   :  { %7433 = vst [vmem:[#allocation18_spill] sm:$0xff] %v5949_v42  ;;  %1775 = vperm.xlu1 %3966, %v5954_v45  }
 0x215   :  { %2786 = vperm.xlu0 %3995, %v7426_v39   ;;  %v5976_v39 = vld [vmem:[%s7051_s1 + $0x32] sm:$0x1] }
 0x218   :  { %3967 = vset.pattern.permute.xlu1 %v7230_v24  ;;  %v5959_v3 = vpop.permute.xlu1 %1975 }
 0x219   :  { %7434 = vst [vmem:[#allocation52_spill] sm:$0xff] %v5959_v3  ;;  %1963 = vperm.xlu1 %3967, %v5964_v28   ;;  %1871 = vperm.xlu0 %3995, %v5954_v45   ;;  %v5989_v3 = vld [vmem:[%s7051_s1 + $0x3] sm:$0x1] }
 0x21c   :  { %v5968_v9 = vpop.permute.xlu1 %1987 }
 0x21d   :  { %7435 = vst [vmem:[#allocation56_spill] sm:$0xff] %v5968_v9  ;;  %3968 = vset.pattern.permute.xlu1 %v7266_v41  ;;  %1879 = vperm.xlu0 %3995, %v5976_v39   ;;  %v5984_v9 = vpop.permute.xlu0 %2698 }
 0x21e   :  { %2003 = vperm.xlu1 %3968, %v5964_v28  }
 0x221   :  { %v5980_v42 = vpop.permute.xlu1 %2570  ;;  %2810 = vperm.xlu0 %3995, %v5885_v49  }
 0x222   :  { %7437 = vst [vmem:[#allocation59_spill] sm:$0xff] %v5980_v42  ;;  %3970 = vset.pattern.permute.xlu1 %v7404_v56  ;;  %v5996_v42 = vpop.permute.xlu0 %2702 }
 0x223   :  { %2071 = vperm.xlu1 %3970, %v5989_v3   ;;  %7439 = vst [vmem:[#allocation22_spill] sm:$0xff] %v5996_v42 }
 0x225   :  { %2191 = vperm.xlu0 %3995, %v5844_v1  }
 0x226   :  { %v5993_v21 = vpop.permute.xlu1 %2610 }
 0x227   :  { %7438 = vst [vmem:[#allocation21_spill] sm:$0xff] %v5993_v21  ;;  %2083 = vperm.xlu1 %3970, %v5744_v47  }
 0x229   :  { %2195 = vperm.xlu0 %3995, %v5964_v28  }
 0x22b   :  { %3971 = vset.pattern.permute.xlu1 %v7410_v31  ;;  %v6000_v26 = vpop.permute.xlu1 %1763 }
 0x22c   :  { %2666 = vperm.xlu1 %3971, %v5885_v49  }
 0x22d   :  { %3998 = vset.pattern.permute.xlu0 %v7266_v41  ;;  %v1618_v8 = vpop.permute.xlu0 %1617 }
 0x22e   :  { %1621 = vst.msk [vmem:[#allocation2] sm:$0xff] %vm1620_vm10, %v1618_v8  ;;  %1663 = vperm.xlu0 %3998, %v7423_v46  }
 0x230   :  { %3972 = vset.pattern.permute.xlu1 %v7404_v56  ;;  %v6007_v21 = vpop.permute.xlu1 %1991 }
 0x231   :  { %7440 = vst [vmem:[#allocation81_spill] sm:$0xff] %v6007_v21  ;;  %2706 = vperm.xlu1 %3972, %v5768_v54  }
 0x232   :  { %1675 = vperm.xlu0 %3998, %v7429_v15  }
 0x235   :  { %1779 = vperm.xlu1 %3972, %v7428_v53   ;;  %v6012_v42 = vpop.permute.xlu1 %2031 }
 0x236   :  { %7441 = vst [vmem:[#allocation46_spill] sm:$0xff] %v6012_v42  ;;  %1683 = vperm.xlu0 %3998, %v7428_v53   ;;  %v6076_v42 = vld [vmem:[%s7051_s1 + $0x34] sm:$0x1] }
 0x237   :  { %7453 = vst [vmem:[#allocation29_spill] sm:$0xff] %v6076_v42 }
 0x239   :  { %3973 = vset.pattern.permute.xlu1 %v7417_v19 }
 0x23a   :  { %1819 = vperm.xlu1 %3973, %v7429_v15   ;;  %v6017_v8 = vpop.permute.xlu1 %2614  ;;  %1691 = vperm.xlu0 %3998, %v7430_v55  }
 0x23b   :  { %7442 = vst [vmem:[#allocation48_spill] sm:$0xff] %v6017_v8  ;;  %v6065_v8 = vld [vmem:[%s7051_s1 + $0x24] sm:$0x1] }
 0x23e   :  { %3974 = vset.pattern.permute.xlu1 %v7410_v31  ;;  %1979 = vperm.xlu0 %3998, %v7420_v51   ;;  %v6022_v46 = vpop.permute.xlu0 %2091  ;;  %v6044_v51 = vld [vmem:[%s7051_s1 + $0xc] sm:$0x1] }
 0x23f   :  { %7443 = vst [vmem:[#allocation63_spill] sm:$0xff] %v6022_v46  ;;  %2047 = vperm.xlu1 %3974, %v5844_v1   ;;  %v6025_v21 = vpop.permute.xlu1 %2654 }
 0x240   :  { %7444 = vst [vmem:[#allocation49_spill] sm:$0xff] %v6025_v21  ;;  %v6056_v21 = vld [vmem:[%s7051_s1 + $0x1c] sm:$0x1] }
 0x241   :  { %7450 = vst [vmem:[#allocation35_spill] sm:$0xff] %v6056_v21 }
 0x242   :  { %2606 = vperm.xlu0 %3998, %v5836_v60   ;;  %v6028_v53 = vpop.permute.xlu0 %2095 }
 0x243   :  { %7445 = vst [vmem:[#allocation88_spill] sm:$0xff] %v6028_v53  ;;  %3975 = vset.pattern.permute.xlu1 %v7404_v56 }
 0x244   :  { %2087 = vperm.xlu1 %3975, %v5801_v52   ;;  %v6032_v15 = vpop.permute.xlu1 %2694 }
 0x246   :  { %2622 = vperm.xlu0 %3998, %v5854_v63   ;;  %v6035_v55 = vpop.permute.xlu0 %2718 }
 0x247   :  { %7446 = vst [vmem:[#allocation51_spill] sm:$0xff] %v6035_v55 }
 0x248   :  { %3976 = vset.pattern.permute.xlu1 %v7410_v31 }
 0x249   :  { %2670 = vperm.xlu1 %3976, %v5854_v63   ;;  %v6039_v1 = vpop.permute.xlu1 %1955 }
 0x24a   :  { %7447 = vst [vmem:[#allocation53_spill] sm:$0xff] %v6039_v1  ;;  %2291 = vperm.xlu0 %3998, %v6044_v51  }
 0x24b   :  { %v6047_v53 = vpop.permute.xlu0 %1811 }
 0x24c   :  { %7448 = vst [vmem:[#allocation99_spill] sm:$0xff] %v6047_v53 }
 0x24d   :  { %3977 = vset.pattern.permute.xlu1 %v7404_v56 }
 0x24e   :  { %2710 = vperm.xlu1 %3977, %v5820_v10   ;;  %v6051_v55 = vpop.permute.xlu1 %1995  ;;  %2299 = vperm.xlu0 %3998, %v6056_v21  }
 0x24f   :  { %7449 = vst [vmem:[#allocation67_spill] sm:$0xff] %v6051_v55  ;;  %v6059_v46 = vpop.permute.xlu0 %1815 }
 0x250   :  { %7451 = vst [vmem:[#allocation28_spill] sm:$0xff] %v6059_v46 }
 0x252   :  { %3978 = vset.pattern.permute.xlu1 %v7417_v19  ;;  %2303 = vperm.xlu0 %3998, %v6065_v8  }
 0x253   :  { %2750 = vperm.xlu1 %3978, %v5836_v60   ;;  %v6069_v1 = vpop.permute.xlu1 %2035  ;;  %v6071_v55 = vpop.permute.xlu0 %2123 }
 0x254   :  { %7452 = vst [vmem:[#allocation106_spill] sm:$0xff] %v6069_v1 }
 0x256   :  { %2311 = vperm.xlu0 %3998, %v6076_v42  }
 0x257   :  { %3979 = vset.pattern.permute.xlu1 %v7404_v56  ;;  %v6080_v4 = vpop.permute.xlu0 %2746 }
 0x258   :  { %1783 = vperm.xlu1 %3979, %v5976_v39   ;;  %v6083_v0 = vpop.permute.xlu1 %2075 }
 0x25a   :  { %4010 = vset.pattern.permute.xlu0 %v7230_v24 }
 0x25b   :  { %1627 = vperm.xlu0 %4010, %v5929_v22   ;;  %v6087_v1 = vpop.permute.xlu0 %1807 }
 0x25c   :  { %7454 = vst [vmem:[#allocation37_spill] sm:$0xff] %v6087_v1  ;;  %3980 = vset.pattern.permute.xlu1 %v7417_v19 }
 0x25d   :  { %1823 = vperm.xlu1 %3980, %v5954_v45   ;;  %v6091_v16 = vpop.permute.xlu1 %2618 }
 0x25e   :  { %7455 = vst [vmem:[#allocation31_spill] sm:$0xff] %v6091_v16 }
 0x25f   :  { %1639 = vperm.xlu0 %4010, %v5954_v45   ;;  %v6094_v34 = vpop.permute.xlu0 %2127 }
 0x260   :  { %7456 = vst [vmem:[#allocation38_spill] sm:$0xff] %v6094_v34 }
 0x261   :  { %3981 = vset.pattern.permute.xlu1 %v7410_v31 }
 0x262   :  { %2051 = vperm.xlu1 %3981, %v5964_v28   ;;  %v6098_v37 = vpop.permute.xlu1 %2658 }
 0x263   :  { %7457 = vst [vmem:[#allocation20_spill] sm:$0xff] %v6098_v37  ;;  %1647 = vperm.xlu0 %4010, %v5976_v39   ;;  %v6101_v22 = vpop.permute.xlu0 %2738 }
 0x266   :  { %3982 = vset.pattern.permute.xlu1 %v7417_v19 }
 0x267   :  { %2119 = vperm.xlu1 %3982, %v5989_v3   ;;  %v6105_v1 = vpop.permute.xlu1 %1759  ;;  %2558 = vperm.xlu0 %4010, %v7416_v7   ;;  %v6108_v45 = vpop.permute.xlu0 %1827 }
 0x268   :  { %7458 = vst [vmem:[#allocation32_spill] sm:$0xff] %v6105_v1  ;;  %7459 = vst [vmem:[#allocation58_spill] sm:$0xff] %v6108_v45 }
 0x26b   :  { %2131 = vperm.xlu1 %3982, %v5744_v47   ;;  %v6111_v16 = vpop.permute.xlu1 %1771  ;;  %1943 = vperm.xlu0 %4010, %v7411_v62   ;;  %v6114_v34 = vpop.permute.xlu0 %2139 }
 0x26c   :  { %7460 = vst [vmem:[#allocation9_spill] sm:$0xff] %v6111_v16  ;;  %7461 = vst [vmem:[#allocation41_spill] sm:$0xff] %v6114_v34 }
 0x26f   :  { %3983 = vset.pattern.permute.xlu1 %v7404_v56  ;;  %2566 = vperm.xlu0 %4010, %v5836_v60   ;;  %v6118_v37 = vpop.permute.xlu0 %2762 }
 0x270   :  { %7462 = vst [vmem:[#allocation98_spill] sm:$0xff] %v6118_v37  ;;  %2714 = vperm.xlu1 %3983, %v5885_v49   ;;  %v6121_v1 = vpop.permute.xlu1 %1959 }
 0x271   :  { %7463 = vst [vmem:[#allocation30_spill] sm:$0xff] %v6121_v1  ;;  %v6137_v1 = vld [vmem:[%s7051_s1 + $0x3a] sm:$0x1] }
 0x273   :  { %1947 = vperm.xlu0 %4010, %v5744_v47   ;;  %v6124_v7 = vpop.permute.xlu0 %1835 }
 0x274   :  { %7464 = vst [vmem:[#allocation110_spill] sm:$0xff] %v6124_v7  ;;  %3984 = vset.pattern.permute.xlu1 %v7417_v19 }
 0x275   :  { %2754 = vperm.xlu1 %3984, %v5768_v54   ;;  %v6128_v45 = vpop.permute.xlu1 %1999 }
 0x276   :  { %7465 = vst [vmem:[#allocation114_spill] sm:$0xff] %v6128_v45 }
 0x277   :  { %1951 = vperm.xlu0 %4010, %v5801_v52   ;;  %v6131_v34 = vpop.permute.xlu0 %2143 }
 0x278   :  { %7466 = vst [vmem:[#allocation39_spill] sm:$0xff] %v6131_v34  ;;  %v4092_v34 = vld [vmem:[%s7051_s1 + $0x2] sm:$0x1] }
 0x279   :  { %3985 = vset.pattern.permute.xlu1 %v7404_v56 }
 0x27a   :  { %1787 = vperm.xlu1 %3985, %v6137_v1   ;;  %v6140_v7 = vpop.permute.xlu1 %2079 }
 0x27b   :  { %7467 = vst [vmem:[#allocation36_spill] sm:$0xff] %v6140_v7  ;;  %2574 = vperm.xlu0 %4010, %v5820_v10   ;;  %v6143_v37 = vpop.permute.xlu0 %2766  ;;  %v4093_v7 = vld [vmem:[%s7051_s1 + $0x1a] sm:$0x1] }
 0x27c   :  { %7468 = vst [vmem:[#allocation44_spill] sm:$0xff] %v6143_v37  ;;  %v6160_v37 = vld [vmem:[%s7051_s1 + $0x4] sm:$0x1] }
 0x27e   :  { %3986 = vset.pattern.permute.xlu1 %v7432_v36 }
 0x27f   :  { %1855 = vperm.xlu1 %3986, %v4092_v34   ;;  %v6149_v45 = vpop.permute.xlu1 %2582  ;;  %2578 = vperm.xlu0 %4010, %v5885_v49   ;;  %v6171_v49 = vld [vmem:[%s7051_s1 + $0x2c] sm:$0x1] }
 0x280   :  { %7469 = vst [vmem:[#allocation42_spill] sm:$0xff] %v6149_v45  ;;  %v6152_v16 = vpop.permute.xlu0 %1859  ;;  %7472 = vst [vmem:[#allocation125_spill] sm:$0xff] %v6171_v49 }
 0x281   :  { %7470 = vst [vmem:[#allocation47_spill] sm:$0xff] %v6152_v16 }
 0x283   :  { %1867 = vperm.xlu1 %3986, %v4093_v7   ;;  %2247 = vperm.xlu0 %4010, %v6160_v37  }
 0x284   :  { %v6163_v46 = vpop.permute.xlu1 %2662  ;;  %v6165_v34 = vpop.permute.xlu0 %2790 }
 0x285   :  { %7471 = vst [vmem:[#allocation124_spill] sm:$0xff] %v6163_v46  ;;  %v6182_v46 = vld [vmem:[%s7051_s1 + $0x3c] sm:$0x1] }
 0x286   :  { %7474 = vst [vmem:[#allocation127_spill] sm:$0xff] %v6182_v46 }
 0x287   :  { %3987 = vset.pattern.permute.xlu1 %v7417_v19  ;;  %2267 = vperm.xlu0 %4010, %v6171_v49  }
 0x288   :  { %2135 = vperm.xlu1 %3987, %v5801_v52   ;;  %v6175_v7 = vpop.permute.xlu0 %1863 }
 0x289   :  { %7473 = vst [vmem:[#allocation126_spill] sm:$0xff] %v6175_v7  ;;  %v6177_v45 = vpop.permute.xlu1 %2690 }
 0x28b   :  { %2275 = vperm.xlu0 %4010, %v6182_v46  }
 0x28c   :  { %3988 = vset.pattern.permute.xlu1 %v7432_v36  ;;  %v6186_v16 = vpop.permute.xlu0 %2171 }
 0x28d   :  { %2175 = vperm.xlu1 %3988, %v7411_v62  }
 0x28e   :  { %v6189_v38 = vpop.permute.xlu1 %2742 }
 0x28f   :  { %4013 = vset.pattern.permute.xlu0 %v7410_v31 }
 0x290   :  { %2347 = vperm.xlu0 %4013, %v6056_v21   ;;  %v6193_v7 = vpop.permute.xlu0 %2794 }
 0x291   :  { %3990 = vset.pattern.permute.xlu1 %v7417_v19 }
 0x292   :  { %2758 = vperm.xlu1 %3990, %v5820_v10  }
 0x293   :  { %v6197_v53 = vpop.permute.xlu1 %1775 }
 0x294   :  { %7475 = vst [vmem:[#allocation128_spill] sm:$0xff] %v6197_v53  ;;  %2359 = vperm.xlu0 %4013, %v6076_v42   ;;  %v6200_v14 = vpop.permute.xlu0 %2786 }
 0x296   :  { %3991 = vset.pattern.permute.xlu1 %v7432_v36 }
 0x297   :  { %2798 = vperm.xlu1 %3991, %v5836_v60  }
 0x298   :  { %v6204_v62 = vpop.permute.xlu1 %1963  ;;  %2363 = vperm.xlu0 %4013, %v6182_v46   ;;  %v6207_v30 = vpop.permute.xlu0 %1871 }
 0x299   :  { %7476 = vst [vmem:[#allocation129_spill] sm:$0xff] %v6204_v62  ;;  %7477 = vst [vmem:[#allocation130_spill] sm:$0xff] %v6207_v30  ;;  %v7492_v30 = vld [vmem:[#allocation72_spill] sm:$0xff] }
 0x29b   :  { %3992 = vset.pattern.permute.xlu1 %v7417_v19 }
 0x29c   :  { %1831 = vperm.xlu1 %3992, %v5976_v39   ;;  %4021 = vset.pattern.permute.xlu0 %v7417_v19  ;;  %v6212_v53 = vpop.permute.xlu0 %1879 }
 0x29d   :  { %7478 = vst [vmem:[#allocation131_spill] sm:$0xff] %v6212_v53  ;;  %v6214_v27 = vpop.permute.xlu1 %2003  ;;  %2431 = vperm.xlu0 %4021, %v6160_v37  }
 0x29e   :  { %7479 = vst [vmem:[#allocation132_spill] sm:$0xff] %v6214_v27 }
 0x2a0   :  { %3993 = vset.pattern.permute.xlu1 %v7404_v56  ;;  %v6218_v60 = vpop.permute.xlu0 %2810 }
 0x2a1   :  { %7480 = vst [vmem:[#allocation133_spill] sm:$0xff] %v6218_v60  ;;  %2099 = vperm.xlu1 %3993, %v5964_v28   ;;  %4022 = vset.pattern.permute.xlu0 %v7404_v56  ;;  %v7495_v56 = vld [vmem:[#allocation66_spill] sm:$0xff] }
 0x2a2   :  { %v6222_v62 = vpop.permute.xlu1 %2071  ;;  %2383 = vperm.xlu0 %4022, %v6160_v37  }
 0x2a3   :  { %7481 = vst [vmem:[#allocation134_spill] sm:$0xff] %v6222_v62 }
 0x2a4   :  { %v6225_v39 = vpop.permute.xlu0 %2191 }
 0x2a5   :  { %7482 = vst [vmem:[#allocation135_spill] sm:$0xff] %v6225_v39  ;;  %3994 = vset.pattern.permute.xlu1 %v7432_v36 }
 0x2a6   :  { %2167 = vperm.xlu1 %3994, %v5989_v3   ;;  %v6229_v27 = vpop.permute.xlu1 %2083  ;;  %2407 = vperm.xlu0 %4022, %v6076_v42  }
 0x2a7   :  { %7483 = vst [vmem:[#allocation136_spill] sm:$0xff] %v6229_v27 }
 0x2a8   :  { %v6232_v53 = vpop.permute.xlu0 %2195 }
 0x2a9   :  { %7484 = vst [vmem:[#allocation137_spill] sm:$0xff] %v6232_v53 }
 0x2aa   :  { %2179 = vperm.xlu1 %3994, %v5744_v47   ;;  %2411 = vperm.xlu0 %4022, %v6182_v46   ;;  %v4097_v47 = vld [vmem:[%s7051_s1 + $0x2a] sm:$0x1] }
 0x2ab   :  { %v6236_v60 = vpop.permute.xlu1 %2666 }
 0x2ac   :  { %7485 = vst [vmem:[#allocation138_spill] sm:$0xff] %v6236_v60 }
 0x2ad   :  { %v6238_v62 = vpop.permute.xlu0 %1663 }
 0x2ae   :  { %2802 = vperm.xlu1 %3994, %v5768_v54   ;;  %4028 = vset.pattern.permute.xlu0 %v7432_v36 }
 0x2af   :  { %2479 = vperm.xlu0 %4028, %v6160_v37  }
 0x2b0   :  { %v6243_v3 = vpop.permute.xlu1 %2706 }
 0x2b1   :  { %7486 = vst [vmem:[#allocation139_spill] sm:$0xff] %v6243_v3  ;;  %v6245_v39 = vpop.permute.xlu0 %1675 }
 0x2b2   :  { %1875 = vperm.xlu1 %3994, %v4097_v47   ;;  %v7491_v47 = vld [vmem:[#allocation71_spill] sm:$0xff] }
 0x2b3   :  { %2495 = vperm.xlu0 %4028, %v6065_v8   ;;  %v1967_v42 = vmul.f32 %v5908_v44, %v7491_v47 }
 0x2b4   :  { %v6251_v53 = vpop.permute.xlu1 %1779 }
 0x2b5   :  { %7487 = vst [vmem:[#allocation140_spill] sm:$0xff] %v6251_v53  ;;  %v6253_v60 = vpop.permute.xlu0 %1683 }
 0x2b6   :  { %7488 = vst [vmem:[#allocation141_spill] sm:$0xff] %v6253_v60  ;;  %2183 = vperm.xlu1 %3994, %v5801_v52   ;;  %v7494_v52 = vld [vmem:[#allocation93_spill] sm:$0xff] }
 0x2b7   :  { %2499 = vperm.xlu0 %4028, %v6171_v49  }
 0x2b9   :  { %v6257_v54 = vpop.permute.xlu1 %1819  ;;  %v6259_v3 = vpop.permute.xlu0 %1691 }
 0x2ba   :  { %7489 = vst [vmem:[#allocation142_spill] sm:$0xff] %v6257_v54  ;;  %7490 = vst [vmem:[#allocation143_spill] sm:$0xff] %v6259_v3  ;;  %2806 = vperm.xlu1 %3994, %v5820_v10   ;;  %v2055_v54 = vmul.f32 %v7495_v56, %v7494_v52  ;;  %v2103_v10 = vmul.f32 %v6083_v0, %v5520_v32  ;;  %v2199_v56 = vmul.f32 %v6186_v16, %v5591_v2 }
 0x2bb   :  { %2507 = vperm.xlu0 %4028, %v6182_v46  }
 0x2bd   :  { %v1980_v27 = vpop.permute.xlu0 %1979 }
 0x2be   :  { %v2007_v53 = vmul.f32 %v1980_v27, %v7492_v30  ;;  %3996 = vset.pattern.permute.xlu1 %v7417_v19  ;;  %v6267_v60 = vpop.permute.xlu1 %2047  ;;  %v2151_v27 = vmul.f32 %v6071_v55, %v5566_v23 }
 0x2bf   :  { %7493 = vst [vmem:[#allocation144_spill] sm:$0xff] %v6267_v60  ;;  %2147 = vperm.xlu1 %3996, %v5964_v28  }
 0x2c0   :  { %v2015_v3 = vadd.f32 %v2007_v53, %v1967_v42 }
 0x2c1   :  { %v6272_v49 = vpop.permute.xlu0 %2606 }
 0x2c2   :  { %7496 = vst [vmem:[#allocation66_spill] sm:$0xff] %v6272_v49  ;;  %v2063_v46 = vadd.f32 %v2055_v54, %v2015_v3 }
 0x2c3   :  { %3997 = vset.pattern.permute.xlu1 %v7432_v36  ;;  %v6277_v44 = vpop.permute.xlu1 %2087 }
 0x2c4   :  { %7497 = vst [vmem:[#allocation145_spill] sm:$0xff] %v6277_v44  ;;  %v2111_v60 = vadd.f32 %v2103_v10, %v2063_v46  ;;  %2187 = vperm.xlu1 %3997, %v5830_v61  }
 0x2c5   :  { %v6282_v28 = vpop.permute.xlu0 %2622 }
 0x2c6   :  { %7498 = vst [vmem:[#allocation146_spill] sm:$0xff] %v6282_v28  ;;  %v2159_v42 = vadd.f32 %v2151_v27, %v2111_v60 }
 0x2c8   :  { %v6286_v53 = vadd.f32 %v2199_v56, %v2159_v42  ;;  %1883 = vperm.xlu1 %3997, %v6137_v1   ;;  %v6289_v0 = vpop.permute.xlu1 %2670  ;;  %v6307_v1 = vld [vmem:[%s7051_s1 + $0x14] sm:$0x1] }
 0x2c9   :  { %7500 = vst [vmem:[#allocation148_spill] sm:$0xff] %v6289_v0  ;;  %v6291_v3 = vpop.permute.xlu0 %2291  ;;  %v7508_v56 = vld [vmem:[#allocation76_spill] sm:$0xff]  ;;  %v7511_v0 = vld [vmem:[#allocation61_spill] sm:$0xff] }
 0x2ca   :  { %7499 = vst [vmem:[#allocation147_spill] sm:$0xff] %v6286_v53  ;;  %7501 = vst [vmem:[#allocation149_spill] sm:$0xff] %v6291_v3  ;;  %v2627_v42 = vmul.f32 %v5918_v43, %v7508_v56  ;;  %v2625_v36 = vmul.f32 %v5938_v5, %v7511_v0 }
 0x2cc   :  { %2814 = vperm.xlu1 %3997, %v5854_v63  }
 0x2cd   :  { %v6294_v55 = vpop.permute.xlu1 %2710  ;;  %v6296_v46 = vpop.permute.xlu0 %2299 }
 0x2ce   :  { %7502 = vst [vmem:[#allocation150_spill] sm:$0xff] %v6294_v55  ;;  %7503 = vst [vmem:[#allocation151_spill] sm:$0xff] %v6296_v46  ;;  %v7510_v46 = vld [vmem:[#allocation74_spill] sm:$0xff]  ;;  %v7512_v55 = vld [vmem:[#allocation60_spill] sm:$0xff] }
 0x2cf   :  { %v2587_v3 = vmul.f32 %v5913_v17, %v7510_v46  ;;  %v2626_v17 = vmul.f32 %v5903_v25, %v7492_v30 }
 0x2d0   :  { %3999 = vset.pattern.permute.xlu1 %v7230_v24 }
 0x2d1   :  { %2251 = vperm.xlu1 %3999, %v6044_v51   ;;  %v6300_v16 = vpop.permute.xlu0 %2303  ;;  %v2635_v28 = vadd.f32 %v2627_v42, %v2587_v3  ;;  %v7516_v42 = vld [vmem:[#allocation84_spill] sm:$0xff] }
 0x2d2   :  { %7504 = vst [vmem:[#allocation152_spill] sm:$0xff] %v6300_v16  ;;  %v6302_v61 = vpop.permute.xlu1 %2750 }
 0x2d3   :  { %7505 = vst [vmem:[#allocation153_spill] sm:$0xff] %v6302_v61  ;;  %v2585_v61 = vmul.f32 %v5933_v33, %v7512_v55  ;;  %v7515_v33 = vld [vmem:[#allocation78_spill] sm:$0xff] }
 0x2d4   :  { %v2673_v19 = vmul.f32 %v7516_v42, %v7515_v33  ;;  %v7517_v42 = vld [vmem:[#allocation55_spill] sm:$0xff] }
 0x2d5   :  { %2255 = vperm.xlu1 %3999, %v6307_v1   ;;  %v6310_v63 = vpop.permute.xlu0 %2311  ;;  %v2633_v53 = vadd.f32 %v2625_v36, %v2585_v61  ;;  %v2723_v61 = vmul.f32 %v5984_v9, %v5513_v29  ;;  %v2770_v9 = vmul.f32 %v6189_v38, %v5566_v23  ;;  %v2818_v38 = vmul.f32 %v6165_v34, %v5591_v2 }
 0x2d6   :  { %7506 = vst [vmem:[#allocation154_spill] sm:$0xff] %v6310_v63 }
 0x2d7   :  { %v6312_v60 = vpop.permute.xlu1 %1783 }
 0x2d8   :  { %7507 = vst [vmem:[#allocation155_spill] sm:$0xff] %v6312_v60 }
 0x2d9   :  { %4000 = vset.pattern.permute.xlu1 %v7266_v41 }
 0x2da   :  { %2295 = vperm.xlu1 %4000, %v6307_v1   ;;  %v1628_v54 = vpop.permute.xlu0 %1627 }
 0x2db   :  { %v1655_v3 = vmul.f32 %v1628_v54, %v7491_v47  ;;  %v2722_v54 = vmul.f32 %v6032_v15, %v5520_v32 }
 0x2dc   :  { %v6316_v10 = vpop.permute.xlu1 %1823 }
 0x2de   :  { %4001 = vset.pattern.permute.xlu1 %v7230_v24  ;;  %v1640_v27 = vpop.permute.xlu0 %1639 }
 0x2df   :  { %2259 = vperm.xlu1 %4001, %v6056_v21  }
 0x2e1   :  { %v6322_v16 = vpop.permute.xlu1 %2051 }
 0x2e2   :  { %7509 = vst [vmem:[#allocation156_spill] sm:$0xff] %v6322_v16  ;;  %v6324_v63 = vpop.permute.xlu0 %1647  ;;  %v7514_v16 = vld [vmem:[#allocation70_spill] sm:$0xff] }
 0x2e3   :  { %4002 = vset.pattern.permute.xlu1 %v7266_v41  ;;  %v2675_v60 = vmul.f32 %v7514_v16, %v5445_v11  ;;  %v2721_v16 = vmul.f32 %v6177_v45, %v5435_v18  ;;  %v1743_v45 = vmul.f32 %v7517_v42, %v7494_v52 }
 0x2e4   :  { %2287 = vperm.xlu1 %4002, %v6160_v37  }
 0x2e5   :  { %v2683_v5 = vadd.f32 %v2675_v60, %v2635_v28  ;;  %v1695_v28 = vmul.f32 %v5849_v57, %v7492_v30  ;;  %v2771_v60 = vmul.f32 %v6080_v4, %v5530_v48  ;;  %v2819_v57 = vmul.f32 %v6193_v7, %v5584_v40 }
 0x2e6   :  { %v6334_v44 = vpop.permute.xlu1 %2119  ;;  %v2559_v43 = vpop.permute.xlu0 %2558  ;;  %v2817_v7 = vmul.f32 %v6200_v14, %v5552_v13  ;;  %v1791_v14 = vmul.f32 %v6000_v26, %v5520_v32  ;;  %v7566_v32 = vld [vmem:[#allocation65_spill] sm:$0xff] }
 0x2e7   :  { %7513 = vst [vmem:[#allocation157_spill] sm:$0xff] %v6334_v44  ;;  %v2586_v49 = vmul.f32 %v2559_v43, %v7491_v47  ;;  %v2674_v44 = vmul.f32 %v5944_v59, %v7494_v52  ;;  %v2681_v43 = vadd.f32 %v2673_v19, %v2633_v53  ;;  %v1696_v19 = vmul.f32 %v5859_v6, %v7508_v56 }
 0x2e8   :  { %4003 = vset.pattern.permute.xlu1 %v7410_v31  ;;  %v1694_v53 = vmul.f32 %v6238_v62, %v7511_v0  ;;  %v1654_v6 = vmul.f32 %v5804_v12, %v7512_v55 }
 0x2e9   :  { %2339 = vperm.xlu1 %4003, %v6044_v51   ;;  %v2634_v25 = vadd.f32 %v2626_v17, %v2586_v49  ;;  %v2731_v49 = vadd.f32 %v2723_v61, %v2683_v5  ;;  %v1703_v17 = vadd.f32 %v1695_v28, %v1655_v3  ;;  %v2729_v47 = vadd.f32 %v2721_v16, %v2681_v43  ;;  %v7519_v3 = vld [vmem:[#allocation75_spill] sm:$0xff] }
 0x2ea   :  { %v6350_v36 = vpop.permute.xlu1 %2131  ;;  %v1658_v16 = vmul.f32 %v1640_v27, %v7519_v3  ;;  %v7520_v61 = vld [vmem:[#allocation79_spill] sm:$0xff]  ;;  %v1702_v27 = vadd.f32 %v1694_v53, %v1654_v6 }
 0x2eb   :  { %v2682_v59 = vadd.f32 %v2674_v44, %v2634_v25  ;;  %v2779_v15 = vadd.f32 %v2771_v60, %v2731_v49  ;;  %v2769_v44 = vmul.f32 %v6101_v22, %v5485_v50  ;;  %v1656_v22 = vmul.f32 %v5811_v20, %v7510_v46  ;;  %v7523_v49 = vld [vmem:[#allocation80_spill] sm:$0xff]  ;;  %v7527_v53 = vld [vmem:[#allocation43_spill] sm:$0xff] }
 0x2ec   :  { %v1698_v62 = vmul.f32 %v5865_v58, %v7520_v61  ;;  %v1751_v28 = vadd.f32 %v1743_v45, %v1703_v17  ;;  %v1744_v60 = vmul.f32 %v5878_v35, %v5445_v11  ;;  %v7522_v45 = vld [vmem:[#allocation23_spill] sm:$0xff] }
 0x2ed   :  { %4004 = vset.pattern.permute.xlu1 %v7230_v24  ;;  %v2730_v4 = vadd.f32 %v2722_v54, %v2682_v59  ;;  %v2827_v34 = vadd.f32 %v2819_v57, %v2779_v15  ;;  %v2777_v54 = vadd.f32 %v2769_v44, %v2729_v47  ;;  %v1704_v12 = vadd.f32 %v1696_v19, %v1656_v22  ;;  %v7525_v57 = vld [vmem:[#allocation57_spill] sm:$0xff]  ;;  %v7529_v6 = vld [vmem:[#allocation19_spill] sm:$0xff]  ;;  %v7530_v22 = vld [vmem:[#allocation28_spill] sm:$0xff] }
 0x2ee   :  { %2263 = vperm.xlu1 %4004, %v6065_v8   ;;  %v1706_v59 = vadd.f32 %v1698_v62, %v1658_v16  ;;  %v1742_v35 = vmul.f32 %v7522_v45, %v7515_v33  ;;  %v1697_v47 = vmul.f32 %v6245_v39, %v7523_v49  ;;  %v1799_v17 = vadd.f32 %v1791_v14, %v1751_v28  ;;  %v7526_v19 = vld [vmem:[#allocation77_spill] sm:$0xff] }
 0x2ef   :  { %v6374_v5 = vpop.permute.xlu1 %2714  ;;  %v2778_v25 = vadd.f32 %v2770_v9, %v2730_v4  ;;  %v2825_v20 = vadd.f32 %v2817_v7, %v2777_v54  ;;  %v7524_v9 = vld [vmem:[#allocation95_spill] sm:$0xff]  ;;  %v1752_v26 = vadd.f32 %v1744_v60, %v1704_v12  ;;  %v2843_v15 = vrot.slane %v2827_v34, 6  ;;  %v7531_v60 = vld [vmem:[#allocation125_spill] sm:$0xff]  ;;  %v7533_v54 = vld [vmem:[#allocation32_spill] sm:$0xff] }
 0x2f0   :  { %7518 = vst [vmem:[#allocation70_spill] sm:$0xff] %v6374_v5  ;;  %v1746_v4 = vmul.f32 %v7525_v57, %v7524_v9  ;;  %v7528_v7 = vld [vmem:[#allocation99_spill] sm:$0xff]  ;;  %v1792_v39 = vmul.f32 %v7529_v6, %v5513_v29  ;;  %v1840_v62 = vmul.f32 %v7530_v22, %v5530_v48  ;;  %v7537_v57 = vld [vmem:[#allocation128_spill] sm:$0xff]  ;;  %v7606_v5 = vld [vmem:[#allocation117_spill] sm:$0xff] }
 0x2f1   :  { %v2826_v43 = vadd.f32 %v2818_v38, %v2778_v25  ;;  %v1657_v38 = vmul.f32 %v7527_v53, %v7526_v19  ;;  %v1839_v16 = vmul.f32 %v7528_v7, %v5566_v23  ;;  %v1750_v25 = vadd.f32 %v1742_v35, %v1702_v27  ;;  %v7536_v35 = vld [vmem:[#allocation112_spill] sm:$0xff]  ;;  %v7544_v23 = vld [vmem:[#allocation9_spill] sm:$0xff] }
 0x2f2   :  { %4005 = vset.pattern.permute.xlu1 %v7410_v31  ;;  %v1754_v28 = vadd.f32 %v1746_v4, %v1706_v59  ;;  %v1794_v53 = vmul.f32 %v7537_v57, %v7536_v35  ;;  %v7538_v59 = vld [vmem:[#allocation92_spill] sm:$0xff]  ;;  %v7539_v4 = vld [vmem:[#allocation54_spill] sm:$0xff] }
 0x2f3   :  { %2343 = vperm.xlu1 %4005, %v6307_v1   ;;  %v2841_v42 = vrot.slane %v2826_v43, 7  ;;  %v1790_v43 = vmul.f32 %v7533_v54, %v5435_v18  ;;  %v1705_v14 = vadd.f32 %v1697_v47, %v1657_v38  ;;  %v1847_v12 = vadd.f32 %v1839_v16, %v1799_v17  ;;  %v7541_v47 = vld [vmem:[#allocation37_spill] sm:$0xff] }
 0x2f4   :  { %v6393_v58 = vpop.permute.xlu1 %2754  ;;  %v1745_v7 = vmul.f32 %v7539_v4, %v7538_v59  ;;  %v1802_v54 = vadd.f32 %v1794_v53, %v1754_v28  ;;  %v1838_v17 = vmul.f32 %v7541_v47, %v5485_v50  ;;  %v7543_v4 = vld [vmem:[#allocation108_spill] sm:$0xff] }
 0x2f5   :  { %7521 = vst [vmem:[#allocation84_spill] sm:$0xff] %v6393_v58  ;;  %v2842_v44 = vsel %vm169_vm1, %v2841_v42, %v2825_v20  ;;  %v1800_v20 = vadd.f32 %v1792_v39, %v1752_v26  ;;  %v7535_v42 = vld [vmem:[#allocation126_spill] sm:$0xff]  ;;  %v1798_v6 = vadd.f32 %v1790_v43, %v1750_v25  ;;  %v7542_v39 = vld [vmem:[#allocation121_spill] sm:$0xff]  ;;  %v7545_v25 = vld [vmem:[#allocation111_spill] sm:$0xff] }
 0x2f6   :  { %v6413_v34 = vsel %vm172_vm2, %v2843_v15, %v2842_v44  ;;  %v1888_v45 = vmul.f32 %v7535_v42, %v5584_v40  ;;  %v7540_v15 = vld [vmem:[#allocation47_spill] sm:$0xff]  ;;  %v1753_v26 = vadd.f32 %v1745_v7, %v1705_v14  ;;  %v1842_v42 = vmul.f32 %v6316_v10, %v7542_v39 }
 0x2f7   :  { %4006 = vset.pattern.permute.xlu1 %v7266_v41  ;;  %7532 = vst [vmem:[#allocation55_spill] sm:$0xff] %v6413_v34  ;;  %v1887_v44 = vmul.f32 %v7540_v15, %v5591_v2  ;;  %v1848_v22 = vadd.f32 %v1840_v62, %v1800_v20  ;;  %v1793_v15 = vmul.f32 %v7544_v23, %v7543_v4  ;;  %v7546_v62 = vld [vmem:[#allocation142_spill] sm:$0xff]  ;;  %v7547_v7 = vmov 3   ;;  %v7580_v34 = vld [vmem:[#allocation36_spill] sm:$0xff] }
 0x2f8   :  { %2307 = vperm.xlu1 %4006, %v7531_v60   ;;  %v1841_v28 = vmul.f32 %v7546_v62, %v7545_v25  ;;  %v1846_v43 = vadd.f32 %v1838_v17, %v1798_v6  ;;  %v1850_v53 = vadd.f32 %v1842_v42, %v1802_v54  ;;  %v7550_v62 = vld [vmem:[#allocation119_spill] sm:$0xff] }
 0x2f9   :  { %v6417_v27 = vpop.permute.xlu1 %1787  ;;  %v1895_v38 = vadd.f32 %v1887_v44, %v1847_v12  ;;  %v1896_v16 = vadd.f32 %v1888_v45, %v1848_v22  ;;  %v1801_v47 = vadd.f32 %v1793_v15, %v1753_v26  ;;  %v7548_v45 = vld [vmem:[#allocation122_spill] sm:$0xff] }
 0x2fa   :  { %7534 = vst [vmem:[#allocation75_spill] sm:$0xff] %v6417_v27  ;;  %v7549_v44 = vld [vmem:[#allocation130_spill] sm:$0xff]  ;;  %v7579_v27 = vld [vmem:[#allocation53_spill] sm:$0xff] }
 0x2fb   :  { %v1910_v14 = vrot.slane %v1895_v38, 7  ;;  %v1890_v10 = vmul.f32 %v7549_v44, %v7548_v45  ;;  %v1849_v23 = vadd.f32 %v1841_v28, %v1801_v47  ;;  %v1944_v38 = vpop.permute.xlu0 %1943 }
 0x2fc   :  { %4007 = vset.pattern.permute.xlu1 %v7410_v31  ;;  %v1968_v47 = vmul.f32 %v1944_v38, %v7510_v46  ;;  %v7578_v46 = vld [vmem:[#allocation59_spill] sm:$0xff] }
 0x2fd   :  { %2335 = vperm.xlu1 %4007, %v6160_v37   ;;  %v1912_v37 = vrot.slane %v1896_v16, 6  ;;  %v1898_v17 = vadd.f32 %v1890_v10, %v1850_v53  ;;  %v7551_v16 = vld [vmem:[#allocation29_spill] sm:$0xff]  ;;  %v7557_v10 = vld [vmem:[#allocation127_spill] sm:$0xff]  ;;  %v2589_v30 = vmul.f32 %v7578_v46, %v7519_v3 }
 0x2fe   :  { %v1856_v57 = vpop.permute.xlu1 %1855 }
 0x2ff   :  { %v1886_v20 = vmul.f32 %v1856_v57, %v5552_v13  ;;  %v1916_v15 = vrot.slane %v1898_v17, 4 }
 0x301   :  { %v1894_v12 = vadd.f32 %v1886_v20, %v1846_v43  ;;  %4008 = vset.pattern.permute.xlu1 %v7547_v7  ;;  %v6454_v20 = vpop.permute.xlu0 %2566 }
 0x302   :  { %2387 = vperm.xlu1 %4008, %v6044_v51   ;;  %v1868_v22 = vpop.permute.xlu1 %1867 }
 0x303   :  { %v1911_v2 = vsel %vm169_vm1, %v1910_v14, %v1894_v12  ;;  %v1889_v6 = vmul.f32 %v1868_v22, %v7550_v62  ;;  %v7555_v14 = vld [vmem:[#allocation26_spill] sm:$0xff] }
 0x304   :  { %v1913_v54 = vsel %vm172_vm2, %v1912_v37, %v1911_v2  ;;  %v2008_v12 = vmul.f32 %v7555_v14, %v7508_v56  ;;  %v7556_v37 = vld [vmem:[#allocation52_spill] sm:$0xff] }
 0x305   :  { %v1897_v26 = vadd.f32 %v1889_v6, %v1849_v23  ;;  %v1948_v53 = vpop.permute.xlu0 %1947  ;;  %v2006_v44 = vmul.f32 %v7556_v37, %v7511_v0  ;;  %v7559_v6 = vld [vmem:[#allocation18_spill] sm:$0xff]  ;;  %v7567_v0 = vld [vmem:[#allocation67_spill] sm:$0xff] }
 0x306   :  { %4009 = vset.pattern.permute.xlu1 %v7230_v24  ;;  %v2016_v23 = vadd.f32 %v2008_v12, %v1968_v47  ;;  %v1966_v17 = vmul.f32 %v7559_v6, %v7512_v55  ;;  %v7564_v37 = vld [vmem:[#allocation102_spill] sm:$0xff]  ;;  %v7565_v12 = vld [vmem:[#allocation21_spill] sm:$0xff] }
 0x307   :  { %v1914_v42 = vrot.slane %v1897_v26, 5  ;;  %2271 = vperm.xlu1 %4009, %v7551_v16   ;;  %v6447_v57 = vpop.permute.xlu1 %2135  ;;  %v7560_v26 = vld [vmem:[#allocation46_spill] sm:$0xff]  ;;  %v6483_v47 = vmul.f32 %v7564_v37, %v7524_v9  ;;  %v2629_v6 = vmul.f32 %v7565_v12, %v7520_v61  ;;  %v7571_v37 = vld [vmem:[#allocation64_spill] sm:$0xff]  ;;  %v7574_v12 = vld [vmem:[#allocation45_spill] sm:$0xff] }
 0x308   :  { %7552 = vst [vmem:[#allocation23_spill] sm:$0xff] %v6447_v57  ;;  %v2056_v38 = vmul.f32 %v7560_v26, %v5445_v11  ;;  %v7562_v16 = vld [vmem:[#allocation62_spill] sm:$0xff]  ;;  %v2014_v14 = vadd.f32 %v2006_v44, %v1966_v17  ;;  %v2011_v26 = vmul.f32 %v7567_v0, %v7566_v32  ;;  %v7576_v0 = vld [vmem:[#allocation83_spill] sm:$0xff]  ;;  %v7586_v57 = vld [vmem:[#allocation81_spill] sm:$0xff] }
 0x309   :  { %v1915_v43 = vsel %vm175_vm3, %v1914_v42, %v1913_v54  ;;  %v1952_v54 = vpop.permute.xlu0 %1951  ;;  %v7561_v42 = vld [vmem:[#allocation103_spill] sm:$0xff]  ;;  %v7568_v11 = vld [vmem:[#allocation90_spill] sm:$0xff]  ;;  %v2637_v46 = vadd.f32 %v2629_v6, %v2589_v30 }
 0x30a   :  { %v6451_v28 = vsel %vm178_vm4, %v1916_v15, %v1915_v43  ;;  %v6476_v15 = vmul.f32 %v7562_v16, %v7561_v42  ;;  %v2064_v55 = vadd.f32 %v2056_v38, %v2016_v23  ;;  %v7577_v23 = vld [vmem:[#allocation24_spill] sm:$0xff] }
 0x30b   :  { %7553 = vst [vmem:[#allocation80_spill] sm:$0xff] %v6451_v28  ;;  %4011 = vset.pattern.permute.xlu1 %v7410_v31  ;;  %v1700_v38 = vmul.f32 %v7577_v23, %v7576_v0  ;;  %v7581_v28 = vld [vmem:[#allocation50_spill] sm:$0xff] }
 0x30c   :  { %2351 = vperm.xlu1 %4011, %v6065_v8   ;;  %v2176_v2 = vpop.permute.xlu1 %2175 }
 0x310   :  { %4012 = vset.pattern.permute.xlu1 %v7547_v7 }
 0x311   :  { %2391 = vperm.xlu1 %4012, %v6307_v1   ;;  %v6459_v24 = vpop.permute.xlu1 %2758 }
 0x312   :  { %7554 = vst [vmem:[#allocation57_spill] sm:$0xff] %v6459_v24  ;;  %v1747_v24 = vmul.f32 %v7581_v28, %v7568_v11 }
 0x315   :  { %4014 = vset.pattern.permute.xlu1 %v7266_v41  ;;  %v7563_v41 = vld [vmem:[#allocation91_spill] sm:$0xff] }
 0x316   :  { %2315 = vperm.xlu1 %4014, %v7557_v10   ;;  %v6468_v22 = vpop.permute.xlu1 %2798  ;;  %v2054_v43 = vmul.f32 %v7563_v41, %v7515_v33  ;;  %v7569_v41 = vld [vmem:[#allocation109_spill] sm:$0xff]  ;;  %v7573_v10 = vld [vmem:[#allocation68_spill] sm:$0xff] }
 0x317   :  { %7558 = vst [vmem:[#allocation77_spill] sm:$0xff] %v6468_v22  ;;  %v2059_v44 = vmul.f32 %v7569_v41, %v7568_v11  ;;  %v7572_v33 = vld [vmem:[#allocation33_spill] sm:$0xff]  ;;  %v6502_v56 = vmul.f32 %v7574_v12, %v7573_v10  ;;  %v1971_v41 = vmul.f32 %v7579_v27, %v7571_v37  ;;  %v7585_v12 = vld [vmem:[#allocation56_spill] sm:$0xff]  ;;  %v6520_v22 = vpop.permute.xlu0 %2574  ;;  %v2010_v27 = vmul.f32 %v7586_v57, %v7520_v61 }
 0x318   :  { %v1659_v52 = vmul.f32 %v7572_v33, %v7571_v37  ;;  %v7582_v33 = vld [vmem:[#allocation100_spill] sm:$0xff]  ;;  %v2062_v23 = vadd.f32 %v2054_v43, %v2014_v14  ;;  %v7590_v14 = vld [vmem:[#allocation141_spill] sm:$0xff] }
 0x319   :  { %7575 = vst [vmem:[#allocation43_spill] sm:$0xff] %v6502_v56  ;;  %v2009_v56 = vmul.f32 %v7585_v12, %v7523_v49  ;;  %v2019_v58 = vadd.f32 %v2011_v26, %v1971_v41  ;;  %v7589_v12 = vld [vmem:[#allocation134_spill] sm:$0xff]  ;;  %v1699_v30 = vmul.f32 %v7590_v14, %v7566_v32  ;;  %v7597_v14 = vld [vmem:[#allocation49_spill] sm:$0xff]  ;;  %v7599_v61 = vld [vmem:[#allocation88_spill] sm:$0xff] }
 0x31a   :  { %4015 = vset.pattern.permute.xlu1 %v7410_v31  ;;  %v7570_v31 = vld [vmem:[#allocation22_spill] sm:$0xff]  ;;  %v2102_v43 = vmul.f32 %v7589_v12, %v5435_v18  ;;  %v7598_v18 = vld [vmem:[#allocation115_spill] sm:$0xff] }
 0x31b   :  { %2355 = vperm.xlu1 %4015, %v7531_v60   ;;  %v6490_v16 = vpop.permute.xlu1 %1831  ;;  %v6496_v17 = vmul.f32 %v7570_v31, %v7543_v4  ;;  %v2104_v31 = vmul.f32 %v7580_v34, %v5513_v29  ;;  %v7583_v60 = vld [vmem:[#allocation25_spill] sm:$0xff]  ;;  %v7587_v34 = vld [vmem:[#allocation48_spill] sm:$0xff]  ;;  %v7593_v26 = vld [vmem:[#allocation82_spill] sm:$0xff] }
 0x31c   :  { %v6516_v45 = vmul.f32 %v7583_v60, %v7582_v33  ;;  %v6527_v28 = vmul.f32 %v7587_v34, %v7566_v32  ;;  %v7588_v60 = vld [vmem:[#allocation20_spill] sm:$0xff]  ;;  %v1660_v41 = vmul.f32 %v6324_v63, %v7593_v26  ;;  %v2200_v34 = vmul.f32 %v2176_v2, %v5584_v40  ;;  %v7603_v63 = vld [vmem:[#allocation106_spill] sm:$0xff]  ;;  %v7604_v2 = vld [vmem:[#allocation31_spill] sm:$0xff] }
 0x31d   :  { %v2112_v39 = vadd.f32 %v2104_v31, %v2064_v55  ;;  %v2677_v29 = vmul.f32 %v7588_v60, %v7524_v9  ;;  %v7592_v55 = vld [vmem:[#allocation38_spill] sm:$0xff]  ;;  %v1969_v31 = vmul.f32 %v1948_v53, %v7526_v19  ;;  %v7595_v9 = vld [vmem:[#allocation63_spill] sm:$0xff]  ;;  %v2676_v32 = vmul.f32 %v7597_v14, %v7538_v59 }
 0x31e   :  { %7584 = vst [vmem:[#allocation99_spill] sm:$0xff] %v6516_v45  ;;  %v2152_v6 = vmul.f32 %v7592_v55, %v5530_v48  ;;  %v7594_v60 = vld [vmem:[#allocation94_spill] sm:$0xff]  ;;  %v6552_v45 = vmul.f32 %v7599_v61, %v7598_v18  ;;  %v7601_v55 = vld [vmem:[#allocation157_spill] sm:$0xff]  ;;  %v2057_v53 = vmul.f32 %v7603_v63, %v7538_v59  ;;  %v2631_v40 = vmul.f32 %v7604_v2, %v7576_v0  ;;  %v2579_v61 = vpop.permute.xlu0 %2578  ;;  %v7613_v2 = vld [vmem:[#allocation147_spill] sm:$0xff] }
 0x31f   :  { %4016 = vset.pattern.permute.xlu1 %v7547_v7  ;;  %v6546_v12 = vmul.f32 %v7595_v9, %v7594_v60  ;;  %v2150_v48 = vmul.f32 %v7601_v55, %v5485_v50  ;;  %v1707_v33 = vadd.f32 %v1699_v30, %v1659_v52  ;;  %v2588_v14 = vmul.f32 %v6454_v20, %v7526_v19  ;;  %v7607_v55 = vld [vmem:[#allocation58_spill] sm:$0xff]  ;;  %v7615_v59 = vld [vmem:[#allocation139_spill] sm:$0xff] }
 0x320   :  { %2395 = vperm.xlu1 %4016, %v6056_v21   ;;  %v6536_v57 = vpop.permute.xlu1 %2099  ;;  %7600 = vst [vmem:[#allocation32_spill] sm:$0xff] %v6552_v45  ;;  %v2160_v9 = vadd.f32 %v2152_v6, %v2112_v39  ;;  %v2110_v21 = vadd.f32 %v2102_v43, %v2062_v23  ;;  %v7605_v45 = vmov 4   ;;  %v2017_v50 = vadd.f32 %v2009_v56, %v1969_v31  ;;  %v7608_v39 = vld [vmem:[#allocation66_spill] sm:$0xff] }
 0x321   :  { %7591 = vst [vmem:[#allocation19_spill] sm:$0xff] %v6536_v57  ;;  %7596 = vst [vmem:[#allocation28_spill] sm:$0xff] %v6546_v12  ;;  %v6556_v57 = vadd.f32 %v2059_v44, %v2019_v58  ;;  %v2685_v12 = vadd.f32 %v2677_v29, %v2637_v46  ;;  %v1843_v58 = vmul.f32 %v7607_v55, %v7606_v5  ;;  %v7609_v46 = vld [vmem:[#allocation40_spill] sm:$0xff]  ;;  %v7610_v43 = vld [vmem:[#allocation98_spill] sm:$0xff] }
 0x322   :  { %v1708_v44 = vadd.f32 %v1700_v38, %v1660_v41  ;;  %v2628_v29 = vmul.f32 %v7608_v39, %v7523_v49  ;;  %v2158_v23 = vadd.f32 %v2150_v48, %v2110_v21  ;;  %v1970_v52 = vmul.f32 %v1952_v54, %v7519_v3  ;;  %v7611_v6 = vld [vmem:[#allocation30_spill] sm:$0xff]  ;;  %v7614_v54 = vld [vmem:[#allocation136_spill] sm:$0xff] }
 0x323   :  { %7602 = vst [vmem:[#allocation126_spill] sm:$0xff] %v6556_v57  ;;  %v2208_v57 = vadd.f32 %v2200_v34, %v2160_v9  ;;  %v6574_v30 = vmul.f32 %v7610_v43, %v7609_v46  ;;  %v1972_v38 = vmul.f32 %v7611_v6, %v7593_v26  ;;  %v7612_v56 = vld [vmem:[#allocation114_spill] sm:$0xff]  ;;  %v2591_v31 = vmul.f32 %v2579_v61, %v7593_v26  ;;  %v7616_v61 = vld [vmem:[#allocation140_spill] sm:$0xff] }
 0x324   :  { %4017 = vset.pattern.permute.xlu1 %v7605_v45  ;;  %v2012_v41 = vmul.f32 %v7612_v56, %v7576_v0  ;;  %v1755_v34 = vadd.f32 %v1747_v24, %v1707_v33  ;;  %v2222_v9 = vrot.slane %v7613_v2, 7  ;;  %v2636_v48 = vadd.f32 %v2628_v29, %v2588_v14  ;;  %v7617_v29 = vld [vmem:[#allocation155_spill] sm:$0xff]  ;;  %v7619_v2 = vld [vmem:[#allocation138_spill] sm:$0xff] }
 0x325   :  { %2435 = vperm.xlu1 %4017, %v6044_v51   ;;  %v2168_v63 = vpop.permute.xlu1 %2167  ;;  %v2105_v55 = vmul.f32 %v7614_v54, %v7543_v4  ;;  %v2065_v39 = vadd.f32 %v2057_v53, %v2017_v50  ;;  %v2224_v43 = vrot.slane %v2208_v57, 6  ;;  %v2725_v56 = vmul.f32 %v7615_v59, %v7536_v35 }
 0x326   :  { %v2198_v20 = vmul.f32 %v2168_v63, %v5552_v13  ;;  %v1756_v63 = vadd.f32 %v6476_v15, %v1708_v44  ;;  %v1795_v24 = vmul.f32 %v7616_v61, %v7594_v60  ;;  %v2018_v33 = vadd.f32 %v2010_v27, %v1970_v52  ;;  %v7618_v52 = vld [vmem:[#allocation124_spill] sm:$0xff] }
 0x327   :  { %v2639_v15 = vadd.f32 %v2631_v40, %v2591_v31  ;;  %v1844_v50 = vmul.f32 %v6490_v16, %v7609_v46  ;;  %v2020_v53 = vadd.f32 %v2012_v41, %v1972_v38  ;;  %v2684_v59 = vadd.f32 %v2676_v32, %v2636_v48  ;;  %v7620_v16 = vld [vmem:[#allocation129_spill] sm:$0xff]  ;;  %v7622_v38 = vld [vmem:[#allocation131_spill] sm:$0xff] }
 0x328   :  { %v2206_v21 = vadd.f32 %v2198_v20, %v2158_v23  ;;  %v1796_v23 = vmul.f32 %v7617_v29, %v7598_v18  ;;  %v2590_v44 = vmul.f32 %v6520_v22, %v7571_v37  ;;  %v1803_v27 = vadd.f32 %v1795_v24, %v1755_v34  ;;  %v7626_v29 = vld [vmem:[#allocation84_spill] sm:$0xff] }
 0x329   :  { %4018 = vset.pattern.permute.xlu1 %v7547_v7  ;;  %v2180_v6 = vpop.permute.xlu1 %2179  ;;  %v2678_v20 = vmul.f32 %v7618_v52, %v7568_v11  ;;  %v2113_v40 = vadd.f32 %v2105_v55, %v2065_v39  ;;  %v6607_v54 = vmul.f32 %v7620_v16, %v7573_v10  ;;  %v2733_v41 = vadd.f32 %v2725_v56, %v2685_v12  ;;  %v7628_v52 = vld [vmem:[#allocation153_spill] sm:$0xff]  ;;  %v7631_v16 = vld [vmem:[#allocation122_spill] sm:$0xff] }
 0x32a   :  { %v2223_v14 = vsel %vm169_vm1, %v2222_v9, %v2206_v21  ;;  %2399 = vperm.xlu1 %4018, %v6065_v8   ;;  %v2679_v9 = vmul.f32 %v7619_v2, %v7561_v42  ;;  %v1804_v21 = vadd.f32 %v1796_v23, %v1756_v63  ;;  %v2066_v22 = vadd.f32 %v6483_v47, %v2018_v33  ;;  %v7623_v63 = vld [vmem:[#allocation145_spill] sm:$0xff]  ;;  %v7624_v47 = vld [vmem:[#allocation70_spill] sm:$0xff]  ;;  %v7627_v23 = vld [vmem:[#allocation23_spill] sm:$0xff] }
 0x32b   :  { %v6597_v57 = vsel %vm172_vm2, %v2224_v43, %v2223_v14  ;;  %v7621_v43 = vld [vmem:[#allocation123_spill] sm:$0xff]  ;;  %v2153_v34 = vmul.f32 %v6350_v36, %v7545_v25  ;;  %v2201_v55 = vmul.f32 %v2180_v6, %v7550_v62  ;;  %v2106_v39 = vmul.f32 %v7623_v63, %v7536_v35  ;;  %v7625_v14 = vld [vmem:[#allocation121_spill] sm:$0xff] }
 0x32c   :  { %v1892_v32 = vmul.f32 %v7622_v38, %v7621_v43  ;;  %v2687_v48 = vadd.f32 %v2679_v9, %v2639_v15  ;;  %v1852_v61 = vadd.f32 %v1844_v50, %v1804_v21  ;;  %v2638_v24 = vadd.f32 %v6527_v28, %v2590_v44  ;;  %v7629_v28 = vld [vmem:[#allocation77_spill] sm:$0xff] }
 0x32d   :  { %v2803_v31 = vpop.permute.xlu1 %2802  ;;  %v2732_v12 = vadd.f32 %v6496_v17, %v2684_v59  ;;  %v1851_v56 = vadd.f32 %v1843_v58, %v1803_v27  ;;  %v2727_v33 = vmul.f32 %v7624_v47, %v7598_v18  ;;  %v2773_v36 = vmul.f32 %v7626_v29, %v7625_v14  ;;  %v7630_v17 = vld [vmem:[#allocation27_spill] sm:$0xff]  ;;  %v7632_v63 = vld [vmem:[#allocation69_spill] sm:$0xff]  ;;  %v7633_v47 = vld [vmem:[#allocation132_spill] sm:$0xff] }
 0x32e   :  { %4019 = vset.pattern.permute.xlu1 %v7605_v45  ;;  %v2154_v15 = vmul.f32 %v7627_v23, %v7625_v14  ;;  %v2161_v6 = vadd.f32 %v2153_v34, %v2113_v40  ;;  %v2772_v2 = vmul.f32 %v7628_v52, %v7545_v25  ;;  %v2114_v9 = vadd.f32 %v2106_v39, %v2066_v22  ;;  %v7634_v52 = vld [vmem:[#allocation125_spill] sm:$0xff]  ;;  %v7635_v22 = vld [vmem:[#allocation144_spill] sm:$0xff] }
 0x32f   :  { %2439 = vperm.xlu1 %4019, %v6307_v1   ;;  %v2820_v44 = vmul.f32 %v7629_v28, %v7550_v62  ;;  %v2735_v59 = vadd.f32 %v2727_v33, %v2687_v48  ;;  %v1900_v27 = vadd.f32 %v1892_v32, %v1852_v61  ;;  %v2821_v38 = vmul.f32 %v2803_v31, %v7631_v16  ;;  %v7637_v31 = vld [vmem:[#allocation57_spill] sm:$0xff] }
 0x330   :  { %v2209_v21 = vadd.f32 %v2201_v55, %v2161_v6  ;;  %v2013_v40 = vmul.f32 %v7633_v47, %v7632_v63  ;;  %v2686_v34 = vadd.f32 %v2678_v20, %v2638_v24  ;;  %v2780_v29 = vadd.f32 %v2772_v2, %v2732_v12  ;;  %v7638_v28 = vld [vmem:[#allocation133_spill] sm:$0xff] }
 0x331   :  { %v1876_v50 = vpop.permute.xlu1 %1875  ;;  %v2060_v39 = vmul.f32 %v7635_v22, %v7561_v42  ;;  %v2781_v32 = vadd.f32 %v2773_v36, %v2733_v41  ;;  %v2162_v61 = vadd.f32 %v2154_v15, %v2114_v9  ;;  %v2783_v24 = vadd.f32 %v6574_v30, %v2735_v59  ;;  %v7639_v22 = vld [vmem:[#allocation80_spill] sm:$0xff]  ;;  %v7640_v15 = vld [vmem:[#allocation143_spill] sm:$0xff] }
 0x332   :  { %v1891_v58 = vmul.f32 %v1876_v50, %v7630_v17  ;;  %v7636_v50 = vld [vmem:[#allocation150_spill] sm:$0xff]  ;;  %v2828_v33 = vadd.f32 %v2820_v44, %v2780_v29  ;;  %v1920_v12 = vrot.slane %v1900_v27, 2  ;;  %v1701_v9 = vmul.f32 %v7640_v15, %v7632_v63  ;;  %v7641_v29 = vld [vmem:[#allocation100_spill] sm:$0xff]  ;;  %v7643_v59 = vld [vmem:[#allocation35_spill] sm:$0xff] }
 0x333   :  { %4020 = vset.pattern.permute.xlu1 %v7547_v7  ;;  %v2726_v48 = vmul.f32 %v7636_v50, %v7594_v60  ;;  %v2774_v7 = vmul.f32 %v7637_v31, %v7606_v5  ;;  %v2829_v2 = vadd.f32 %v2821_v38, %v2781_v32  ;;  %v2068_v44 = vadd.f32 %v2060_v39, %v2020_v53  ;;  %v7644_v32 = vld [vmem:[#allocation146_spill] sm:$0xff]  ;;  %v7653_v15 = vld [vmem:[#allocation55_spill] sm:$0xff] }
 0x334   :  { %v1899_v23 = vadd.f32 %v1891_v58, %v1851_v56  ;;  %2403 = vperm.xlu1 %4020, %v7634_v52   ;;  %v2226_v56 = vrot.slane %v2209_v21, 5  ;;  %v2823_v58 = vmul.f32 %v7638_v28, %v7621_v43  ;;  %v2021_v31 = vadd.f32 %v2013_v40, %v6607_v54  ;;  %v7652_v54 = vld [vmem:[#allocation43_spill] sm:$0xff] }
 0x335   :  { %v2184_v55 = vpop.permute.xlu1 %2183  ;;  %v2734_v47 = vadd.f32 %v2726_v48, %v2686_v34  ;;  %v2845_v34 = vrot.slane %v2828_v33, 5  ;;  %v2847_v39 = vrot.slane %v2829_v2, 4  ;;  %v7647_v33 = vld [vmem:[#allocation41_spill] sm:$0xff]  ;;  %v1709_v40 = vadd.f32 %v1701_v9, %v7652_v54 }
 0x336   :  { %v1918_v6 = vrot.slane %v1899_v23, 3  ;;  %v2202_v20 = vmul.f32 %v2184_v55, %v7631_v16  ;;  %v7642_v23 = vld [vmem:[#allocation156_spill] sm:$0xff]  ;;  %v2831_v55 = vadd.f32 %v2823_v58, %v2783_v24  ;;  %v2227_v53 = vsel %vm175_vm3, %v2226_v56, %v6597_v57  ;;  %v7649_v24 = vld [vmem:[#allocation42_spill] sm:$0xff] }
 0x337   :  { %v2061_v30 = vmul.f32 %v7642_v23, %v7641_v29  ;;  %v2782_v38 = vadd.f32 %v2774_v7, %v2734_v47  ;;  %v2155_v47 = vmul.f32 %v7647_v33, %v7606_v5  ;;  %v2592_v58 = vmul.f32 %v7649_v24, %v7573_v10  ;;  %v7656_v33 = vld [vmem:[#allocation75_spill] sm:$0xff] }
 0x338   :  { %v1919_v41 = vsel %vm181_vm5, %v1918_v6, %v7639_v22  ;;  %v2210_v36 = vadd.f32 %v2202_v20, %v2162_v61  ;;  %4023 = vset.pattern.permute.xlu1 %v7605_v45  ;;  %v2632_v61 = vmul.f32 %v7644_v32, %v7632_v63  ;;  %v7645_v6 = vld [vmem:[#allocation101_spill] sm:$0xff]  ;;  %v7646_v20 = vld [vmem:[#allocation19_spill] sm:$0xff]  ;;  %v7651_v56 = vmov 5   ;;  %v7654_v32 = vld [vmem:[#allocation120_spill] sm:$0xff] }
 0x339   :  { %2443 = vperm.xlu1 %4023, %v7643_v59   ;;  %v2807_v27 = vpop.permute.xlu1 %2806  ;;  %v6656_v21 = vsel %vm184_vm6, %v1920_v12, %v1919_v41  ;;  %v2109_v28 = vmul.f32 %v7646_v20, %v7645_v6  ;;  %v7648_v22 = vld [vmem:[#allocation39_spill] sm:$0xff]  ;;  %v2069_v2 = vadd.f32 %v2061_v30, %v2021_v31  ;;  %v2846_v23 = vsel %vm175_vm3, %v2845_v34, %v7653_v15  ;;  %v7657_v34 = vld [vmem:[#allocation126_spill] sm:$0xff]  ;;  %v7662_v15 = vld [vmem:[#allocation137_spill] sm:$0xff] }
 0x33a   :  { %v2228_v50 = vrot.slane %v2210_v36, 4  ;;  %v2822_v48 = vmul.f32 %v2807_v27, %v7630_v17  ;;  %v2156_v41 = vmul.f32 %v7648_v22, %v7609_v46  ;;  %v7650_v36 = vld [vmem:[#allocation32_spill] sm:$0xff]  ;;  %v1797_v9 = vmul.f32 %v7656_v33, %v7645_v6  ;;  %v7701_v46 = vld [vmem:[#allocation107_spill] sm:$0xff] }
 0x33b   :  { %v2116_v57 = vadd.f32 %v7650_v36, %v2068_v44  ;;  %v7655_v44 = vld [vmem:[#allocation148_spill] sm:$0xff]  ;;  %v2117_v30 = vadd.f32 %v2109_v28, %v2069_v2  ;;  %v7660_v36 = vld [vmem:[#allocation135_spill] sm:$0xff]  ;;  %v7661_v2 = vld [vmem:[#allocation34_spill] sm:$0xff] }
 0x33c   :  { %v2229_v12 = vsel %vm178_vm4, %v2228_v50, %v2227_v53  ;;  %v2830_v7 = vadd.f32 %v2822_v48, %v2782_v38  ;;  %v2640_v38 = vadd.f32 %v2632_v61, %v2592_v58  ;;  %v2851_v50 = vrot.slane %v2831_v55, 2  ;;  %v7659_v55 = vld [vmem:[#allocation99_spill] sm:$0xff] }
 0x33d   :  { %4024 = vset.pattern.permute.xlu1 %v7651_v56  ;;  %v2848_v48 = vsel %vm178_vm4, %v2847_v39, %v2846_v23  ;;  %v2680_v20 = vmul.f32 %v7655_v44, %v7641_v29  ;;  %v1757_v24 = vadd.f32 %v7659_v55, %v1709_v40  ;;  %v2204_v54 = vmul.f32 %v7660_v36, %v7621_v43  ;;  %v7663_v40 = vld [vmem:[#allocation51_spill] sm:$0xff]  ;;  %v7700_v43 = vld [vmem:[#allocation104_spill] sm:$0xff] }
 0x33e   :  { %v2849_v59 = vrot.slane %v2830_v7, 3  ;;  %2483 = vperm.xlu1 %4024, %v6044_v51   ;;  %v2148_v27 = vpop.permute.xlu1 %2147  ;;  %v7658_v7 = vld [vmem:[#allocation28_spill] sm:$0xff]  ;;  %v2164_v51 = vadd.f32 %v2156_v41, %v2116_v57  ;;  %v2205_v23 = vmul.f32 %v7662_v15, %v7661_v2  ;;  %v2931_v15 = vld [vmem:[%s7055_s5 + $0x8] sm:$0xff] }
 0x33f   :  { %v2157_v53 = vmul.f32 %v2148_v27, %v7654_v32  ;;  %v2115_v22 = vadd.f32 %v7658_v7, %v7657_v34  ;;  %v1805_v27 = vadd.f32 %v1797_v9, %v1757_v24  ;;  %v7665_v9 = vld [vmem:[#allocation44_spill] sm:$0xff] }
 0x340   :  { %v2850_v31 = vsel %vm181_vm5, %v2849_v59, %v2848_v48  ;;  %v2688_v59 = vadd.f32 %v2680_v20, %v2640_v38  ;;  %v2212_v57 = vadd.f32 %v2204_v54, %v2164_v51  ;;  %v7664_v48 = vld [vmem:[#allocation110_spill] sm:$0xff]  ;;  %v2776_v34 = vmul.f32 %v7665_v9, %v7654_v32  ;;  %v4101_v9 = vld [vmem:[%s7051_s1 + $0x34] sm:$0x1] }
 0x341   :  { %v2852_v61 = vsel %vm184_vm6, %v2851_v50, %v2850_v31  ;;  %v2165_v39 = vadd.f32 %v2157_v53, %v2117_v30  ;;  %v2163_v58 = vadd.f32 %v2155_v47, %v2115_v22  ;;  %v2728_v50 = vmul.f32 %v7663_v40, %v7645_v6 }
 0x342   :  { %4025 = vset.pattern.permute.xlu1 %v7605_v45  ;;  %v1845_v47 = vmul.f32 %v7664_v48, %v7654_v32  ;;  %v2232_v20 = vrot.slane %v2212_v57, 2  ;;  %v7667_v57 = vld [vmem:[#allocation149_spill] sm:$0xff] }
 0x343   :  { %2447 = vperm.xlu1 %4025, %v6065_v8   ;;  %v2188_v28 = vpop.permute.xlu1 %2187  ;;  %v2213_v53 = vadd.f32 %v2205_v23, %v2165_v39  ;;  %v2736_v33 = vadd.f32 %v2728_v50, %v2688_v59  ;;  %v7668_v50 = vld [vmem:[#allocation71_spill] sm:$0xff]  ;;  %v4099_v48 = vld [vmem:[%s7051_s1 + $0x1c] sm:$0x1] }
 0x344   :  { %v2203_v41 = vmul.f32 %v2188_v28, %v7630_v17  ;;  %v1853_v31 = vadd.f32 %v1845_v47, %v1805_v27  ;;  %v7669_v47 = vmov 0.0|0.0  }
 0x345   :  { %v2234_v7 = vrot.slane %v2213_v53, 1  ;;  %v7670_v53 = vld [vmem:[#allocation96_spill] sm:$0xff] }
 0x346   :  { %v2211_v44 = vadd.f32 %v2203_v41, %v2163_v58  ;;  %v2784_v58 = vadd.f32 %v2776_v34, %v2736_v33  ;;  %v7666_v41 = vld [vmem:[#allocation72_spill] sm:$0xff] }
 0x347   :  { %4026 = vset.pattern.permute.xlu1 %v7651_v56  ;;  %v1884_v8 = vpop.permute.xlu1 %1883  ;;  %v2319_v40 = vmul.f32 %v7667_v57, %v7666_v41  ;;  %v2932_v33 = vld [vmem:[%s7055_s5 + $0x10] sm:$0xff] }
 0x348   :  { %v2230_v30 = vrot.slane %v2211_v44, 3  ;;  %v1893_v38 = vmul.f32 %v1884_v8, %v7661_v2  ;;  %2487 = vperm.xlu1 %4026, %v6307_v1  }
 0x34a   :  { %v2231_v22 = vsel %vm181_vm5, %v2230_v30, %v2229_v12  ;;  %v1901_v51 = vadd.f32 %v1893_v38, %v1853_v31  ;;  %v2930_v12 = vld [vmem:[%s7055_s5] sm:$0xff]  ;;  %v2933_v30 = vld [vmem:[%s7055_s5 + $0x18] sm:$0xff] }
 0x34b   :  { %v2233_v55 = vsel %vm184_vm6, %v2232_v20, %v2231_v22  ;;  %v2815_v24 = vpop.permute.xlu1 %2814  ;;  %v3817_v23 = vpack.c.bf16 %v2931_v15, %v2930_v12  ;;  %v3820_v31 = vpack.c.bf16 %v2933_v30, %v2932_v33  ;;  %v6741_v38 = vld [vmem:[%s7053_s3] ss:$0 sm:$0xff]  ;;  %v2937_v15 = vld [vmem:[%s7055_s5 + $0x38] sm:$0xff] }
 0x34c   :  { %v1922_v39 = vrot.slane %v1901_v51, 1  ;;  %v2824_v36 = vmul.f32 %v2815_v24, %v7661_v2  ;;  %4027 = vset.pattern.permute.xlu1 %v7605_v45  ;;  %v2235_v54 = vsel %vm187_vm7, %v2234_v7, %v2233_v55  ;;  %7671 = vst [vmem:[#allocation112_spill] sm:$0xff] %v6741_v38  ;;  %v2934_v22 = vld [vmem:[%s7055_s5 + $0x20] sm:$0xff]  ;;  %v2936_v51 = vld [vmem:[%s7055_s5 + $0x30] sm:$0xff]  ;;  %v7672_v55 = vld [vmem:[#allocation73_spill] sm:$0xff] }
 0x34d   :  { %2451 = vperm.xlu1 %4027, %v7634_v52   ;;  %3818 = vmatpush1.bf16.msra.mxu0 %v3817_v23  ;;  %v2912_v23 = vld [vmem:[%s7054_s4] sm:$0xff]  ;;  %v3826_v57 = vpack.c.bf16 %v2937_v15, %v2936_v51 }
 0x34e   :  { %v1923_v1 = vsel %vm187_vm7, %v1922_v39, %v6656_v21  ;;  %v2832_v28 = vadd.f32 %v2824_v36, %v2784_v58  ;;  %3819 = vmatprep.subr.bf16.mxu0 %v7669_v47  ;;  %v7673_v39 = vld [vmem:[#allocation74_spill] sm:$0xff]  ;;  %v7674_v36 = vld [vmem:[#allocation76_spill] sm:$0xff] }
 0x34f   :  { %v1925_v24 = vmul.f32 %v7672_v55, %v1923_v1  ;;  %v7678_v55 = vld [vmem:[#allocation93_spill] sm:$0xff]  ;;  %v2942_v15 = vld [vmem:[%s7055_s5 + $0x60] sm:$0xff] }
 0x350   :  { %v2853_v59 = vrot.slane %v2832_v28, 1  ;;  %v2252_v27 = vpop.permute.xlu1 %2251 }
 0x351   :  { %v2279_v52 = vmul.f32 %v2252_v27, %v7668_v50  ;;  %4029 = vset.pattern.permute.xlu1 %v7651_v56  ;;  %3821 = vmatpush1.bf16.msra.mxu0 %v3820_v31  ;;  %v7675_v27 = vld [vmem:[#allocation127_spill] sm:$0xff] }
 0x352   :  { %v2854_v21 = vsel %vm187_vm7, %v2853_v59, %v2852_v61  ;;  %2491 = vperm.xlu1 %4029, %v4099_v48   ;;  %3822 = vmatprep.subr.bf16.mxu0 %v7669_v47  ;;  %v2913_v59 = vld [vmem:[%s7054_s4 + $0x8] sm:$0xff]  ;;  %v7676_v48 = vld [vmem:[#allocation85_spill] sm:$0xff] }
 0x353   :  { %v2856_v44 = vmul.f32 %v7670_v53, %v2854_v21  ;;  %v6730_v8 = vadd.f32 %v2319_v40, %v2279_v52  ;;  %v3853_v1 = vpack.c.bf16 %v2913_v59, %v2912_v23  ;;  %v2938_v40 = vld [vmem:[%s7055_s5 + $0x40] sm:$0xff]  ;;  %v2939_v50 = vld [vmem:[%s7055_s5 + $0x48] sm:$0xff]  ;;  %v1926_v21 = vadd.f32 %v6741_v38, %v1925_v24  ;;  %v7680_v59 = vld [vmem:[#allocation152_spill] sm:$0xff] }
 0x354   :  { %v2256_v61 = vpop.permute.xlu1 %2255  ;;  %v2237_v53 = vmul.f32 %v7676_v48, %v2235_v54  ;;  %v2914_v54 = vld [vmem:[%s7054_s4 + $0x10] sm:$0xff]  ;;  %v2943_v23 = vld [vmem:[%s7055_s5 + $0x68] sm:$0xff]  ;;  %v2945_v48 = vld [vmem:[%s7055_s5 + $0x78] sm:$0xff] }
 0x355   :  { %v2857_v20 = vadd.f32 %v6741_v38, %v2856_v44  ;;  %v2280_v58 = vmul.f32 %v2256_v61, %v7673_v39  ;;  %3854 = vmatpush3.bf16.msra.mxu1 %v3853_v1  ;;  %v7677_v44 = vld [vmem:[#allocation151_spill] sm:$0xff]  ;;  %v3829_v61 = vpack.c.bf16 %v2939_v50, %v2938_v40  ;;  %v2918_v40 = vld [vmem:[%s7054_s4 + $0x30] sm:$0xff]  ;;  %v2919_v50 = vld [vmem:[%s7054_s4 + $0x38] sm:$0xff] }
 0x356   :  { %4030 = vset.pattern.permute.xlu1 %v7605_v45  ;;  %v2935_v45 = vld [vmem:[%s7055_s5 + $0x28] sm:$0xff]  ;;  %3855 = vmatprep.subr.bf16.mxu1 %v7669_v47  ;;  %v2321_v33 = vmul.f32 %v7677_v44, %v7523_v49  ;;  %v2940_v49 = vld [vmem:[%s7055_s5 + $0x50] sm:$0xff] }
 0x357   :  { %2455 = vperm.xlu1 %4030, %v4101_v9   ;;  %v2858_v34 = vmax.f32 %v2857_v20, 0.0  ;;  %v3823_v12 = vpack.c.bf16 %v2935_v45, %v2934_v22  ;;  %v2915_v20 = vld [vmem:[%s7054_s4 + $0x18] sm:$0xff]  ;;  %v2921_v44 = vld [vmem:[%s7054_s4 + $0x48] sm:$0xff] }
 0x359   :  { %v2296_v7 = vpop.permute.xlu1 %2295  ;;  %2860 = vrot.lane.b32.xlu0 %v2858_v34, %s4169_s2  ;;  %3824 = vmatpush1.bf16.msra.mxu0 %v3823_v12  ;;  %v2941_v34 = vld [vmem:[%s7055_s5 + $0x58] sm:$0xff] }
 0x35a   :  { %v2320_v28 = vmul.f32 %v2296_v7, %v7674_v36  ;;  %3825 = vmatprep.subr.bf16.mxu0 %v7669_v47  ;;  %v3832_v22 = vpack.c.bf16 %v2941_v34, %v2940_v49  ;;  %v2917_v36 = vld [vmem:[%s7054_s4 + $0x28] sm:$0xff]  ;;  %v2923_v34 = vld [vmem:[%s7054_s4 + $0x58] sm:$0xff] }
 0x35b   :  { %2459 = vperm.xlu1 %4030, %v7675_v27   ;;  %v7681_v49 = vld [vmem:[#allocation87_spill] sm:$0xff] }
 0x35c   :  { %v6772_v41 = vadd.f32 %v2320_v28, %v2280_v58  ;;  %v2916_v58 = vld [vmem:[%s7054_s4 + $0x20] sm:$0xff] }
 0x35d   :  { %3827 = vmatpush1.bf16.msra.mxu0 %v3826_v57  ;;  %v3859_v12 = vpack.c.bf16 %v2917_v36, %v2916_v58  ;;  %v3835_v57 = vpack.c.bf16 %v2943_v23, %v2942_v15  ;;  %v7683_v36 = vld [vmem:[#allocation61_spill] sm:$0xff]  ;;  %v2925_v23 = vld [vmem:[%s7054_s4 + $0x68] sm:$0xff] }
 0x35e   :  { %v2260_v52 = vpop.permute.xlu1 %2259  ;;  %3828 = vmatprep.subr.bf16.mxu0 %v7669_v47 }
 0x35f   :  { %v2281_v30 = vmul.f32 %v2260_v52, %v7526_v19  ;;  %4031 = vset.pattern.permute.xlu1 %v7651_v56  ;;  %v1927_v19 = vmax.f32 %v1926_v21, 0.0  ;;  %v2238_v56 = vadd.f32 %v6741_v38, %v2237_v53  ;;  %v2944_v52 = vld [vmem:[%s7055_s5 + $0x70] sm:$0xff]  ;;  %v2920_v53 = vld [vmem:[%s7054_s4 + $0x40] sm:$0xff] }
 0x360   :  { %2503 = vperm.xlu1 %4031, %v4101_v9   ;;  %v3856_v9 = vpack.c.bf16 %v2915_v20, %v2914_v54  ;;  %v2248_v20 = vpop.permute.xlu0 %2247 }
 0x361   :  { %v6788_v31 = vadd.f32 %v2321_v33, %v2281_v30  ;;  %3830 = vmatpush1.bf16.msra.mxu0 %v3829_v61  ;;  %v2239_v45 = vmax.f32 %v2238_v56, 0.0  ;;  %v3838_v33 = vpack.c.bf16 %v2945_v48, %v2944_v52  ;;  %v2946_v30 = vld [vmem:[%s7055_s5 + $0x80] sm:$0xff]  ;;  %v2947_v61 = vld [vmem:[%s7055_s5 + $0x88] sm:$0xff]  ;;  %v3865_v56 = vpack.c.bf16 %v2921_v44, %v2920_v53  ;;  %v7687_v48 = vld [vmem:[#allocation13_spill] sm:$0xff] }
 0x362   :  { %3831 = vmatprep.subr.bf16.mxu0 %v7669_v47  ;;  %3857 = vmatpush3.bf16.msra.mxu1 %v3856_v9  ;;  %v2922_v9 = vld [vmem:[%s7054_s4 + $0x50] sm:$0xff]  ;;  %v7688_v44 = vld [vmem:[#allocation17_spill] sm:$0xff] }
 0x363   :  { %v2288_v7 = vpop.permute.xlu1 %2287  ;;  %3858 = vmatprep.subr.bf16.mxu1 %v7669_v47 }
 0x364   :  { %1929 = vrot.lane.b32.xlu1 %v1927_v19, %s4170_s27 }
 0x365   :  { %3833 = vmatpush1.bf16.msra.mxu0 %v3832_v22  ;;  %v3841_v22 = vpack.c.bf16 %v2947_v61, %v2946_v30  ;;  %v2950_v61 = vld [vmem:[%s7055_s5 + $0xa0] sm:$0xff] }
 0x366   :  { %3834 = vmatprep.subr.bf16.mxu0 %v7669_v47  ;;  %3860 = vmatpush3.bf16.msra.mxu1 %v3859_v12  ;;  %v3868_v12 = vpack.c.bf16 %v2923_v34, %v2922_v9  ;;  %v7690_v9 = vld [vmem:[#allocation15_spill] sm:$0xff] }
 0x367   :  { %3861 = vmatprep.subr.bf16.mxu1 %v7669_v47 }
 0x368   :  { %v2340_v51 = vpop.permute.xlu1 %2339  ;;  %2241 = vrot.lane.b32.xlu1 %v2239_v45, %s4171_s28 }
 0x369   :  { %v2367_v24 = vmul.f32 %v2340_v51, %v7678_v55  ;;  %3836 = vmatpush1.bf16.msra.mxu0 %v3835_v57  ;;  %v2948_v51 = vld [vmem:[%s7055_s5 + $0x90] sm:$0xff]  ;;  %v2949_v55 = vld [vmem:[%s7055_s5 + $0x98] sm:$0xff] }
 0x36a   :  { %3837 = vmatprep.subr.bf16.mxu0 %v7669_v47  ;;  %v3844_v30 = vpack.c.bf16 %v2949_v55, %v2948_v51  ;;  %v7691_v51 = vld [vmem:[#allocation16_spill] sm:$0xff] }
 0x36b   :  { %v6809_v39 = vadd.f32 %v2367_v24, %v6730_v8  ;;  %v7679_v8 = vld [vmem:[#allocation79_spill] sm:$0xff]  ;;  %v7682_v24 = vld [vmem:[#allocation60_spill] sm:$0xff] }
 0x36c   :  { %v2322_v27 = vmul.f32 %v7680_v59, %v7679_v8  ;;  %v2278_v58 = vmul.f32 %v2248_v20, %v7682_v24  ;;  %v4102_v8 = vld [vmem:[%s7050_s0 + $0xd] sm:$0x1]  ;;  %v7684_v59 = vld [vmem:[#allocation10_spill] sm:$0xff] }
 0x36d   :  { %v2264_v28 = vpop.permute.xlu1 %2263  ;;  %3839 = vmatpush1.bf16.msra.mxu0 %v3838_v33  ;;  %v2904_v33 = vmul.f32 0.16666667, %v7688_v44  ;;  %v4106_v20 = vld [vmem:[%s7050_s0 + $0x2d] sm:$0x1] }
 0x36e   :  { %v2282_v1 = vmul.f32 %v2264_v28, %v7519_v3  ;;  %v3862_v3 = vpack.c.bf16 %v2919_v50, %v2918_v40  ;;  %3840 = vmatprep.subr.bf16.mxu0 %v7669_v47  ;;  %v2318_v28 = vmul.f32 %v2288_v7, %v7683_v36  ;;  %v4103_v7 = vld [vmem:[%s7050_s0 + $0x15] sm:$0x1]  ;;  %v4104_v40 = vld [vmem:[%s7050_s0 + $0x1d] sm:$0x1] }
 0x36f   :  { %v7686_v50 = vld [vmem:[#allocation12_spill] sm:$0xff] }
 0x370   :  { %v6835_v21 = vadd.f32 %v2322_v27, %v2282_v1  ;;  %3863 = vmatpush3.bf16.msra.mxu1 %v3862_v3  ;;  %v2897_v27 = vadd.f32 %v4102_v8, %v7684_v59  ;;  %v7685_v1 = vld [vmem:[#allocation11_spill] sm:$0xff]  ;;  %v2899_v52 = vadd.f32 %v4104_v40, %v7686_v50  ;;  %v4105_v3 = vld [vmem:[%s7050_s0 + $0x25] sm:$0x1] }
 0x371   :  { %3864 = vmatprep.subr.bf16.mxu1 %v7669_v47  ;;  %v2898_v57 = vadd.f32 %v4103_v7, %v7685_v1  ;;  %v2900_v53 = vadd.f32 %v4105_v3, %v7687_v48  ;;  %3842 = vmatpush1.bf16.msra.mxu0 %v3841_v22  ;;  %v4108_v22 = vld [vmem:[%s7050_s0 + $0x3d] sm:$0x1] }
 0x372   :  { %v2344_v54 = vpop.permute.xlu1 %2343  ;;  %3843 = vmatprep.subr.bf16.mxu0 %v7669_v47  ;;  %v2903_v55 = vadd.f32 %v4108_v22, %v7691_v51  ;;  %v2905_v24 = vmul.f32 0.16666667, %v2897_v27  ;;  %v2907_v8 = vmul.f32 0.16666667, %v2899_v52  ;;  %v2926_v27 = vld [vmem:[%s7054_s4 + $0x70] sm:$0xff] }
 0x373   :  { %v2368_v19 = vmul.f32 %v2344_v54, %v7681_v49  ;;  %v2951_v54 = vld [vmem:[%s7055_s5 + $0xa8] sm:$0xff]  ;;  %v7689_v49 = vld [vmem:[#allocation14_spill] sm:$0xff]  ;;  %v2906_v36 = vmul.f32 0.16666667, %v2898_v57  ;;  %v2908_v7 = vmul.f32 0.16666667, %v2900_v53  ;;  %v2326_v57 = vadd.f32 %v2318_v28, %v2278_v58 }
 0x374   :  { %3866 = vmatpush3.bf16.msra.mxu1 %v3865_v56  ;;  %v4107_v56 = vld [vmem:[%s7050_s0 + $0x35] sm:$0x1]  ;;  %v2911_v50 = vmul.f32 0.16666667, %v2903_v55  ;;  %v3036_v3 = vrot.slane %v2905_v24, 7  ;;  %v3040_v44 = vrot.slane %v2907_v8, 5 }
 0x375   :  { %v6863_v45 = vadd.f32 %v2368_v19, %v6772_v41  ;;  %v2924_v41 = vld [vmem:[%s7054_s4 + $0x60] sm:$0xff]  ;;  %3867 = vmatprep.subr.bf16.mxu1 %v7669_v47  ;;  %v2901_v19 = vadd.f32 %v4106_v20, %v7689_v49  ;;  %v2902_v34 = vadd.f32 %v4107_v56, %v7690_v9  ;;  %v3038_v48 = vrot.slane %v2906_v36, 6  ;;  %3845 = vmatpush1.bf16.msra.mxu0 %v3844_v30  ;;  %v2952_v53 = vld [vmem:[%s7055_s5 + $0xb0] sm:$0xff]  ;;  %v2953_v30 = vld [vmem:[%s7055_s5 + $0xb8] sm:$0xff] }
 0x376   :  { %v3871_v59 = vpack.c.bf16 %v2925_v23, %v2924_v41  ;;  %v3847_v49 = vpack.c.bf16 %v2951_v54, %v2950_v61  ;;  %v2927_v41 = vld [vmem:[%s7054_s4 + $0x78] sm:$0xff]  ;;  %v3042_v23 = vrot.slane %v2908_v7, 4  ;;  %3846 = vmatprep.subr.bf16.mxu0 %v7669_v47  ;;  %v3037_v61 = vsel %vm169_vm1, %v3036_v3, %v2904_v33  ;;  %v3130_v55 = vld [vmem:[#allocation3] sm:$0xff]  ;;  %v3132_v3 = vld [vmem:[#allocation3 + $0x10] sm:$0xff] }
 0x377   :  { %v6874_v15 = vpop.permute.xlu1 %2307  ;;  %v2909_v1 = vmul.f32 0.16666667, %v2901_v19  ;;  %v2910_v40 = vmul.f32 0.16666667, %v2902_v34  ;;  %v3039_v19 = vsel %vm172_vm2, %v3038_v48, %v3037_v61  ;;  %v3874_v58 = vpack.c.bf16 %v2927_v41, %v2926_v27  ;;  %v3131_v24 = vld [vmem:[#allocation3 + $0x8] sm:$0xff]  ;;  %v3133_v48 = vld [vmem:[#allocation3 + $0x18] sm:$0xff]  ;;  %v6950_v27 = vpop.permute.xlu0 %2267 }
 0x378   :  { %3869 = vmatpush3.bf16.msra.mxu1 %v3868_v12  ;;  %v7692_v12 = vld [vmem:[#allocation78_spill] sm:$0xff]  ;;  %v3041_v28 = vsel %vm175_vm3, %v3040_v44, %v3039_v19  ;;  %v3048_v34 = vrot.slane %v2911_v50, 1  ;;  %v3850_v22 = vpack.c.bf16 %v2953_v30, %v2952_v53  ;;  %v7693_v8 = vld [vmem:[#allocation105_spill] sm:$0xff]  ;;  %v3137_v61 = vld [vmem:[#allocation3 + $0x38] sm:$0xff] }
 0x379   :  { %3870 = vmatprep.subr.bf16.mxu1 %v7669_v47  ;;  %v3044_v54 = vrot.slane %v2909_v1, 3  ;;  %v3046_v56 = vrot.slane %v2910_v40, 2  ;;  %3848 = vmatpush1.bf16.msra.mxu0 %v3847_v49  ;;  %v3043_v51 = vsel %vm178_vm4, %v3042_v23, %v3041_v28  ;;  %v3877_v40 = vpack.c.bf16 %v3131_v24, %v3130_v55 }
 0x37a   :  { %3849 = vmatprep.subr.bf16.mxu0 %v7669_v47  ;;  %v3880_v23 = vpack.c.bf16 %v3133_v48, %v3132_v3 }
 0x37b   :  { %v3045_v36 = vsel %vm181_vm5, %v3044_v54, %v3043_v51  ;;  %v6959_v54 = vpop.permute.xlu0 %2275  ;;  %v3141_v51 = vld [vmem:[#allocation3 + $0x58] sm:$0xff] }
 0x37c   :  { %v2336_v20 = vpop.permute.xlu1 %2335  ;;  %3872 = vmatpush3.bf16.msra.mxu1 %v3871_v59  ;;  %v3047_v59 = vsel %vm184_vm6, %v3046_v56, %v3045_v36  ;;  %v3138_v56 = vld [vmem:[#allocation3 + $0x40] sm:$0xff] }
 0x37d   :  { %v2366_v52 = vmul.f32 %v2336_v20, %v7692_v12  ;;  %3873 = vmatprep.subr.bf16.mxu1 %v7669_v47  ;;  %v3049_v1 = vsel %vm187_vm7, %v3048_v34, %v3047_v59  ;;  %3851 = vmatpush1.bf16.msra.mxu0 %v3850_v22  ;;  %v7694_v20 = vld [vmem:[#allocation154_spill] sm:$0xff]  ;;  %v3135_v12 = vld [vmem:[#allocation3 + $0x28] sm:$0xff] }
 0x37e   :  { %v2324_v49 = vmul.f32 %v7694_v20, %v7576_v0  ;;  %v3136_v0 = vld [vmem:[#allocation3 + $0x30] sm:$0xff] }
 0x37f   :  { %v6936_v9 = vadd.f32 %v2366_v52, %v2326_v57  ;;  %v7695_v57 = vmov 0.0   ;;  %v2348_v28 = vpop.permute.xlu0 %2347  ;;  %v3140_v22 = vld [vmem:[#allocation3 + $0x50] sm:$0xff] }
 0x380   :  { %3875 = vmatpush3.bf16.msra.mxu1 %v3874_v58  ;;  %v3139_v58 = vld [vmem:[#allocation3 + $0x48] sm:$0xff]  ;;  %v3892_v24 = vpack.c.bf16 %v3141_v51, %v3140_v22  ;;  %v7699_v22 = vld [vmem:[#allocation118_spill] sm:$0xff] }
 0x381   :  { %v2388_v33 = vpop.permute.xlu1 %2387  ;;  %3876 = vmatprep.subr.bf16.mxu1 %v7669_v47  ;;  %v3889_v34 = vpack.c.bf16 %v3139_v58, %v3138_v56 }
 0x382   :  { %v2415_v7 = vmul.f32 %v2388_v33, %v7693_v8 }
 0x383   :  { %3635 = vmatmul.mubr.f32.vlgmr.msra.gmra.mrb[6].mxu1 %v3049_v1  ;;  %v6966_v33 = vpop.permute.xlu0 %2359 }
 0x384   :  { %v2423_v50 = vadd.f32 %v2415_v7, %v6809_v39  ;;  %3878 = vmatpush3.bf16.msra.mxu1 %v3877_v40  ;;  %3669 = vmatprep.mubr.msk.f32.mxu1 %vm4161_vm0, %v7695_v57  ;;  %v3134_v39 = vld [vmem:[#allocation3 + $0x20] sm:$0xff] }
 0x385   :  { %3879 = vmatprep.subr.bf16.mxu1 %v7669_v47  ;;  %v3883_v30 = vpack.c.bf16 %v3135_v12, %v3134_v39  ;;  %v7697_v12 = vld [vmem:[#allocation113_spill] sm:$0xff] }
 0x386   :  { %v2272_v44 = vpop.permute.xlu1 %2271 }
 0x387   :  { %v2284_v41 = vmul.f32 %v2272_v44, %v7593_v26  ;;  %v3886_v26 = vpack.c.bf16 %v3137_v61, %v3136_v0  ;;  %v6969_v8 = vpop.permute.xlu0 %2363  ;;  %v7698_v0 = vld [vmem:[#allocation97_spill] sm:$0xff] }
 0x388   :  { %3881 = vmatpush3.bf16.msra.mxu1 %v3880_v23 }
 0x389   :  { %v6956_v52 = vadd.f32 %v2324_v49, %v2284_v41  ;;  %3882 = vmatprep.subr.bf16.mxu1 %v7669_v47  ;;  %v7696_v41 = vld [vmem:[#allocation86_spill] sm:$0xff] }
 0x38b   :  { %v2352_v53 = vpop.permute.xlu1 %2351  ;;  %v2432_v1 = vpop.permute.xlu0 %2431 }
 0x38c   :  { %3884 = vmatpush3.bf16.msra.mxu1 %v3883_v30  ;;  %v2462_v61 = vmul.f32 %v2432_v1, %v7698_v0 }
 0x38d   :  { %3885 = vmatprep.subr.bf16.mxu1 %v7669_v47 }
 0x38f   :  { %v2384_v3 = vpop.permute.xlu0 %2383 }
 0x390   :  { %v2392_v19 = vpop.permute.xlu1 %2391  ;;  %3887 = vmatpush3.bf16.msra.mxu1 %v3886_v26  ;;  %v2414_v23 = vmul.f32 %v2384_v3, %v7696_v41 }
 0x391   :  { %3888 = vmatprep.subr.bf16.mxu1 %v7669_v47  ;;  %v2416_v2 = vmul.f32 %v2392_v19, %v7700_v43 }
 0x392   :  { %v2422_v39 = vadd.f32 %v2414_v23, %v6936_v9  ;;  %v7702_v23 = vld [vmem:[#allocation65_spill] sm:$0xff] }
 0x393   :  { %v6971_v44 = vpop.permute.xlu0 %2407  ;;  %v2323_v1 = vmul.f32 %v6874_v15, %v7702_v23 }
 0x394   :  { %3890 = vmatpush3.bf16.msra.mxu1 %v3889_v34  ;;  %v2470_v58 = vadd.f32 %v2462_v61, %v2422_v39  ;;  %v2424_v39 = vadd.f32 %v2416_v2, %v6863_v45 }
 0x395   :  { %v6963_v55 = vpop.permute.xlu1 %2315  ;;  %3891 = vmatprep.subr.bf16.mxu1 %v7669_v47 }
 0x397   :  { %v6973_v49 = vpop.permute.xlu0 %2411 }
 0x398   :  { %3893 = vmatpush3.bf16.msra.mxu1 %v3892_v24 }
 0x399   :  { %3894 = vmatprep.subr.bf16.mxu1 %v7669_v47 }
 0x39a   :  { %v2356_v36 = vpop.permute.xlu1 %2355 }
 0x39b   :  { %v2480_v26 = vpop.permute.xlu0 %2479  ;;  %v2371_v0 = vmul.f32 %v2356_v36, %v7568_v11 }
 0x39c   :  { %v2510_v24 = vmul.f32 %v2480_v26, %v5552_v13  ;;  %v2283_v13 = vmul.f32 %v6950_v27, %v7571_v37 }
 0x39e   :  { %v2518_v38 = vadd.f32 %v2510_v24, %v2470_v58 }
 0x39f   :  { %v2396_v7 = vpop.permute.xlu1 %2395  ;;  %v2496_v61 = vpop.permute.xlu0 %2495 }
 0x3a0   :  { %v2417_v37 = vmul.f32 %v2396_v7, %v7543_v4  ;;  %v2285_v4 = vmul.f32 %v6959_v54, %v7573_v10  ;;  %v2514_v7 = vmul.f32 %v2496_v61, %v7631_v16  ;;  %v2372_v10 = vmul.f32 %v6966_v33, %v7561_v42  ;;  %v7706_v33 = vld [vmem:[#allocation40_spill] sm:$0xff] }
 0x3a4   :  { %v2436_v59 = vpop.permute.xlu1 %2435 }
 0x3a5   :  { %v2463_v30 = vmul.f32 %v2436_v59, %v7697_v12 }
 0x3a7   :  { %v2471_v34 = vadd.f32 %v2463_v30, %v2423_v50  ;;  %v7703_v50 = vld [vmem:[#allocation95_spill] sm:$0xff] }
 0x3a8   :  { %v2370_v12 = vmul.f32 %v2352_v53, %v7703_v50  ;;  %v7705_v53 = vld [vmem:[#allocation92_spill] sm:$0xff] }
 0x3a9   :  { %v2400_v40 = vpop.permute.xlu1 %2399  ;;  %v2369_v26 = vmul.f32 %v2348_v28, %v7705_v53  ;;  %v7710_v53 = vld [vmem:[#allocation112_spill] sm:$0xff] }
 0x3aa   :  { %v2378_v2 = vadd.f32 %v2370_v12, %v6835_v21  ;;  %v2500_v21 = vpop.permute.xlu0 %2499  ;;  %v2420_v12 = vmul.f32 %v6971_v44, %v7598_v18 }
 0x3ae   :  { %v2440_v48 = vpop.permute.xlu1 %2439  ;;  %v2508_v42 = vpop.permute.xlu0 %2507 }
 0x3af   :  { %v2464_v9 = vmul.f32 %v2440_v48, %v7701_v46  ;;  %v2418_v46 = vmul.f32 %v2400_v40, %v7536_v35  ;;  %v2377_v35 = vadd.f32 %v2369_v26, %v6788_v31  ;;  %v2515_v31 = vmul.f32 %v2500_v21, %v7630_v17 }
 0x3b0   :  { %v7711_v21 = vmov 0.0|0.0  }
 0x3b1   :  { %v2472_v43 = vadd.f32 %v2464_v9, %v2424_v39  ;;  %v2426_v36 = vadd.f32 %v2418_v46, %v2378_v2  ;;  %v7709_v2 = vld [vmem:[#allocation89_spill] sm:$0xff] }
 0x3b3   :  { %v2404_v20 = vpop.permute.xlu1 %2403 }
 0x3b4   :  { %v2419_v48 = vmul.f32 %v2404_v20, %v7594_v60 }
 0x3b8   :  { %v2444_v57 = vpop.permute.xlu1 %2443 }
 0x3b9   :  { %v2465_v60 = vmul.f32 %v2444_v57, %v7545_v25 }
 0x3bd   :  { %v2484_v56 = vpop.permute.xlu1 %2483 }
 0x3be   :  { %v2511_v51 = vmul.f32 %v2484_v56, %v7699_v22 }
 0x3c0   :  { %v2519_v47 = vadd.f32 %v2511_v51, %v2471_v34  ;;  %v2425_v34 = vadd.f32 %v2417_v37, %v2377_v35  ;;  %v3144_v35 = vld [vmem:[#allocation3 + $0x70] sm:$0xff] }
 0x3c2   :  { %v2534_v3 = vrot.slane %v2519_v47, 7  ;;  %v2448_v41 = vpop.permute.xlu1 %2447  ;;  %v7704_v47 = vld [vmem:[#allocation116_spill] sm:$0xff]  ;;  %v2473_v51 = vadd.f32 %v2465_v60, %v2425_v34  ;;  %v3145_v60 = vld [vmem:[#allocation3 + $0x78] sm:$0xff] }
 0x3c3   :  { %v2466_v45 = vmul.f32 %v2448_v41, %v7625_v14  ;;  %v2325_v14 = vmul.f32 %v6963_v55, %v7632_v63  ;;  %v2373_v63 = vmul.f32 %v6969_v8, %v7641_v29 }
 0x3c4   :  { %v2535_v59 = vsel %vm169_vm1, %v2534_v3, %v2518_v38  ;;  %v2331_v38 = vadd.f32 %v2323_v1, %v2283_v13  ;;  %v2380_v1 = vadd.f32 %v2372_v10, %v6956_v52 }
 0x3c5   :  { %v2474_v28 = vadd.f32 %v2466_v45, %v2426_v36  ;;  %v2333_v57 = vadd.f32 %v2325_v14, %v2285_v4  ;;  %v3142_v36 = vld [vmem:[#allocation3 + $0x60] sm:$0xff] }
 0x3c6   :  { %v2379_v56 = vadd.f32 %v2371_v0, %v2331_v38  ;;  %v2428_v0 = vadd.f32 %v2420_v12, %v2380_v1 }
 0x3c7   :  { %v2488_v30 = vpop.permute.xlu1 %2487  ;;  %v2522_v24 = vadd.f32 %v2514_v7, %v2474_v28 }
 0x3c8   :  { %v2512_v19 = vmul.f32 %v2488_v30, %v7704_v47  ;;  %v2427_v40 = vadd.f32 %v2419_v48, %v2379_v56 }
 0x3c9   :  { %v2540_v23 = vrot.slane %v2522_v24, 4 }
 0x3ca   :  { %v2520_v15 = vadd.f32 %v2512_v19, %v2472_v43  ;;  %v7707_v43 = vld [vmem:[#allocation34_spill] sm:$0xff]  ;;  %v7708_v19 = vld [vmem:[#allocation123_spill] sm:$0xff] }
 0x3cb   :  { %v2861_v37 = vpop.permute.xlu0 %2860 }
 0x3cc   :  { %v2536_v11 = vrot.slane %v2520_v15, 6  ;;  %v2452_v27 = vpop.permute.xlu1 %2451 }
 0x3cd   :  { %v2467_v58 = vmul.f32 %v2452_v27, %v7606_v5 }
 0x3ce   :  { %v2537_v20 = vsel %vm172_vm2, %v2536_v11, %v2535_v59  ;;  %v2381_v59 = vadd.f32 %v2373_v63, %v2333_v57 }
 0x3cf   :  { %v2475_v22 = vadd.f32 %v2467_v58, %v2427_v40  ;;  %v3143_v58 = vld [vmem:[#allocation3 + $0x68] sm:$0xff] }
 0x3d0   :  { %v3895_v40 = vpack.c.bf16 %v3143_v58, %v3142_v36 }
 0x3d1   :  { %v2492_v5 = vpop.permute.xlu1 %2491  ;;  %v2523_v3 = vadd.f32 %v2515_v31, %v2475_v22  ;;  %v3254_v22 = vld [vmem:[%s7056_s6] ss:$0 sm:$0xff]  ;;  %s4172_s6 = smov [#allocation6]  }
 0x3d2   :  { %v2513_v25 = vmul.f32 %v2492_v5, %v7550_v62  ;;  %v2421_v62 = vmul.f32 %v6973_v49, %v7645_v6  ;;  %v2517_v6 = vmul.f32 %v2508_v42, %v7707_v43  ;;  %3896 = vmatpush3.bf16.msra.mxu1 %v3895_v40  ;;  %s3243_s18 = sshll.u32 %s4172_s6, 4  ;;  %s3244_s18 = int_to_ptr.vmem [resolvable:$true] %s3243_s18 }
 0x3d3   :  { %v2542_v16 = vrot.slane %v2523_v3, 3  ;;  %3897 = vmatprep.subr.bf16.mxu1 %v7711_v21  ;;  %p4136_p9 = scmp.lt.s32.totalorder %s3244_s18, %s3244_s18 }
 0x3d4   :  { %v2521_v41 = vadd.f32 %v2513_v25, %v2473_v51  ;;  %v2429_v8 = vadd.f32 %v2421_v62, %v2381_v59  ;;  %v3255_v51 = vld [vmem:[%s7058_s8] ss:$0 sm:$0xff]  ;;  %s4131_s8 = scalar_lea.vmem %s3244_s18, 128 }
 0x3d5   :  { %p4132_p8 = scmp.ne.s32.totalorder %s3244_s18, %s4131_s8  ;;  %p4137_p10 = scmp.lt.s32.totalorder %s4131_s8, %s4131_s8 }
 0x3d6   :  { %v2538_v55 = vrot.slane %v2521_v41, 5  ;;  %v2456_v9 = vpop.permute.xlu1 %2455 }
 0x3d7   :  { %v2468_v30 = vmul.f32 %v2456_v9, %v7706_v33  ;;  %p4138_p11 = por %p4137_p10, %p4136_p9 }
 0x3d8   :  { %v2539_v17 = vsel %vm175_vm3, %v2538_v55, %v2537_v20  ;;  %v3898_v20 = vpack.c.bf16 %v3145_v60, %v3144_v35 }
 0x3d9   :  { %v2541_v54 = vsel %vm178_vm4, %v2540_v23, %v2539_v17  ;;  %v2476_v47 = vadd.f32 %v2468_v30, %v2428_v0  ;;  %p4139_p12 = pnand %p4138_p11, %p4132_p8 }
 0x3da   :  { %v2460_v39 = vpop.permute.xlu1 %2459  ;;  %v2543_v29 = vsel %vm181_vm5, %v2542_v16, %v2541_v54  ;;  %3899 = vmatpush3.bf16.msra.mxu1 %v3898_v20 }
 0x3db   :  { %v2469_v50 = vmul.f32 %v2460_v39, %v7654_v32 }
 0x3dd   :  { %v2477_v13 = vadd.f32 %v2469_v50, %v2429_v8 }
 0x3df   :  { %v2504_v49 = vpop.permute.xlu1 %2503  ;;  %v2525_v61 = vadd.f32 %v2517_v6, %v2477_v13 }
 0x3e0   :  { %v2516_v52 = vmul.f32 %v2504_v49, %v7708_v19 }
 0x3e1   :  { %v2546_v32 = vrot.slane %v2525_v61, 1 }
 0x3e2   :  { %v2524_v46 = vadd.f32 %v2516_v52, %v2476_v47 }
 0x3e3   :  { %v1930_v38 = vpop.permute.xlu1 %1929 }
 0x3e4   :  { %v2544_v48 = vrot.slane %v2524_v46, 2  ;;  %1933 = vst.msk [vmem:[#allocation2] sm:$0xff] %vm1932_vm11, %v1930_v38 }
 0x3e6   :  { %v2545_v18 = vsel %vm184_vm6, %v2544_v48, %v2543_v29 }
 0x3e7   :  { %v2547_v44 = vsel %vm187_vm7, %v2546_v32, %v2545_v18  ;;  %v2242_v15 = vpop.permute.xlu1 %2241 }
 0x3e8   :  { %v2549_v45 = vmul.f32 %v7709_v2, %v2547_v44  ;;  %2245 = vst.msk [vmem:[#allocation2] sm:$0xff] %vm2244_vm12, %v2242_v15 }
 0x3ea   :  { %v2550_v26 = vadd.f32 %v7710_v53, %v2549_v45 }
 0x3ec   :  { %v2551_v56 = vmax.f32 %v2550_v26, 0.0 }
 0x3ee   :  { %2552 = vst.msk [vmem:[#allocation2 + $0x8] sm:$0xff] %vm1308_vm9, %v2551_v56 }
 0x3ef   :  { %2863 = vst.msk [vmem:[#allocation2 + $0x8] sm:$0xff] %vm1620_vm10, %v2861_v37  ;;  %v2928_v27 = vld [vmem:[#allocation2] sm:$0xff] }
 0x3f6   :  { %v2929_v11 = vld [vmem:[#allocation2 + $0x8] sm:$0xff] }
 0x3f7   :  { %3253 = vmatprep.mubr.msk.f32.mxu0 %vm2954_vm13, %v2929_v11 }
 0x3f8   :  { %3023 = vmatmul.mubr.f32.vlgmr.msra.gmra.mrb[6].mxu0 %v2928_v27 }
 0x456   :  { %v3117_v14 = vpop.f32.mrb[6].mxu1 }
 0x457   :  { %v3636_v28 = vpop.f32.mrb[7].mxu1 }
 0x4cb   :  { %v3024_v34 = vpop.f32.mrb[6].mxu0 }
 0x4cc   :  { %v3118_v4 = vadd.f32 %v3117_v14, %v3024_v34  ;;  %v3026_v7 = vpop.f32.mrb[7].mxu0 }
 0x4ce   :  { %v3128_v5 = vadd.f32 %v3254_v22, %v3118_v4 }
 0x4d0   :  { %v3129_v31 = vmax.f32 %v3128_v5, 0.0 }
 0x4d2   :  { %3670 = vmatmul.mubr.f32.vlgmr.msra.gmra.mrb[8].mxu1 %v3129_v31 }
 0x5a5   :  { %v3219_v25 = vpop.f32.mrb[8].mxu1 }
 0x5a6   :  { %v3220_v57 = vadd.f32 %v3255_v51, %v3219_v25  ;;  %v3671_v24 = vpop.f32.mrb[9].mxu1 }
 0x5a8   :  { %v3223_v3 = vmul.f32 %v3220_v57, %v3220_v57 }
 0x5aa   :  { %3224 = vadd.xlane.f32.xlu0 %v3223_v3 }
 0x637   :  { %v3225_v41 = vpop.xlane.xlu0 %3224 }
 0x638   :  { %4044 = vrsqrt.f32 %v3225_v41  ;;  %vm3228_vm14 = vcmp.eq.f32.partialorder %v3225_v41, inf  ;;  %v3231_v9 = vand.u32 2147483648, %v3225_v41  ;;  %vm3230_vm15 = vcmp.eq.f32.partialorder %v3225_v41, 0.0 }
 0x642   :  { %v4045_v63 = vpop.eup %4044 }
 0x643   :  { %v3227_v55 = vmul.f32 %v4045_v63, %v3225_v41 }
 0x645   :  { %v3229_v59 = vsel %vm3228_vm14, %v3225_v41, %v3227_v55 }
 0x646   :  { %v3232_v23 = vsel %vm3230_vm15, %v3231_v9, %v3229_v59 }
 0x647   :  { %v3233_v10 = vmax.f32 %v3232_v23, 1e-12 }
 0x649   :  { %4046 = vrcp.f32 %v3233_v10 }
 0x653   :  { %v4047_v16 = vpop.eup %4046 }
 0x654   :  { %v3235_v17 = vmul.f32 %v4047_v16, %v3220_v57 }
 0x656   :  { %3236 = vst [vmem:[#allocation6] sm:$0xff] %v3235_v17 }
 0x657   :  { %4142 = shalt.err (!%p4139_p12)
}
 0x658   :  { %s4143_s21 = scalar_lea.hbm %s7059_s9, 128 }
 0x659   :  { %p4144_p13 = scmp.ne.s32.totalorder %s7059_s9, %s4143_s21  ;;  %p4147_p0 = scmp.lt.u32.totalorder %s4143_s21, %s7059_s9 }
 0x65b   :  { %p4149_p1 = pnand %p4147_p0, %p4144_p13 }
 0x65d   :  { %4152 = shalt.err (!%p4149_p1)
}
 0x65e   :  { %3246 = dma.vmem_to_hbm [thread:$0]  %s3244_s18, 128, %s7059_s9, [#allocation5]  }
 0x65f   :  { %4155 = dma.done.wait [#allocation5], 128  }
 0x660   :  { %4156 = vsyncadd [#allocation5], 4294967168 }
 0x661   :  { %3250 = vsyncpa [#allocation4], 1 }
 0x662   :  { %3251 = vsyncpa [#allocation5], 1 }

</bundles_post_ra>
